<compile_context>
chip_gen: v7x
topology: tpu7x:2x2x1
jax: 0.10.0
libtpu: 0.0.40
codegen_flags: <defaults>
</compile_context>

<pallas_src>
import functools

import jax
import jax.numpy as jnp
from jax.experimental import pallas as pl
from jax.experimental.pallas import tpu as pltpu


# ---------------------------------------------------------------------------
# Kernel 1: complex field construction fused with FFT zero-padding
#   ur = amp*cos(phs), ui = amp*sin(phs), written into the center of a
#   zero-initialized (1, C, Hp, Wp) block.
# ---------------------------------------------------------------------------
def field_pad_kernel(amp_ref, phs_ref, ur_ref, ui_ref, *, pad):
    a = amp_ref[...]                      # (1, C, H, W)
    p = phs_ref[...]
    H, W = a.shape[-2], a.shape[-1]
    ur_ref[...] = jnp.zeros_like(ur_ref)  # zero border (FFT pad)
    ui_ref[...] = jnp.zeros_like(ui_ref)
    ur_ref[:, :, pad:pad + H, pad:pad + W] = a * jnp.cos(p)
    ui_ref[:, :, pad:pad + H, pad:pad + W] = a * jnp.sin(p)


def make_padded_field(amp, phs, pad):
    B, C, H, W = amp.shape
    Hp, Wp = H + 2 * pad, W + 2 * pad
    out_sh = jax.ShapeDtypeStruct((B, C, Hp, Wp), jnp.float32)
    return pl.pallas_call(
        functools.partial(field_pad_kernel, pad=pad),
        out_shape=(out_sh, out_sh),
        grid=(B,),
        in_specs=[
            pl.BlockSpec((1, C, H, W), lambda b: (b, 0, 0, 0)),
            pl.BlockSpec((1, C, H, W), lambda b: (b, 0, 0, 0)),
        ],
        out_specs=(
            pl.BlockSpec((1, C, Hp, Wp), lambda b: (b, 0, 0, 0)),
            pl.BlockSpec((1, C, Hp, Wp), lambda b: (b, 0, 0, 0)),
        ),
        compiler_params=pltpu.CompilerParams(dimension_semantics=("parallel",)),
    )(amp, phs)


# ---------------------------------------------------------------------------
# Kernel 2: fused  part1(real) + part1(imag) + bias  ->  |.| -> per-(b,c) max
#           normalize -> angle -> acos -> checkerboard double-phase encode.
# One program per batch element; channel loop (C is tiny) inside the kernel.
# Zero padding for the 3x3 conv is staged in VMEM scratch (no host jnp.pad).
# ---------------------------------------------------------------------------
def conv_dp_kernel(w_ref, b_ref, re_ref, im_ref, sign_ref, poh_ref,
                   pre_ref, pim_ref):
    # w_ref:   SMEM (C*9,)  flattened symmetric depthwise kernels
    # b_ref:   SMEM (C,)    bias
    # re_ref/im_ref: VMEM (1, C, H, W)
    # sign_ref: VMEM (H, W)  = checkerboard_mask_1 - checkerboard_mask_2
    # poh_ref:  VMEM (1, C, H, W)
    # pre_ref/pim_ref: VMEM scratch (1, C, H+2, W+2)
    C = re_ref.shape[1]
    H = re_ref.shape[2]
    W = re_ref.shape[3]

    # zero-padded staging copies in VMEM (replaces the host-side jnp.pad)
    pre_ref[...] = jnp.zeros_like(pre_ref)
    pim_ref[...] = jnp.zeros_like(pim_ref)
    pre_ref[:, :, 1:1 + H, 1:1 + W] = re_ref[...]
    pim_ref[:, :, 1:1 + H, 1:1 + W] = im_ref[...]

    sign = sign_ref[...]                                   # (H, W)

    for c in range(C):                                     # C is small & static
        mr = jnp.zeros((H, W), jnp.float32)
        mi = jnp.zeros((H, W), jnp.float32)
        for ky in range(3):
            for kx in range(3):
                wv = w_ref[c * 9 + ky * 3 + kx]            # SMEM scalar
                mr = mr + wv * pre_ref[0, c, ky:ky + H, kx:kx + W]
                mi = mi + wv * pim_ref[0, c, ky:ky + H, kx:kx + W]
        bias = b_ref[c]
        mr = mr + bias
        mi = mi + bias

        # amplitude_normalizor: per-(batch, channel) spatial max normalization
        mag = jnp.sqrt(mr * mr + mi * mi)
        mx = jnp.max(mag, axis=(-2, -1), keepdims=True)    # (1, 1)
        inv = pl.reciprocal(jnp.maximum(mx, 1e-12), approx=True)
        amp = jnp.minimum(mag * inv, 1.0)                  # clamp (approx recip)
        phs = jnp.arctan2(mi, mr)                          # torch.angle
        # acos(x) == atan2(sqrt(1-x^2), x), exact for x in [0, 1]
        acos_amp = jnp.arctan2(jnp.sqrt(jnp.maximum(1.0 - amp * amp, 0.0)), amp)

        # POH = m1*(phs+acos) + m2*(phs-acos) = phs + (m1-m2)*acos
        poh_ref[0, c, :, :] = phs + sign * acos_amp


def conv_double_phase(cre, cim, w_flat, bias, sign):
    B, C, H, W = cre.shape
    return pl.pallas_call(
        conv_dp_kernel,
        out_shape=jax.ShapeDtypeStruct((B, C, H, W), jnp.float32),
        grid=(B,),
        in_specs=[
            pl.BlockSpec(memory_space=pltpu.MemorySpace.SMEM),     # weights
            pl.BlockSpec(memory_space=pltpu.MemorySpace.SMEM),     # bias
            pl.BlockSpec((1, C, H, W), lambda b: (b, 0, 0, 0)),    # real part
            pl.BlockSpec((1, C, H, W), lambda b: (b, 0, 0, 0)),    # imag part
            pl.BlockSpec((H, W), lambda b: (0, 0)),                # checkerboard sign
        ],
        out_specs=pl.BlockSpec((1, C, H, W), lambda b: (b, 0, 0, 0)),
        scratch_shapes=[
            pltpu.VMEM((1, C, H + 2, W + 2), jnp.float32),
            pltpu.VMEM((1, C, H + 2, W + 2), jnp.float32),
        ],
        compiler_params=pltpu.CompilerParams(dimension_semantics=("parallel",)),
    )(w_flat, bias, cre, cim, sign)


# ---------------------------------------------------------------------------
# Full forward pass
# ---------------------------------------------------------------------------
def ap2poh_forward(amp_z, phs_z, w_flat, bias, Hc, sign, *, pad):
    B, C, H, W = amp_z.shape

    # propagator.propagate_AP2C_backward
    ur, ui = make_padded_field(amp_z, phs_z, pad)          # Pallas kernel 1
    # TODO(synk): FFT/IFFT have no clean Pallas equivalent; the transfer-function
    # multiply is kept in jnp so XLA fuses it with fft2/ifft2 (per perf review).
    u = jnp.fft.ifft2(jnp.fft.fft2(ur + 1j * ui) * Hc[None])
    u = u[:, :, pad:pad + H, pad:pad + W]                  # cropping
    cre = jnp.real(u).astype(jnp.float32)
    cim = jnp.imag(u).astype(jnp.float32)

    # part1(real), part1(imag), bias, normalize, angle, double-phase — one kernel
    poh = conv_double_phase(cre, cim, w_flat, bias, sign)  # Pallas kernel 2
    return poh


# ---------------------------------------------------------------------------
# Deterministic parameter / constant setup
# ---------------------------------------------------------------------------
def init_params(C, H, W, pad, pixel_pitch=3.74e-6,
                wave_length=(6.38e-7, 5.2e-7, 4.5e-7), distance=1e-3):
    # part1: depthwise symmetric 3x3 conv, xavier_normal-style init, zero bias.
    # TODO(synk): exact ChannelWiseSymmetricConv definition unavailable; assumed
    # depthwise conv with kernel symmetrized over horizontal/vertical flips.
    std = (2.0 / (9 + 9)) ** 0.5
    w = jax.random.normal(jax.random.PRNGKey(42), (C, 3, 3), jnp.float32) * std
    w = (w + w[:, ::-1, :] + w[:, :, ::-1] + w[:, ::-1, ::-1]) / 4.0
    w_flat = w.reshape(-1).astype(jnp.float32)
    bias = jnp.zeros((C,), jnp.float32)

    # backward angular-spectrum transfer function (conjugate/backward ASM)
    Hp, Wp = H + 2 * pad, W + 2 * pad
    fy = jnp.fft.fftfreq(Hp, d=pixel_pitch)
    fx = jnp.fft.fftfreq(Wp, d=pixel_pitch)
    FY, FX = jnp.meshgrid(fy, fx, indexing="ij")
    lam = jnp.asarray(wave_length, jnp.float32)[:, None, None]
    arg = 1.0 - (lam * FX) ** 2 - (lam * FY) ** 2
    kz = 2.0 * jnp.pi / lam * jnp.sqrt(jnp.maximum(arg, 0.0))
    phase = -kz * distance
    Hr = jnp.where(arg > 0, jnp.cos(phase), 0.0).astype(jnp.float32)
    Hi = jnp.where(arg > 0, jnp.sin(phase), 0.0).astype(jnp.float32)
    Hc = (Hr + 1j * Hi).astype(jnp.complex64)

    # checkerboard masks (block size 1); sign = mask1 - mask2
    ii = jnp.arange(H)[:, None]
    jj = jnp.arange(W)[None, :]
    m1 = ((ii + jj) % 2 == 0).astype(jnp.float32)
    sign = 2.0 * m1 - 1.0
    return w_flat, bias, Hc, sign


if __name__ == "__main__":
    B, C, H, W = 2, 3, 16, 16        # small shapes; module default is (1, C, 192, 192)
    pad = 8                          # per-side zero pad -> 32x32 FFT plane
    key = jax.random.PRNGKey(0)
    k1, k2 = jax.random.split(key)
    amp_z = jax.random.uniform(k1, (B, C, H, W), jnp.float32)
    phs_z = (jax.random.uniform(k2, (B, C, H, W), jnp.float32) * 2.0 - 1.0) * jnp.pi

    w_flat, bias, Hc, sign = init_params(C, H, W, pad)

    fwd = jax.jit(functools.partial(ap2poh_forward, pad=pad))
    poh = fwd(amp_z, phs_z, w_flat, bias, Hc, sign)
    jax.block_until_ready(poh)
    assert poh.shape == (B, C, H, W) and poh.dtype == jnp.float32
    assert bool(jnp.all(jnp.isfinite(poh)))
    print("KERNEL_OK")
</pallas_src>

<mosaic_0001>
module attributes {stable_mosaic.version = 11 : i64} {
  func.func @field_pad_kernel(%arg0: i32, %arg1: memref<1x3x16x16xf32, #tpu.memory_space<vmem>>, %arg2: memref<1x3x16x16xf32, #tpu.memory_space<vmem>>, %arg3: memref<1x3x32x32xf32, #tpu.memory_space<vmem>>, %arg4: memref<1x3x32x32xf32, #tpu.memory_space<vmem>>) attributes {dimension_semantics = [#tpu.dimension_semantics<parallel>], iteration_bounds = array<i64: 2>, scalar_prefetch = 0 : i64, scratch_operands = 0 : i64, tpu.core_type = #tpu.core_type<tc>, window_params = [{transform_indices = @transform_0, window_bounds = array<i64: 1, 3, 16, 16>}, {transform_indices = @transform_1, window_bounds = array<i64: 1, 3, 16, 16>}, {transform_indices = @transform_2, window_bounds = array<i64: 1, 3, 32, 32>}, {transform_indices = @transform_3, window_bounds = array<i64: 1, 3, 32, 32>}]} {
    %c0 = arith.constant 0 : index
    %c0_0 = arith.constant 0 : index
    %c0_1 = arith.constant 0 : index
    %c0_2 = arith.constant 0 : index
    %0 = vector.load %arg1[%c0, %c0_0, %c0_1, %c0_2] : memref<1x3x16x16xf32, #tpu.memory_space<vmem>>, vector<1x3x16x16xf32>
    %c0_3 = arith.constant 0 : index
    %c0_4 = arith.constant 0 : index
    %c0_5 = arith.constant 0 : index
    %c0_6 = arith.constant 0 : index
    %1 = vector.load %arg2[%c0_3, %c0_4, %c0_5, %c0_6] : memref<1x3x16x16xf32, #tpu.memory_space<vmem>>, vector<1x3x16x16xf32>
    %cst = arith.constant 0.000000e+00 : f32
    %2 = vector.broadcast %cst : f32 to vector<1x3x32x32xf32>
    %c0_7 = arith.constant 0 : index
    %c0_8 = arith.constant 0 : index
    %c0_9 = arith.constant 0 : index
    %c0_10 = arith.constant 0 : index
    %3 = vector.load %arg3[%c0_7, %c0_8, %c0_9, %c0_10] : memref<1x3x32x32xf32, #tpu.memory_space<vmem>>, vector<1x3x32x32xf32>
    tpu.vector_store %arg3[%c0_7, %c0_8, %c0_9, %c0_10], %2 {strides = array<i32>} : memref<1x3x32x32xf32, #tpu.memory_space<vmem>>, vector<1x3x32x32xf32>,
    %cst_11 = arith.constant 0.000000e+00 : f32
    %4 = vector.broadcast %cst_11 : f32 to vector<1x3x32x32xf32>
    %c0_12 = arith.constant 0 : index
    %c0_13 = arith.constant 0 : index
    %c0_14 = arith.constant 0 : index
    %c0_15 = arith.constant 0 : index
    %5 = vector.load %arg4[%c0_12, %c0_13, %c0_14, %c0_15] : memref<1x3x32x32xf32, #tpu.memory_space<vmem>>, vector<1x3x32x32xf32>
    tpu.vector_store %arg4[%c0_12, %c0_13, %c0_14, %c0_15], %4 {strides = array<i32>} : memref<1x3x32x32xf32, #tpu.memory_space<vmem>>, vector<1x3x32x32xf32>,
    %6 = math.cos %1 : vector<1x3x16x16xf32>
    %7 = arith.mulf %0, %6 : vector<1x3x16x16xf32>
    %c0_16 = arith.constant 0 : index
    %c0_17 = arith.constant 0 : index
    %c8 = arith.constant 8 : index
    %c8_18 = arith.constant 8 : index
    %8 = vector.load %arg3[%c0_16, %c0_17, %c8, %c8_18] : memref<1x3x32x32xf32, #tpu.memory_space<vmem>>, vector<1x3x16x16xf32>
    tpu.vector_store %arg3[%c0_16, %c0_17, %c8, %c8_18], %7 {strides = array<i32>} : memref<1x3x32x32xf32, #tpu.memory_space<vmem>>, vector<1x3x16x16xf32>,
    %9 = math.sin %1 : vector<1x3x16x16xf32>
    %10 = arith.mulf %0, %9 : vector<1x3x16x16xf32>
    %c0_19 = arith.constant 0 : index
    %c0_20 = arith.constant 0 : index
    %c8_21 = arith.constant 8 : index
    %c8_22 = arith.constant 8 : index
    %11 = vector.load %arg4[%c0_19, %c0_20, %c8_21, %c8_22] : memref<1x3x32x32xf32, #tpu.memory_space<vmem>>, vector<1x3x16x16xf32>
    tpu.vector_store %arg4[%c0_19, %c0_20, %c8_21, %c8_22], %10 {strides = array<i32>} : memref<1x3x32x32xf32, #tpu.memory_space<vmem>>, vector<1x3x16x16xf32>,
    return
  }
  func.func @transform_0(%arg0: i32) -> (i32, i32, i32, i32) {
    %c0_i32 = arith.constant 0 : i32
    %c0_i32_0 = arith.constant 0 : i32
    %c0_i32_1 = arith.constant 0 : i32
    %c0_i32_2 = arith.constant 0 : i32
    return %arg0, %c0_i32, %c0_i32_0, %c0_i32_1 : i32, i32, i32, i32
  }
  func.func @transform_1(%arg0: i32) -> (i32, i32, i32, i32) {
    %c0_i32 = arith.constant 0 : i32
    %c0_i32_0 = arith.constant 0 : i32
    %c0_i32_1 = arith.constant 0 : i32
    %c0_i32_2 = arith.constant 0 : i32
    return %arg0, %c0_i32, %c0_i32_0, %c0_i32_1 : i32, i32, i32, i32
  }
  func.func @transform_2(%arg0: i32) -> (i32, i32, i32, i32) {
    %c0_i32 = arith.constant 0 : i32
    %c0_i32_0 = arith.constant 0 : i32
    %c0_i32_1 = arith.constant 0 : i32
    %c0_i32_2 = arith.constant 0 : i32
    return %arg0, %c0_i32, %c0_i32_0, %c0_i32_1 : i32, i32, i32, i32
  }
  func.func @transform_3(%arg0: i32) -> (i32, i32, i32, i32) {
    %c0_i32 = arith.constant 0 : i32
    %c0_i32_0 = arith.constant 0 : i32
    %c0_i32_1 = arith.constant 0 : i32
    %c0_i32_2 = arith.constant 0 : i32
    return %arg0, %c0_i32, %c0_i32_0, %c0_i32_1 : i32, i32, i32, i32
  }
}

module attributes {stable_mosaic.version = 11 : i64} {
  func.func @conv_dp_kernel(%arg0: i32, %arg1: memref<27xf32, #tpu.memory_space<smem>>, %arg2: memref<3xf32, #tpu.memory_space<smem>>, %arg3: memref<1x3x16x16xf32, #tpu.memory_space<vmem>>, %arg4: memref<1x3x16x16xf32, #tpu.memory_space<vmem>>, %arg5: memref<16x16xf32, #tpu.memory_space<vmem>>, %arg6: memref<1x3x16x16xf32, #tpu.memory_space<vmem>>, %arg7: memref<1x3x18x18xf32, #tpu.memory_space<vmem>>, %arg8: memref<1x3x18x18xf32, #tpu.memory_space<vmem>>) attributes {dimension_semantics = [#tpu.dimension_semantics<parallel>], iteration_bounds = array<i64: 2>, scalar_prefetch = 0 : i64, scratch_operands = 2 : i64, tpu.core_type = #tpu.core_type<tc>, window_params = [{transform_indices = @transform_0, window_bounds = array<i64: 27>}, {transform_indices = @transform_1, window_bounds = array<i64: 3>}, {transform_indices = @transform_2, window_bounds = array<i64: 1, 3, 16, 16>}, {transform_indices = @transform_3, window_bounds = array<i64: 1, 3, 16, 16>}, {pipeline_mode = #tpu.pipeline_mode<synchronous>, transform_indices = @transform_4, window_bounds = array<i64: 16, 16>}, {transform_indices = @transform_5, window_bounds = array<i64: 1, 3, 16, 16>}]} {
    %cst = arith.constant 0.000000e+00 : f32
    %0 = vector.broadcast %cst : f32 to vector<1x3x18x18xf32>
    %c0 = arith.constant 0 : index
    %c0_0 = arith.constant 0 : index
    %c0_1 = arith.constant 0 : index
    %c0_2 = arith.constant 0 : index
    %1 = vector.load %arg7[%c0, %c0_0, %c0_1, %c0_2] : memref<1x3x18x18xf32, #tpu.memory_space<vmem>>, vector<1x3x18x18xf32>
    tpu.vector_store %arg7[%c0, %c0_0, %c0_1, %c0_2], %0 {strides = array<i32>} : memref<1x3x18x18xf32, #tpu.memory_space<vmem>>, vector<1x3x18x18xf32>,
    %cst_3 = arith.constant 0.000000e+00 : f32
    %2 = vector.broadcast %cst_3 : f32 to vector<1x3x18x18xf32>
    %c0_4 = arith.constant 0 : index
    %c0_5 = arith.constant 0 : index
    %c0_6 = arith.constant 0 : index
    %c0_7 = arith.constant 0 : index
    %3 = vector.load %arg8[%c0_4, %c0_5, %c0_6, %c0_7] : memref<1x3x18x18xf32, #tpu.memory_space<vmem>>, vector<1x3x18x18xf32>
    tpu.vector_store %arg8[%c0_4, %c0_5, %c0_6, %c0_7], %2 {strides = array<i32>} : memref<1x3x18x18xf32, #tpu.memory_space<vmem>>, vector<1x3x18x18xf32>,
    %c0_8 = arith.constant 0 : index
    %c0_9 = arith.constant 0 : index
    %c0_10 = arith.constant 0 : index
    %c0_11 = arith.constant 0 : index
    %4 = vector.load %arg3[%c0_8, %c0_9, %c0_10, %c0_11] : memref<1x3x16x16xf32, #tpu.memory_space<vmem>>, vector<1x3x16x16xf32>
    %c0_12 = arith.constant 0 : index
    %c0_13 = arith.constant 0 : index
    %c1 = arith.constant 1 : index
    %c1_14 = arith.constant 1 : index
    %5 = vector.load %arg7[%c0_12, %c0_13, %c1, %c1_14] : memref<1x3x18x18xf32, #tpu.memory_space<vmem>>, vector<1x3x16x16xf32>
    tpu.vector_store %arg7[%c0_12, %c0_13, %c1, %c1_14], %4 {strides = array<i32>} : memref<1x3x18x18xf32, #tpu.memory_space<vmem>>, vector<1x3x16x16xf32>,
    %c0_15 = arith.constant 0 : index
    %c0_16 = arith.constant 0 : index
    %c0_17 = arith.constant 0 : index
    %c0_18 = arith.constant 0 : index
    %6 = vector.load %arg4[%c0_15, %c0_16, %c0_17, %c0_18] : memref<1x3x16x16xf32, #tpu.memory_space<vmem>>, vector<1x3x16x16xf32>
    %c0_19 = arith.constant 0 : index
    %c0_20 = arith.constant 0 : index
    %c1_21 = arith.constant 1 : index
    %c1_22 = arith.constant 1 : index
    %7 = vector.load %arg8[%c0_19, %c0_20, %c1_21, %c1_22] : memref<1x3x18x18xf32, #tpu.memory_space<vmem>>, vector<1x3x16x16xf32>
    tpu.vector_store %arg8[%c0_19, %c0_20, %c1_21, %c1_22], %6 {strides = array<i32>} : memref<1x3x18x18xf32, #tpu.memory_space<vmem>>, vector<1x3x16x16xf32>,
    %c0_23 = arith.constant 0 : index
    %c0_24 = arith.constant 0 : index
    %8 = vector.load %arg5[%c0_23, %c0_24] : memref<16x16xf32, #tpu.memory_space<vmem>>, vector<16x16xf32>
    %cst_25 = arith.constant 0.000000e+00 : f32
    %9 = vector.broadcast %cst_25 : f32 to vector<16x16xf32>
    %cst_26 = arith.constant 0.000000e+00 : f32
    %10 = vector.broadcast %cst_26 : f32 to vector<16x16xf32>
    %c0_27 = arith.constant 0 : index
    %11 = memref.load %arg1[%c0_27] : memref<27xf32, #tpu.memory_space<smem>>
    %c0_28 = arith.constant 0 : index
    %c0_29 = arith.constant 0 : index
    %c0_30 = arith.constant 0 : index
    %c0_31 = arith.constant 0 : index
    %12 = vector.load %arg7[%c0_28, %c0_29, %c0_30, %c0_31] : memref<1x3x18x18xf32, #tpu.memory_space<vmem>>, vector<1x1x16x16xf32>
    %13 = vector.shape_cast %12 : vector<1x1x16x16xf32> to vector<16x16xf32>
    %14 = vector.broadcast %11 : f32 to vector<16x16xf32>
    %15 = arith.mulf %14, %13 : vector<16x16xf32>
    %16 = arith.addf %9, %15 : vector<16x16xf32>
    %c0_32 = arith.constant 0 : index
    %c0_33 = arith.constant 0 : index
    %c0_34 = arith.constant 0 : index
    %c0_35 = arith.constant 0 : index
    %17 = vector.load %arg8[%c0_32, %c0_33, %c0_34, %c0_35] : memref<1x3x18x18xf32, #tpu.memory_space<vmem>>, vector<1x1x16x16xf32>
    %18 = vector.shape_cast %17 : vector<1x1x16x16xf32> to vector<16x16xf32>
    %19 = vector.broadcast %11 : f32 to vector<16x16xf32>
    %20 = arith.mulf %19, %18 : vector<16x16xf32>
    %21 = arith.addf %10, %20 : vector<16x16xf32>
    %c1_36 = arith.constant 1 : index
    %22 = memref.load %arg1[%c1_36] : memref<27xf32, #tpu.memory_space<smem>>
    %c0_37 = arith.constant 0 : index
    %c0_38 = arith.constant 0 : index
    %c0_39 = arith.constant 0 : index
    %c1_40 = arith.constant 1 : index
    %23 = vector.load %arg7[%c0_37, %c0_38, %c0_39, %c1_40] : memref<1x3x18x18xf32, #tpu.memory_space<vmem>>, vector<1x1x16x16xf32>
    %24 = vector.shape_cast %23 : vector<1x1x16x16xf32> to vector<16x16xf32>
    %25 = vector.broadcast %22 : f32 to vector<16x16xf32>
    %26 = arith.mulf %25, %24 : vector<16x16xf32>
    %27 = arith.addf %16, %26 : vector<16x16xf32>
    %c0_41 = arith.constant 0 : index
    %c0_42 = arith.constant 0 : index
    %c0_43 = arith.constant 0 : index
    %c1_44 = arith.constant 1 : index
    %28 = vector.load %arg8[%c0_41, %c0_42, %c0_43, %c1_44] : memref<1x3x18x18xf32, #tpu.memory_space<vmem>>, vector<1x1x16x16xf32>
    %29 = vector.shape_cast %28 : vector<1x1x16x16xf32> to vector<16x16xf32>
    %30 = vector.broadcast %22 : f32 to vector<16x16xf32>
    %31 = arith.mulf %30, %29 : vector<16x16xf32>
    %32 = arith.addf %21, %31 : vector<16x16xf32>
    %c2 = arith.constant 2 : index
    %33 = memref.load %arg1[%c2] : memref<27xf32, #tpu.memory_space<smem>>
    %c0_45 = arith.constant 0 : index
    %c0_46 = arith.constant 0 : index
    %c0_47 = arith.constant 0 : index
    %c2_48 = arith.constant 2 : index
    %34 = vector.load %arg7[%c0_45, %c0_46, %c0_47, %c2_48] : memref<1x3x18x18xf32, #tpu.memory_space<vmem>>, vector<1x1x16x16xf32>
    %35 = vector.shape_cast %34 : vector<1x1x16x16xf32> to vector<16x16xf32>
    %36 = vector.broadcast %33 : f32 to vector<16x16xf32>
    %37 = arith.mulf %36, %35 : vector<16x16xf32>
    %38 = arith.addf %27, %37 : vector<16x16xf32>
    %c0_49 = arith.constant 0 : index
    %c0_50 = arith.constant 0 : index
    %c0_51 = arith.constant 0 : index
    %c2_52 = arith.constant 2 : index
    %39 = vector.load %arg8[%c0_49, %c0_50, %c0_51, %c2_52] : memref<1x3x18x18xf32, #tpu.memory_space<vmem>>, vector<1x1x16x16xf32>
    %40 = vector.shape_cast %39 : vector<1x1x16x16xf32> to vector<16x16xf32>
    %41 = vector.broadcast %33 : f32 to vector<16x16xf32>
    %42 = arith.mulf %41, %40 : vector<16x16xf32>
    %43 = arith.addf %32, %42 : vector<16x16xf32>
    %c3 = arith.constant 3 : index
    %44 = memref.load %arg1[%c3] : memref<27xf32, #tpu.memory_space<smem>>
    %c0_53 = arith.constant 0 : index
    %c0_54 = arith.constant 0 : index
    %c1_55 = arith.constant 1 : index
    %c0_56 = arith.constant 0 : index
    %45 = vector.load %arg7[%c0_53, %c0_54, %c1_55, %c0_56] : memref<1x3x18x18xf32, #tpu.memory_space<vmem>>, vector<1x1x16x16xf32>
    %46 = vector.shape_cast %45 : vector<1x1x16x16xf32> to vector<16x16xf32>
    %47 = vector.broadcast %44 : f32 to vector<16x16xf32>
    %48 = arith.mulf %47, %46 : vector<16x16xf32>
    %49 = arith.addf %38, %48 : vector<16x16xf32>
    %c0_57 = arith.constant 0 : index
    %c0_58 = arith.constant 0 : index
    %c1_59 = arith.constant 1 : index
    %c0_60 = arith.constant 0 : index
    %50 = vector.load %arg8[%c0_57, %c0_58, %c1_59, %c0_60] : memref<1x3x18x18xf32, #tpu.memory_space<vmem>>, vector<1x1x16x16xf32>
    %51 = vector.shape_cast %50 : vector<1x1x16x16xf32> to vector<16x16xf32>
    %52 = vector.broadcast %44 : f32 to vector<16x16xf32>
    %53 = arith.mulf %52, %51 : vector<16x16xf32>
    %54 = arith.addf %43, %53 : vector<16x16xf32>
    %c4 = arith.constant 4 : index
    %55 = memref.load %arg1[%c4] : memref<27xf32, #tpu.memory_space<smem>>
    %c0_61 = arith.constant 0 : index
    %c0_62 = arith.constant 0 : index
    %c1_63 = arith.constant 1 : index
    %c1_64 = arith.constant 1 : index
    %56 = vector.load %arg7[%c0_61, %c0_62, %c1_63, %c1_64] : memref<1x3x18x18xf32, #tpu.memory_space<vmem>>, vector<1x1x16x16xf32>
    %57 = vector.shape_cast %56 : vector<1x1x16x16xf32> to vector<16x16xf32>
    %58 = vector.broadcast %55 : f32 to vector<16x16xf32>
    %59 = arith.mulf %58, %57 : vector<16x16xf32>
    %60 = arith.addf %49, %59 : vector<16x16xf32>
    %c0_65 = arith.constant 0 : index
    %c0_66 = arith.constant 0 : index
    %c1_67 = arith.constant 1 : index
    %c1_68 = arith.constant 1 : index
    %61 = vector.load %arg8[%c0_65, %c0_66, %c1_67, %c1_68] : memref<1x3x18x18xf32, #tpu.memory_space<vmem>>, vector<1x1x16x16xf32>
    %62 = vector.shape_cast %61 : vector<1x1x16x16xf32> to vector<16x16xf32>
    %63 = vector.broadcast %55 : f32 to vector<16x16xf32>
    %64 = arith.mulf %63, %62 : vector<16x16xf32>
    %65 = arith.addf %54, %64 : vector<16x16xf32>
    %c5 = arith.constant 5 : index
    %66 = memref.load %arg1[%c5] : memref<27xf32, #tpu.memory_space<smem>>
    %c0_69 = arith.constant 0 : index
    %c0_70 = arith.constant 0 : index
    %c1_71 = arith.constant 1 : index
    %c2_72 = arith.constant 2 : index
    %67 = vector.load %arg7[%c0_69, %c0_70, %c1_71, %c2_72] : memref<1x3x18x18xf32, #tpu.memory_space<vmem>>, vector<1x1x16x16xf32>
    %68 = vector.shape_cast %67 : vector<1x1x16x16xf32> to vector<16x16xf32>
    %69 = vector.broadcast %66 : f32 to vector<16x16xf32>
    %70 = arith.mulf %69, %68 : vector<16x16xf32>
    %71 = arith.addf %60, %70 : vector<16x16xf32>
    %c0_73 = arith.constant 0 : index
    %c0_74 = arith.constant 0 : index
    %c1_75 = arith.constant 1 : index
    %c2_76 = arith.constant 2 : index
    %72 = vector.load %arg8[%c0_73, %c0_74, %c1_75, %c2_76] : memref<1x3x18x18xf32, #tpu.memory_space<vmem>>, vector<1x1x16x16xf32>
    %73 = vector.shape_cast %72 : vector<1x1x16x16xf32> to vector<16x16xf32>
    %74 = vector.broadcast %66 : f32 to vector<16x16xf32>
    %75 = arith.mulf %74, %73 : vector<16x16xf32>
    %76 = arith.addf %65, %75 : vector<16x16xf32>
    %c6 = arith.constant 6 : index
    %77 = memref.load %arg1[%c6] : memref<27xf32, #tpu.memory_space<smem>>
    %c0_77 = arith.constant 0 : index
    %c0_78 = arith.constant 0 : index
    %c2_79 = arith.constant 2 : index
    %c0_80 = arith.constant 0 : index
    %78 = vector.load %arg7[%c0_77, %c0_78, %c2_79, %c0_80] : memref<1x3x18x18xf32, #tpu.memory_space<vmem>>, vector<1x1x16x16xf32>
    %79 = vector.shape_cast %78 : vector<1x1x16x16xf32> to vector<16x16xf32>
    %80 = vector.broadcast %77 : f32 to vector<16x16xf32>
    %81 = arith.mulf %80, %79 : vector<16x16xf32>
    %82 = arith.addf %71, %81 : vector<16x16xf32>
    %c0_81 = arith.constant 0 : index
    %c0_82 = arith.constant 0 : index
    %c2_83 = arith.constant 2 : index
    %c0_84 = arith.constant 0 : index
    %83 = vector.load %arg8[%c0_81, %c0_82, %c2_83, %c0_84] : memref<1x3x18x18xf32, #tpu.memory_space<vmem>>, vector<1x1x16x16xf32>
    %84 = vector.shape_cast %83 : vector<1x1x16x16xf32> to vector<16x16xf32>
    %85 = vector.broadcast %77 : f32 to vector<16x16xf32>
    %86 = arith.mulf %85, %84 : vector<16x16xf32>
    %87 = arith.addf %76, %86 : vector<16x16xf32>
    %c7 = arith.constant 7 : index
    %88 = memref.load %arg1[%c7] : memref<27xf32, #tpu.memory_space<smem>>
    %c0_85 = arith.constant 0 : index
    %c0_86 = arith.constant 0 : index
    %c2_87 = arith.constant 2 : index
    %c1_88 = arith.constant 1 : index
    %89 = vector.load %arg7[%c0_85, %c0_86, %c2_87, %c1_88] : memref<1x3x18x18xf32, #tpu.memory_space<vmem>>, vector<1x1x16x16xf32>
    %90 = vector.shape_cast %89 : vector<1x1x16x16xf32> to vector<16x16xf32>
    %91 = vector.broadcast %88 : f32 to vector<16x16xf32>
    %92 = arith.mulf %91, %90 : vector<16x16xf32>
    %93 = arith.addf %82, %92 : vector<16x16xf32>
    %c0_89 = arith.constant 0 : index
    %c0_90 = arith.constant 0 : index
    %c2_91 = arith.constant 2 : index
    %c1_92 = arith.constant 1 : index
    %94 = vector.load %arg8[%c0_89, %c0_90, %c2_91, %c1_92] : memref<1x3x18x18xf32, #tpu.memory_space<vmem>>, vector<1x1x16x16xf32>
    %95 = vector.shape_cast %94 : vector<1x1x16x16xf32> to vector<16x16xf32>
    %96 = vector.broadcast %88 : f32 to vector<16x16xf32>
    %97 = arith.mulf %96, %95 : vector<16x16xf32>
    %98 = arith.addf %87, %97 : vector<16x16xf32>
    %c8 = arith.constant 8 : index
    %99 = memref.load %arg1[%c8] : memref<27xf32, #tpu.memory_space<smem>>
    %c0_93 = arith.constant 0 : index
    %c0_94 = arith.constant 0 : index
    %c2_95 = arith.constant 2 : index
    %c2_96 = arith.constant 2 : index
    %100 = vector.load %arg7[%c0_93, %c0_94, %c2_95, %c2_96] : memref<1x3x18x18xf32, #tpu.memory_space<vmem>>, vector<1x1x16x16xf32>
    %101 = vector.shape_cast %100 : vector<1x1x16x16xf32> to vector<16x16xf32>
    %102 = vector.broadcast %99 : f32 to vector<16x16xf32>
    %103 = arith.mulf %102, %101 : vector<16x16xf32>
    %104 = arith.addf %93, %103 : vector<16x16xf32>
    %c0_97 = arith.constant 0 : index
    %c0_98 = arith.constant 0 : index
    %c2_99 = arith.constant 2 : index
    %c2_100 = arith.constant 2 : index
    %105 = vector.load %arg8[%c0_97, %c0_98, %c2_99, %c2_100] : memref<1x3x18x18xf32, #tpu.memory_space<vmem>>, vector<1x1x16x16xf32>
    %106 = vector.shape_cast %105 : vector<1x1x16x16xf32> to vector<16x16xf32>
    %107 = vector.broadcast %99 : f32 to vector<16x16xf32>
    %108 = arith.mulf %107, %106 : vector<16x16xf32>
    %109 = arith.addf %98, %108 : vector<16x16xf32>
    %c0_101 = arith.constant 0 : index
    %110 = memref.load %arg2[%c0_101] : memref<3xf32, #tpu.memory_space<smem>>
    %111 = vector.broadcast %110 : f32 to vector<16x16xf32>
    %112 = arith.addf %104, %111 : vector<16x16xf32>
    %113 = vector.broadcast %110 : f32 to vector<16x16xf32>
    %114 = arith.addf %109, %113 : vector<16x16xf32>
    %115 = arith.mulf %112, %112 : vector<16x16xf32>
    %116 = arith.mulf %114, %114 : vector<16x16xf32>
    %117 = arith.addf %115, %116 : vector<16x16xf32>
    %118 = math.sqrt %117 : vector<16x16xf32>
    %119 = vector.shape_cast %118 : vector<16x16xf32> to vector<1x16x16xf32>
    %cst_102 = arith.constant dense<0xFF800000> : vector<1xf32>
    %120 = vector.multi_reduction <maximumf>, %119, %cst_102 [1, 2] : vector<1x16x16xf32> to vector<1xf32>
    %121 = vector.shape_cast %120 : vector<1xf32> to vector<1x1x1xf32>
    %122 = vector.extract %121[0, 0, 0] : f32 from vector<1x1x1xf32>
    %123 = vector.broadcast %122 : f32 to vector<1x1xf32>
    %cst_103 = arith.constant 9.99999996E-13 : f32
    %124 = vector.broadcast %cst_103 : f32 to vector<1x1xf32>
    %125 = arith.maximumf %123, %124 : vector<1x1xf32>
    %126 = tpu.reciprocal %125 {approx = true} : vector<1x1xf32> -> vector<1x1xf32>
    %127 = vector.broadcast %126 : vector<1x1xf32> to vector<16x16xf32>
    %128 = arith.mulf %118, %127 : vector<16x16xf32>
    %cst_104 = arith.constant 1.000000e+00 : f32
    %129 = vector.broadcast %cst_104 : f32 to vector<16x16xf32>
    %130 = arith.minimumf %128, %129 : vector<16x16xf32>
    %131 = math.atan2 %114, %112 : vector<16x16xf32>
    %132 = arith.mulf %130, %130 : vector<16x16xf32>
    %cst_105 = arith.constant 1.000000e+00 : f32
    %133 = vector.broadcast %cst_105 : f32 to vector<16x16xf32>
    %134 = arith.subf %133, %132 : vector<16x16xf32>
    %cst_106 = arith.constant 0.000000e+00 : f32
    %135 = vector.broadcast %cst_106 : f32 to vector<16x16xf32>
    %136 = arith.maximumf %134, %135 : vector<16x16xf32>
    %137 = math.sqrt %136 : vector<16x16xf32>
    %138 = math.atan2 %137, %130 : vector<16x16xf32>
    %139 = arith.mulf %8, %138 : vector<16x16xf32>
    %140 = arith.addf %131, %139 : vector<16x16xf32>
    %c0_107 = arith.constant 0 : index
    %c0_108 = arith.constant 0 : index
    %c0_109 = arith.constant 0 : index
    %c0_110 = arith.constant 0 : index
    %141 = vector.load %arg6[%c0_107, %c0_108, %c0_109, %c0_110] : memref<1x3x16x16xf32, #tpu.memory_space<vmem>>, vector<1x1x16x16xf32>
    %142 = vector.shape_cast %141 : vector<1x1x16x16xf32> to vector<16x16xf32>
    %143 = vector.shape_cast %140 : vector<16x16xf32> to vector<1x1x16x16xf32>
    tpu.vector_store %arg6[%c0_107, %c0_108, %c0_109, %c0_110], %143 {strides = array<i32>} : memref<1x3x16x16xf32, #tpu.memory_space<vmem>>, vector<1x1x16x16xf32>,
    %cst_111 = arith.constant 0.000000e+00 : f32
    %144 = vector.broadcast %cst_111 : f32 to vector<16x16xf32>
    %cst_112 = arith.constant 0.000000e+00 : f32
    %145 = vector.broadcast %cst_112 : f32 to vector<16x16xf32>
    %c9 = arith.constant 9 : index
    %146 = memref.load %arg1[%c9] : memref<27xf32, #tpu.memory_space<smem>>
    %c0_113 = arith.constant 0 : index
    %c1_114 = arith.constant 1 : index
    %c0_115 = arith.constant 0 : index
    %c0_116 = arith.constant 0 : index
    %147 = vector.load %arg7[%c0_113, %c1_114, %c0_115, %c0_116] : memref<1x3x18x18xf32, #tpu.memory_space<vmem>>, vector<1x1x16x16xf32>
    %148 = vector.shape_cast %147 : vector<1x1x16x16xf32> to vector<16x16xf32>
    %149 = vector.broadcast %146 : f32 to vector<16x16xf32>
    %150 = arith.mulf %149, %148 : vector<16x16xf32>
    %151 = arith.addf %144, %150 : vector<16x16xf32>
    %c0_117 = arith.constant 0 : index
    %c1_118 = arith.constant 1 : index
    %c0_119 = arith.constant 0 : index
    %c0_120 = arith.constant 0 : index
    %152 = vector.load %arg8[%c0_117, %c1_118, %c0_119, %c0_120] : memref<1x3x18x18xf32, #tpu.memory_space<vmem>>, vector<1x1x16x16xf32>
    %153 = vector.shape_cast %152 : vector<1x1x16x16xf32> to vector<16x16xf32>
    %154 = vector.broadcast %146 : f32 to vector<16x16xf32>
    %155 = arith.mulf %154, %153 : vector<16x16xf32>
    %156 = arith.addf %145, %155 : vector<16x16xf32>
    %c10 = arith.constant 10 : index
    %157 = memref.load %arg1[%c10] : memref<27xf32, #tpu.memory_space<smem>>
    %c0_121 = arith.constant 0 : index
    %c1_122 = arith.constant 1 : index
    %c0_123 = arith.constant 0 : index
    %c1_124 = arith.constant 1 : index
    %158 = vector.load %arg7[%c0_121, %c1_122, %c0_123, %c1_124] : memref<1x3x18x18xf32, #tpu.memory_space<vmem>>, vector<1x1x16x16xf32>
    %159 = vector.shape_cast %158 : vector<1x1x16x16xf32> to vector<16x16xf32>
    %160 = vector.broadcast %157 : f32 to vector<16x16xf32>
    %161 = arith.mulf %160, %159 : vector<16x16xf32>
    %162 = arith.addf %151, %161 : vector<16x16xf32>
    %c0_125 = arith.constant 0 : index
    %c1_126 = arith.constant 1 : index
    %c0_127 = arith.constant 0 : index
    %c1_128 = arith.constant 1 : index
    %163 = vector.load %arg8[%c0_125, %c1_126, %c0_127, %c1_128] : memref<1x3x18x18xf32, #tpu.memory_space<vmem>>, vector<1x1x16x16xf32>
    %164 = vector.shape_cast %163 : vector<1x1x16x16xf32> to vector<16x16xf32>
    %165 = vector.broadcast %157 : f32 to vector<16x16xf32>
    %166 = arith.mulf %165, %164 : vector<16x16xf32>
    %167 = arith.addf %156, %166 : vector<16x16xf32>
    %c11 = arith.constant 11 : index
    %168 = memref.load %arg1[%c11] : memref<27xf32, #tpu.memory_space<smem>>
    %c0_129 = arith.constant 0 : index
    %c1_130 = arith.constant 1 : index
    %c0_131 = arith.constant 0 : index
    %c2_132 = arith.constant 2 : index
    %169 = vector.load %arg7[%c0_129, %c1_130, %c0_131, %c2_132] : memref<1x3x18x18xf32, #tpu.memory_space<vmem>>, vector<1x1x16x16xf32>
    %170 = vector.shape_cast %169 : vector<1x1x16x16xf32> to vector<16x16xf32>
    %171 = vector.broadcast %168 : f32 to vector<16x16xf32>
    %172 = arith.mulf %171, %170 : vector<16x16xf32>
    %173 = arith.addf %162, %172 : vector<16x16xf32>
    %c0_133 = arith.constant 0 : index
    %c1_134 = arith.constant 1 : index
    %c0_135 = arith.constant 0 : index
    %c2_136 = arith.constant 2 : index
    %174 = vector.load %arg8[%c0_133, %c1_134, %c0_135, %c2_136] : memref<1x3x18x18xf32, #tpu.memory_space<vmem>>, vector<1x1x16x16xf32>
    %175 = vector.shape_cast %174 : vector<1x1x16x16xf32> to vector<16x16xf32>
    %176 = vector.broadcast %168 : f32 to vector<16x16xf32>
    %177 = arith.mulf %176, %175 : vector<16x16xf32>
    %178 = arith.addf %167, %177 : vector<16x16xf32>
    %c12 = arith.constant 12 : index
    %179 = memref.load %arg1[%c12] : memref<27xf32, #tpu.memory_space<smem>>
    %c0_137 = arith.constant 0 : index
    %c1_138 = arith.constant 1 : index
    %c1_139 = arith.constant 1 : index
    %c0_140 = arith.constant 0 : index
    %180 = vector.load %arg7[%c0_137, %c1_138, %c1_139, %c0_140] : memref<1x3x18x18xf32, #tpu.memory_space<vmem>>, vector<1x1x16x16xf32>
    %181 = vector.shape_cast %180 : vector<1x1x16x16xf32> to vector<16x16xf32>
    %182 = vector.broadcast %179 : f32 to vector<16x16xf32>
    %183 = arith.mulf %182, %181 : vector<16x16xf32>
    %184 = arith.addf %173, %183 : vector<16x16xf32>
    %c0_141 = arith.constant 0 : index
    %c1_142 = arith.constant 1 : index
    %c1_143 = arith.constant 1 : index
    %c0_144 = arith.constant 0 : index
    %185 = vector.load %arg8[%c0_141, %c1_142, %c1_143, %c0_144] : memref<1x3x18x18xf32, #tpu.memory_space<vmem>>, vector<1x1x16x16xf32>
    %186 = vector.shape_cast %185 : vector<1x1x16x16xf32> to vector<16x16xf32>
    %187 = vector.broadcast %179 : f32 to vector<16x16xf32>
    %188 = arith.mulf %187, %186 : vector<16x16xf32>
    %189 = arith.addf %178, %188 : vector<16x16xf32>
    %c13 = arith.constant 13 : index
    %190 = memref.load %arg1[%c13] : memref<27xf32, #tpu.memory_space<smem>>
    %c0_145 = arith.constant 0 : index
    %c1_146 = arith.constant 1 : index
    %c1_147 = arith.constant 1 : index
    %c1_148 = arith.constant 1 : index
    %191 = vector.load %arg7[%c0_145, %c1_146, %c1_147, %c1_148] : memref<1x3x18x18xf32, #tpu.memory_space<vmem>>, vector<1x1x16x16xf32>
    %192 = vector.shape_cast %191 : vector<1x1x16x16xf32> to vector<16x16xf32>
    %193 = vector.broadcast %190 : f32 to vector<16x16xf32>
    %194 = arith.mulf %193, %192 : vector<16x16xf32>
    %195 = arith.addf %184, %194 : vector<16x16xf32>
    %c0_149 = arith.constant 0 : index
    %c1_150 = arith.constant 1 : index
    %c1_151 = arith.constant 1 : index
    %c1_152 = arith.constant 1 : index
    %196 = vector.load %arg8[%c0_149, %c1_150, %c1_151, %c1_152] : memref<1x3x18x18xf32, #tpu.memory_space<vmem>>, vector<1x1x16x16xf32>
    %197 = vector.shape_cast %196 : vector<1x1x16x16xf32> to vector<16x16xf32>
    %198 = vector.broadcast %190 : f32 to vector<16x16xf32>
    %199 = arith.mulf %198, %197 : vector<16x16xf32>
    %200 = arith.addf %189, %199 : vector<16x16xf32>
    %c14 = arith.constant 14 : index
    %201 = memref.load %arg1[%c14] : memref<27xf32, #tpu.memory_space<smem>>
    %c0_153 = arith.constant 0 : index
    %c1_154 = arith.constant 1 : index
    %c1_155 = arith.constant 1 : index
    %c2_156 = arith.constant 2 : index
    %202 = vector.load %arg7[%c0_153, %c1_154, %c1_155, %c2_156] : memref<1x3x18x18xf32, #tpu.memory_space<vmem>>, vector<1x1x16x16xf32>
    %203 = vector.shape_cast %202 : vector<1x1x16x16xf32> to vector<16x16xf32>
    %204 = vector.broadcast %201 : f32 to vector<16x16xf32>
    %205 = arith.mulf %204, %203 : vector<16x16xf32>
    %206 = arith.addf %195, %205 : vector<16x16xf32>
    %c0_157 = arith.constant 0 : index
    %c1_158 = arith.constant 1 : index
    %c1_159 = arith.constant 1 : index
    %c2_160 = arith.constant 2 : index
    %207 = vector.load %arg8[%c0_157, %c1_158, %c1_159, %c2_160] : memref<1x3x18x18xf32, #tpu.memory_space<vmem>>, vector<1x1x16x16xf32>
    %208 = vector.shape_cast %207 : vector<1x1x16x16xf32> to vector<16x16xf32>
    %209 = vector.broadcast %201 : f32 to vector<16x16xf32>
    %210 = arith.mulf %209, %208 : vector<16x16xf32>
    %211 = arith.addf %200, %210 : vector<16x16xf32>
    %c15 = arith.constant 15 : index
    %212 = memref.load %arg1[%c15] : memref<27xf32, #tpu.memory_space<smem>>
    %c0_161 = arith.constant 0 : index
    %c1_162 = arith.constant 1 : index
    %c2_163 = arith.constant 2 : index
    %c0_164 = arith.constant 0 : index
    %213 = vector.load %arg7[%c0_161, %c1_162, %c2_163, %c0_164] : memref<1x3x18x18xf32, #tpu.memory_space<vmem>>, vector<1x1x16x16xf32>
    %214 = vector.shape_cast %213 : vector<1x1x16x16xf32> to vector<16x16xf32>
    %215 = vector.broadcast %212 : f32 to vector<16x16xf32>
    %216 = arith.mulf %215, %214 : vector<16x16xf32>
    %217 = arith.addf %206, %216 : vector<16x16xf32>
    %c0_165 = arith.constant 0 : index
    %c1_166 = arith.constant 1 : index
    %c2_167 = arith.constant 2 : index
    %c0_168 = arith.constant 0 : index
    %218 = vector.load %arg8[%c0_165, %c1_166, %c2_167, %c0_168] : memref<1x3x18x18xf32, #tpu.memory_space<vmem>>, vector<1x1x16x16xf32>
    %219 = vector.shape_cast %218 : vector<1x1x16x16xf32> to vector<16x16xf32>
    %220 = vector.broadcast %212 : f32 to vector<16x16xf32>
    %221 = arith.mulf %220, %219 : vector<16x16xf32>
    %222 = arith.addf %211, %221 : vector<16x16xf32>
    %c16 = arith.constant 16 : index
    %223 = memref.load %arg1[%c16] : memref<27xf32, #tpu.memory_space<smem>>
    %c0_169 = arith.constant 0 : index
    %c1_170 = arith.constant 1 : index
    %c2_171 = arith.constant 2 : index
    %c1_172 = arith.constant 1 : index
    %224 = vector.load %arg7[%c0_169, %c1_170, %c2_171, %c1_172] : memref<1x3x18x18xf32, #tpu.memory_space<vmem>>, vector<1x1x16x16xf32>
    %225 = vector.shape_cast %224 : vector<1x1x16x16xf32> to vector<16x16xf32>
    %226 = vector.broadcast %223 : f32 to vector<16x16xf32>
    %227 = arith.mulf %226, %225 : vector<16x16xf32>
    %228 = arith.addf %217, %227 : vector<16x16xf32>
    %c0_173 = arith.constant 0 : index
    %c1_174 = arith.constant 1 : index
    %c2_175 = arith.constant 2 : index
    %c1_176 = arith.constant 1 : index
    %229 = vector.load %arg8[%c0_173, %c1_174, %c2_175, %c1_176] : memref<1x3x18x18xf32, #tpu.memory_space<vmem>>, vector<1x1x16x16xf32>
    %230 = vector.shape_cast %229 : vector<1x1x16x16xf32> to vector<16x16xf32>
    %231 = vector.broadcast %223 : f32 to vector<16x16xf32>
    %232 = arith.mulf %231, %230 : vector<16x16xf32>
    %233 = arith.addf %222, %232 : vector<16x16xf32>
    %c17 = arith.constant 17 : index
    %234 = memref.load %arg1[%c17] : memref<27xf32, #tpu.memory_space<smem>>
    %c0_177 = arith.constant 0 : index
    %c1_178 = arith.constant 1 : index
    %c2_179 = arith.constant 2 : index
    %c2_180 = arith.constant 2 : index
    %235 = vector.load %arg7[%c0_177, %c1_178, %c2_179, %c2_180] : memref<1x3x18x18xf32, #tpu.memory_space<vmem>>, vector<1x1x16x16xf32>
    %236 = vector.shape_cast %235 : vector<1x1x16x16xf32> to vector<16x16xf32>
    %237 = vector.broadcast %234 : f32 to vector<16x16xf32>
    %238 = arith.mulf %237, %236 : vector<16x16xf32>
    %239 = arith.addf %228, %238 : vector<16x16xf32>
    %c0_181 = arith.constant 0 : index
    %c1_182 = arith.constant 1 : index
    %c2_183 = arith.constant 2 : index
    %c2_184 = arith.constant 2 : index
    %240 = vector.load %arg8[%c0_181, %c1_182, %c2_183, %c2_184] : memref<1x3x18x18xf32, #tpu.memory_space<vmem>>, vector<1x1x16x16xf32>
    %241 = vector.shape_cast %240 : vector<1x1x16x16xf32> to vector<16x16xf32>
    %242 = vector.broadcast %234 : f32 to vector<16x16xf32>
    %243 = arith.mulf %242, %241 : vector<16x16xf32>
    %244 = arith.addf %233, %243 : vector<16x16xf32>
    %c1_185 = arith.constant 1 : index
    %245 = memref.load %arg2[%c1_185] : memref<3xf32, #tpu.memory_space<smem>>
    %246 = vector.broadcast %245 : f32 to vector<16x16xf32>
    %247 = arith.addf %239, %246 : vector<16x16xf32>
    %248 = vector.broadcast %245 : f32 to vector<16x16xf32>
    %249 = arith.addf %244, %248 : vector<16x16xf32>
    %250 = arith.mulf %247, %247 : vector<16x16xf32>
    %251 = arith.mulf %249, %249 : vector<16x16xf32>
    %252 = arith.addf %250, %251 : vector<16x16xf32>
    %253 = math.sqrt %252 : vector<16x16xf32>
    %254 = vector.shape_cast %253 : vector<16x16xf32> to vector<1x16x16xf32>
    %cst_186 = arith.constant dense<0xFF800000> : vector<1xf32>
    %255 = vector.multi_reduction <maximumf>, %254, %cst_186 [1, 2] : vector<1x16x16xf32> to vector<1xf32>
    %256 = vector.shape_cast %255 : vector<1xf32> to vector<1x1x1xf32>
    %257 = vector.extract %256[0, 0, 0] : f32 from vector<1x1x1xf32>
    %258 = vector.broadcast %257 : f32 to vector<1x1xf32>
    %cst_187 = arith.constant 9.99999996E-13 : f32
    %259 = vector.broadcast %cst_187 : f32 to vector<1x1xf32>
    %260 = arith.maximumf %258, %259 : vector<1x1xf32>
    %261 = tpu.reciprocal %260 {approx = true} : vector<1x1xf32> -> vector<1x1xf32>
    %262 = vector.broadcast %261 : vector<1x1xf32> to vector<16x16xf32>
    %263 = arith.mulf %253, %262 : vector<16x16xf32>
    %cst_188 = arith.constant 1.000000e+00 : f32
    %264 = vector.broadcast %cst_188 : f32 to vector<16x16xf32>
    %265 = arith.minimumf %263, %264 : vector<16x16xf32>
    %266 = math.atan2 %249, %247 : vector<16x16xf32>
    %267 = arith.mulf %265, %265 : vector<16x16xf32>
    %cst_189 = arith.constant 1.000000e+00 : f32
    %268 = vector.broadcast %cst_189 : f32 to vector<16x16xf32>
    %269 = arith.subf %268, %267 : vector<16x16xf32>
    %cst_190 = arith.constant 0.000000e+00 : f32
    %270 = vector.broadcast %cst_190 : f32 to vector<16x16xf32>
    %271 = arith.maximumf %269, %270 : vector<16x16xf32>
    %272 = math.sqrt %271 : vector<16x16xf32>
    %273 = math.atan2 %272, %265 : vector<16x16xf32>
    %274 = arith.mulf %8, %273 : vector<16x16xf32>
    %275 = arith.addf %266, %274 : vector<16x16xf32>
    %c0_191 = arith.constant 0 : index
    %c1_192 = arith.constant 1 : index
    %c0_193 = arith.constant 0 : index
    %c0_194 = arith.constant 0 : index
    %276 = vector.load %arg6[%c0_191, %c1_192, %c0_193, %c0_194] : memref<1x3x16x16xf32, #tpu.memory_space<vmem>>, vector<1x1x16x16xf32>
    %277 = vector.shape_cast %276 : vector<1x1x16x16xf32> to vector<16x16xf32>
    %278 = vector.shape_cast %275 : vector<16x16xf32> to vector<1x1x16x16xf32>
    tpu.vector_store %arg6[%c0_191, %c1_192, %c0_193, %c0_194], %278 {strides = array<i32>} : memref<1x3x16x16xf32, #tpu.memory_space<vmem>>, vector<1x1x16x16xf32>,
    %cst_195 = arith.constant 0.000000e+00 : f32
    %279 = vector.broadcast %cst_195 : f32 to vector<16x16xf32>
    %cst_196 = arith.constant 0.000000e+00 : f32
    %280 = vector.broadcast %cst_196 : f32 to vector<16x16xf32>
    %c18 = arith.constant 18 : index
    %281 = memref.load %arg1[%c18] : memref<27xf32, #tpu.memory_space<smem>>
    %c0_197 = arith.constant 0 : index
    %c2_198 = arith.constant 2 : index
    %c0_199 = arith.constant 0 : index
    %c0_200 = arith.constant 0 : index
    %282 = vector.load %arg7[%c0_197, %c2_198, %c0_199, %c0_200] : memref<1x3x18x18xf32, #tpu.memory_space<vmem>>, vector<1x1x16x16xf32>
    %283 = vector.shape_cast %282 : vector<1x1x16x16xf32> to vector<16x16xf32>
    %284 = vector.broadcast %281 : f32 to vector<16x16xf32>
    %285 = arith.mulf %284, %283 : vector<16x16xf32>
    %286 = arith.addf %279, %285 : vector<16x16xf32>
    %c0_201 = arith.constant 0 : index
    %c2_202 = arith.constant 2 : index
    %c0_203 = arith.constant 0 : index
    %c0_204 = arith.constant 0 : index
    %287 = vector.load %arg8[%c0_201, %c2_202, %c0_203, %c0_204] : memref<1x3x18x18xf32, #tpu.memory_space<vmem>>, vector<1x1x16x16xf32>
    %288 = vector.shape_cast %287 : vector<1x1x16x16xf32> to vector<16x16xf32>
    %289 = vector.broadcast %281 : f32 to vector<16x16xf32>
    %290 = arith.mulf %289, %288 : vector<16x16xf32>
    %291 = arith.addf %280, %290 : vector<16x16xf32>
    %c19 = arith.constant 19 : index
    %292 = memref.load %arg1[%c19] : memref<27xf32, #tpu.memory_space<smem>>
    %c0_205 = arith.constant 0 : index
    %c2_206 = arith.constant 2 : index
    %c0_207 = arith.constant 0 : index
    %c1_208 = arith.constant 1 : index
    %293 = vector.load %arg7[%c0_205, %c2_206, %c0_207, %c1_208] : memref<1x3x18x18xf32, #tpu.memory_space<vmem>>, vector<1x1x16x16xf32>
    %294 = vector.shape_cast %293 : vector<1x1x16x16xf32> to vector<16x16xf32>
    %295 = vector.broadcast %292 : f32 to vector<16x16xf32>
    %296 = arith.mulf %295, %294 : vector<16x16xf32>
    %297 = arith.addf %286, %296 : vector<16x16xf32>
    %c0_209 = arith.constant 0 : index
    %c2_210 = arith.constant 2 : index
    %c0_211 = arith.constant 0 : index
    %c1_212 = arith.constant 1 : index
    %298 = vector.load %arg8[%c0_209, %c2_210, %c0_211, %c1_212] : memref<1x3x18x18xf32, #tpu.memory_space<vmem>>, vector<1x1x16x16xf32>
    %299 = vector.shape_cast %298 : vector<1x1x16x16xf32> to vector<16x16xf32>
    %300 = vector.broadcast %292 : f32 to vector<16x16xf32>
    %301 = arith.mulf %300, %299 : vector<16x16xf32>
    %302 = arith.addf %291, %301 : vector<16x16xf32>
    %c20 = arith.constant 20 : index
    %303 = memref.load %arg1[%c20] : memref<27xf32, #tpu.memory_space<smem>>
    %c0_213 = arith.constant 0 : index
    %c2_214 = arith.constant 2 : index
    %c0_215 = arith.constant 0 : index
    %c2_216 = arith.constant 2 : index
    %304 = vector.load %arg7[%c0_213, %c2_214, %c0_215, %c2_216] : memref<1x3x18x18xf32, #tpu.memory_space<vmem>>, vector<1x1x16x16xf32>
    %305 = vector.shape_cast %304 : vector<1x1x16x16xf32> to vector<16x16xf32>
    %306 = vector.broadcast %303 : f32 to vector<16x16xf32>
    %307 = arith.mulf %306, %305 : vector<16x16xf32>
    %308 = arith.addf %297, %307 : vector<16x16xf32>
    %c0_217 = arith.constant 0 : index
    %c2_218 = arith.constant 2 : index
    %c0_219 = arith.constant 0 : index
    %c2_220 = arith.constant 2 : index
    %309 = vector.load %arg8[%c0_217, %c2_218, %c0_219, %c2_220] : memref<1x3x18x18xf32, #tpu.memory_space<vmem>>, vector<1x1x16x16xf32>
    %310 = vector.shape_cast %309 : vector<1x1x16x16xf32> to vector<16x16xf32>
    %311 = vector.broadcast %303 : f32 to vector<16x16xf32>
    %312 = arith.mulf %311, %310 : vector<16x16xf32>
    %313 = arith.addf %302, %312 : vector<16x16xf32>
    %c21 = arith.constant 21 : index
    %314 = memref.load %arg1[%c21] : memref<27xf32, #tpu.memory_space<smem>>
    %c0_221 = arith.constant 0 : index
    %c2_222 = arith.constant 2 : index
    %c1_223 = arith.constant 1 : index
    %c0_224 = arith.constant 0 : index
    %315 = vector.load %arg7[%c0_221, %c2_222, %c1_223, %c0_224] : memref<1x3x18x18xf32, #tpu.memory_space<vmem>>, vector<1x1x16x16xf32>
    %316 = vector.shape_cast %315 : vector<1x1x16x16xf32> to vector<16x16xf32>
    %317 = vector.broadcast %314 : f32 to vector<16x16xf32>
    %318 = arith.mulf %317, %316 : vector<16x16xf32>
    %319 = arith.addf %308, %318 : vector<16x16xf32>
    %c0_225 = arith.constant 0 : index
    %c2_226 = arith.constant 2 : index
    %c1_227 = arith.constant 1 : index
    %c0_228 = arith.constant 0 : index
    %320 = vector.load %arg8[%c0_225, %c2_226, %c1_227, %c0_228] : memref<1x3x18x18xf32, #tpu.memory_space<vmem>>, vector<1x1x16x16xf32>
    %321 = vector.shape_cast %320 : vector<1x1x16x16xf32> to vector<16x16xf32>
    %322 = vector.broadcast %314 : f32 to vector<16x16xf32>
    %323 = arith.mulf %322, %321 : vector<16x16xf32>
    %324 = arith.addf %313, %323 : vector<16x16xf32>
    %c22 = arith.constant 22 : index
    %325 = memref.load %arg1[%c22] : memref<27xf32, #tpu.memory_space<smem>>
    %c0_229 = arith.constant 0 : index
    %c2_230 = arith.constant 2 : index
    %c1_231 = arith.constant 1 : index
    %c1_232 = arith.constant 1 : index
    %326 = vector.load %arg7[%c0_229, %c2_230, %c1_231, %c1_232] : memref<1x3x18x18xf32, #tpu.memory_space<vmem>>, vector<1x1x16x16xf32>
    %327 = vector.shape_cast %326 : vector<1x1x16x16xf32> to vector<16x16xf32>
    %328 = vector.broadcast %325 : f32 to vector<16x16xf32>
    %329 = arith.mulf %328, %327 : vector<16x16xf32>
    %330 = arith.addf %319, %329 : vector<16x16xf32>
    %c0_233 = arith.constant 0 : index
    %c2_234 = arith.constant 2 : index
    %c1_235 = arith.constant 1 : index
    %c1_236 = arith.constant 1 : index
    %331 = vector.load %arg8[%c0_233, %c2_234, %c1_235, %c1_236] : memref<1x3x18x18xf32, #tpu.memory_space<vmem>>, vector<1x1x16x16xf32>
    %332 = vector.shape_cast %331 : vector<1x1x16x16xf32> to vector<16x16xf32>
    %333 = vector.broadcast %325 : f32 to vector<16x16xf32>
    %334 = arith.mulf %333, %332 : vector<16x16xf32>
    %335 = arith.addf %324, %334 : vector<16x16xf32>
    %c23 = arith.constant 23 : index
    %336 = memref.load %arg1[%c23] : memref<27xf32, #tpu.memory_space<smem>>
    %c0_237 = arith.constant 0 : index
    %c2_238 = arith.constant 2 : index
    %c1_239 = arith.constant 1 : index
    %c2_240 = arith.constant 2 : index
    %337 = vector.load %arg7[%c0_237, %c2_238, %c1_239, %c2_240] : memref<1x3x18x18xf32, #tpu.memory_space<vmem>>, vector<1x1x16x16xf32>
    %338 = vector.shape_cast %337 : vector<1x1x16x16xf32> to vector<16x16xf32>
    %339 = vector.broadcast %336 : f32 to vector<16x16xf32>
    %340 = arith.mulf %339, %338 : vector<16x16xf32>
    %341 = arith.addf %330, %340 : vector<16x16xf32>
    %c0_241 = arith.constant 0 : index
    %c2_242 = arith.constant 2 : index
    %c1_243 = arith.constant 1 : index
    %c2_244 = arith.constant 2 : index
    %342 = vector.load %arg8[%c0_241, %c2_242, %c1_243, %c2_244] : memref<1x3x18x18xf32, #tpu.memory_space<vmem>>, vector<1x1x16x16xf32>
    %343 = vector.shape_cast %342 : vector<1x1x16x16xf32> to vector<16x16xf32>
    %344 = vector.broadcast %336 : f32 to vector<16x16xf32>
    %345 = arith.mulf %344, %343 : vector<16x16xf32>
    %346 = arith.addf %335, %345 : vector<16x16xf32>
    %c24 = arith.constant 24 : index
    %347 = memref.load %arg1[%c24] : memref<27xf32, #tpu.memory_space<smem>>
    %c0_245 = arith.constant 0 : index
    %c2_246 = arith.constant 2 : index
    %c2_247 = arith.constant 2 : index
    %c0_248 = arith.constant 0 : index
    %348 = vector.load %arg7[%c0_245, %c2_246, %c2_247, %c0_248] : memref<1x3x18x18xf32, #tpu.memory_space<vmem>>, vector<1x1x16x16xf32>
    %349 = vector.shape_cast %348 : vector<1x1x16x16xf32> to vector<16x16xf32>
    %350 = vector.broadcast %347 : f32 to vector<16x16xf32>
    %351 = arith.mulf %350, %349 : vector<16x16xf32>
    %352 = arith.addf %341, %351 : vector<16x16xf32>
    %c0_249 = arith.constant 0 : index
    %c2_250 = arith.constant 2 : index
    %c2_251 = arith.constant 2 : index
    %c0_252 = arith.constant 0 : index
    %353 = vector.load %arg8[%c0_249, %c2_250, %c2_251, %c0_252] : memref<1x3x18x18xf32, #tpu.memory_space<vmem>>, vector<1x1x16x16xf32>
    %354 = vector.shape_cast %353 : vector<1x1x16x16xf32> to vector<16x16xf32>
    %355 = vector.broadcast %347 : f32 to vector<16x16xf32>
    %356 = arith.mulf %355, %354 : vector<16x16xf32>
    %357 = arith.addf %346, %356 : vector<16x16xf32>
    %c25 = arith.constant 25 : index
    %358 = memref.load %arg1[%c25] : memref<27xf32, #tpu.memory_space<smem>>
    %c0_253 = arith.constant 0 : index
    %c2_254 = arith.constant 2 : index
    %c2_255 = arith.constant 2 : index
    %c1_256 = arith.constant 1 : index
    %359 = vector.load %arg7[%c0_253, %c2_254, %c2_255, %c1_256] : memref<1x3x18x18xf32, #tpu.memory_space<vmem>>, vector<1x1x16x16xf32>
    %360 = vector.shape_cast %359 : vector<1x1x16x16xf32> to vector<16x16xf32>
    %361 = vector.broadcast %358 : f32 to vector<16x16xf32>
    %362 = arith.mulf %361, %360 : vector<16x16xf32>
    %363 = arith.addf %352, %362 : vector<16x16xf32>
    %c0_257 = arith.constant 0 : index
    %c2_258 = arith.constant 2 : index
    %c2_259 = arith.constant 2 : index
    %c1_260 = arith.constant 1 : index
    %364 = vector.load %arg8[%c0_257, %c2_258, %c2_259, %c1_260] : memref<1x3x18x18xf32, #tpu.memory_space<vmem>>, vector<1x1x16x16xf32>
    %365 = vector.shape_cast %364 : vector<1x1x16x16xf32> to vector<16x16xf32>
    %366 = vector.broadcast %358 : f32 to vector<16x16xf32>
    %367 = arith.mulf %366, %365 : vector<16x16xf32>
    %368 = arith.addf %357, %367 : vector<16x16xf32>
    %c26 = arith.constant 26 : index
    %369 = memref.load %arg1[%c26] : memref<27xf32, #tpu.memory_space<smem>>
    %c0_261 = arith.constant 0 : index
    %c2_262 = arith.constant 2 : index
    %c2_263 = arith.constant 2 : index
    %c2_264 = arith.constant 2 : index
    %370 = vector.load %arg7[%c0_261, %c2_262, %c2_263, %c2_264] : memref<1x3x18x18xf32, #tpu.memory_space<vmem>>, vector<1x1x16x16xf32>
    %371 = vector.shape_cast %370 : vector<1x1x16x16xf32> to vector<16x16xf32>
    %372 = vector.broadcast %369 : f32 to vector<16x16xf32>
    %373 = arith.mulf %372, %371 : vector<16x16xf32>
    %374 = arith.addf %363, %373 : vector<16x16xf32>
    %c0_265 = arith.constant 0 : index
    %c2_266 = arith.constant 2 : index
    %c2_267 = arith.constant 2 : index
    %c2_268 = arith.constant 2 : index
    %375 = vector.load %arg8[%c0_265, %c2_266, %c2_267, %c2_268] : memref<1x3x18x18xf32, #tpu.memory_space<vmem>>, vector<1x1x16x16xf32>
    %376 = vector.shape_cast %375 : vector<1x1x16x16xf32> to vector<16x16xf32>
    %377 = vector.broadcast %369 : f32 to vector<16x16xf32>
    %378 = arith.mulf %377, %376 : vector<16x16xf32>
    %379 = arith.addf %368, %378 : vector<16x16xf32>
    %c2_269 = arith.constant 2 : index
    %380 = memref.load %arg2[%c2_269] : memref<3xf32, #tpu.memory_space<smem>>
    %381 = vector.broadcast %380 : f32 to vector<16x16xf32>
    %382 = arith.addf %374, %381 : vector<16x16xf32>
    %383 = vector.broadcast %380 : f32 to vector<16x16xf32>
    %384 = arith.addf %379, %383 : vector<16x16xf32>
    %385 = arith.mulf %382, %382 : vector<16x16xf32>
    %386 = arith.mulf %384, %384 : vector<16x16xf32>
    %387 = arith.addf %385, %386 : vector<16x16xf32>
    %388 = math.sqrt %387 : vector<16x16xf32>
    %389 = vector.shape_cast %388 : vector<16x16xf32> to vector<1x16x16xf32>
    %cst_270 = arith.constant dense<0xFF800000> : vector<1xf32>
    %390 = vector.multi_reduction <maximumf>, %389, %cst_270 [1, 2] : vector<1x16x16xf32> to vector<1xf32>
    %391 = vector.shape_cast %390 : vector<1xf32> to vector<1x1x1xf32>
    %392 = vector.extract %391[0, 0, 0] : f32 from vector<1x1x1xf32>
    %393 = vector.broadcast %392 : f32 to vector<1x1xf32>
    %cst_271 = arith.constant 9.99999996E-13 : f32
    %394 = vector.broadcast %cst_271 : f32 to vector<1x1xf32>
    %395 = arith.maximumf %393, %394 : vector<1x1xf32>
    %396 = tpu.reciprocal %395 {approx = true} : vector<1x1xf32> -> vector<1x1xf32>
    %397 = vector.broadcast %396 : vector<1x1xf32> to vector<16x16xf32>
    %398 = arith.mulf %388, %397 : vector<16x16xf32>
    %cst_272 = arith.constant 1.000000e+00 : f32
    %399 = vector.broadcast %cst_272 : f32 to vector<16x16xf32>
    %400 = arith.minimumf %398, %399 : vector<16x16xf32>
    %401 = math.atan2 %384, %382 : vector<16x16xf32>
    %402 = arith.mulf %400, %400 : vector<16x16xf32>
    %cst_273 = arith.constant 1.000000e+00 : f32
    %403 = vector.broadcast %cst_273 : f32 to vector<16x16xf32>
    %404 = arith.subf %403, %402 : vector<16x16xf32>
    %cst_274 = arith.constant 0.000000e+00 : f32
    %405 = vector.broadcast %cst_274 : f32 to vector<16x16xf32>
    %406 = arith.maximumf %404, %405 : vector<16x16xf32>
    %407 = math.sqrt %406 : vector<16x16xf32>
    %408 = math.atan2 %407, %400 : vector<16x16xf32>
    %409 = arith.mulf %8, %408 : vector<16x16xf32>
    %410 = arith.addf %401, %409 : vector<16x16xf32>
    %c0_275 = arith.constant 0 : index
    %c2_276 = arith.constant 2 : index
    %c0_277 = arith.constant 0 : index
    %c0_278 = arith.constant 0 : index
    %411 = vector.load %arg6[%c0_275, %c2_276, %c0_277, %c0_278] : memref<1x3x16x16xf32, #tpu.memory_space<vmem>>, vector<1x1x16x16xf32>
    %412 = vector.shape_cast %411 : vector<1x1x16x16xf32> to vector<16x16xf32>
    %413 = vector.shape_cast %410 : vector<16x16xf32> to vector<1x1x16x16xf32>
    tpu.vector_store %arg6[%c0_275, %c2_276, %c0_277, %c0_278], %413 {strides = array<i32>} : memref<1x3x16x16xf32, #tpu.memory_space<vmem>>, vector<1x1x16x16xf32>,
    return
  }
  func.func @transform_0(%arg0: i32) -> i32 {
    %c0_i32 = arith.constant 0 : i32
    %c0_i32_0 = arith.constant 0 : i32
    return %c0_i32 : i32
  }
  func.func @transform_1(%arg0: i32) -> i32 {
    %c0_i32 = arith.constant 0 : i32
    %c0_i32_0 = arith.constant 0 : i32
    return %c0_i32 : i32
  }
  func.func @transform_2(%arg0: i32) -> (i32, i32, i32, i32) {
    %c0_i32 = arith.constant 0 : i32
    %c0_i32_0 = arith.constant 0 : i32
    %c0_i32_1 = arith.constant 0 : i32
    %c0_i32_2 = arith.constant 0 : i32
    return %arg0, %c0_i32, %c0_i32_0, %c0_i32_1 : i32, i32, i32, i32
  }
  func.func @transform_3(%arg0: i32) -> (i32, i32, i32, i32) {
    %c0_i32 = arith.constant 0 : i32
    %c0_i32_0 = arith.constant 0 : i32
    %c0_i32_1 = arith.constant 0 : i32
    %c0_i32_2 = arith.constant 0 : i32
    return %arg0, %c0_i32, %c0_i32_0, %c0_i32_1 : i32, i32, i32, i32
  }
  func.func @transform_4(%arg0: i32) -> (i32, i32) {
    %c0_i32 = arith.constant 0 : i32
    %c0_i32_0 = arith.constant 0 : i32
    %c0_i32_1 = arith.constant 0 : i32
    return %c0_i32, %c0_i32_0 : i32, i32
  }
  func.func @transform_5(%arg0: i32) -> (i32, i32, i32, i32) {
    %c0_i32 = arith.constant 0 : i32
    %c0_i32_0 = arith.constant 0 : i32
    %c0_i32_1 = arith.constant 0 : i32
    %c0_i32_2 = arith.constant 0 : i32
    return %arg0, %c0_i32, %c0_i32_0, %c0_i32_1 : i32, i32, i32, i32
  }
}

</mosaic_0001>

<bundles_post_ra>
// kernel: custom-call.1
= control target key start
LH: loop header
LB: loop body
LE: loop exit
PB: predicated region body
PF: predicated region fallthrough
CT: control target
= control target key end

     0   :  { %s59_s0 = inlined_call_operand.hbm [shape: c64[3,32,32], index: 0, kind: input, shape index: {}]   ;;  %s60_s1 = inlined_call_operand.vmem [shape: f32[3,32,32], index: 1, kind: output, shape index: {}]  }
   0x1   :  { %s2_s8 = scalar_lea.hbm %s59_s0, 1536 }
   0x2   :  { %3 = vsyncpa [#allocation0], 0  ;;  %s4_s11 = sshll.u32 %s60_s1, 4  ;;  %s34_s14 = scalar_lea.hbm %s59_s0, 3072  ;;  %s5_s11 = int_to_ptr.vmem [resolvable:$true] %s4_s11 }
   0x3   :  { %p11_p0 = scmp.ne.s32.totalorder %s2_s8, %s34_s14  ;;  %p13_p1 = scmp.lt.u32.totalorder %s2_s8, %s59_s0 }
   0x4   :  { %p14_p2 = scmp.lt.u32.totalorder %s34_s14, %s34_s14  ;;  %p16_p4 = scmp.lt.u32.totalorder %s34_s14, %s2_s8 }
   0x6   :  { %p15_p3 = por %p14_p2, %p13_p1 }
   0x8   :  { %p17_p5 = por %p16_p4, %p15_p3 }
   0xa   :  { %p18_p6 = pnand %p17_p5, %p11_p0 }
   0xc   :  { %21 = shalt.err (!%p18_p6)  }
   0xd   :  { %s22_s17 = scalar_lea.vmem %s5_s11, 1536  ;;  %p27_p8 = scmp.lt.s32.totalorder %s5_s11, %s5_s11 }
   0xe   :  { %p23_p7 = scmp.ne.s32.totalorder %s5_s11, %s22_s17  ;;  %p28_p9 = scmp.lt.s32.totalorder %s22_s17, %s22_s17 }
  0x10   :  { %p29_p10 = por %p28_p9, %p27_p8 }
  0x12   :  { %p30_p11 = pnand %p29_p10, %p23_p7 }
  0x14   :  { %33 = shalt.err (!%p30_p11)  }
  0x15   :  { %7 = dma.hbm_to_vmem [thread:$0]  %s2_s8, 1536, %s5_s11, [#allocation0] }
  0x16   :  { %35 = dma.done.wait [#allocation0], 1536  }
  0x17   :  { %36 = vsyncadd [#allocation0], 4294965760 }
  0x18   :  { %9 = vsyncpa [#allocation0], 1 }

// kernel: custom-call
= control target key start
LH: loop header
LB: loop body
LE: loop exit
PB: predicated region body
PF: predicated region fallthrough
CT: control target
= control target key end

     0   :  { %2 = vsyncpa [#allocation0], 0  ;;  %s61_s0 = inlined_call_operand.hbm [shape: c64[3,32,32], index: 0, kind: input, shape index: {}]   ;;  %s62_s1 = inlined_call_operand.vmem [shape: f32[3,32,32], index: 1, kind: output, shape index: {}]  }
   0x1   :  { %s3_s8 = sshll.u32 %s62_s1, 4  ;;  %s9_s11 = scalar_lea.hbm %s61_s0, 1536  ;;  %s4_s8 = int_to_ptr.vmem [resolvable:$true] %s3_s8 }
   0x2   :  { %p10_p0 = scmp.ne.s32.totalorder %s61_s0, %s9_s11  ;;  %s11_s16 = scalar_lea.hbm %s61_s0, 3072 }
   0x3   :  { %p12_p1 = scmp.lt.u32.totalorder %s11_s16, %s9_s11  ;;  %p13_p2 = scmp.lt.u32.totalorder %s9_s11, %s61_s0 }
   0x5   :  { %p14_p3 = por %p13_p2, %p12_p1 }
   0x7   :  { %p15_p4 = pnand %p14_p3, %p10_p0 }
   0x9   :  { %18 = shalt.err (!%p15_p4)  }
   0xa   :  { %s19_s1 = scalar_lea.vmem %s4_s8, 1536  ;;  %p24_p6 = scmp.lt.s32.totalorder %s4_s8, %s4_s8 }
   0xb   :  { %p20_p5 = scmp.ne.s32.totalorder %s4_s8, %s19_s1  ;;  %p25_p7 = scmp.lt.s32.totalorder %s19_s1, %s19_s1 }
   0xd   :  { %p26_p8 = por %p25_p7, %p24_p6 }
   0xf   :  { %p27_p9 = pnand %p26_p8, %p20_p5 }
  0x11   :  { %30 = shalt.err (!%p27_p9)  }
  0x12   :  { %6 = dma.hbm_to_vmem [thread:$0]  %s61_s0, 1536, %s4_s8, [#allocation0] }
  0x13   :  { %31 = dma.done.wait [#allocation0], 1536  }
  0x14   :  { %32 = vsyncadd [#allocation0], 4294965760 }
  0x15   :  { %8 = vsyncpa [#allocation0], 1 }

// kernel: ap2poh_forward.2
= control target key start
LH: loop header
LB: loop body
LE: loop exit
PB: predicated region body
PF: predicated region fallthrough
CT: control target
= control target key end

     0   :  { %9 = vsyncpa [#allocation3], 0  ;;  %s2953_s0 = inlined_call_operand.hbm [shape: f32[2,3,16,16], index: 0, kind: input, shape index: {}]   ;;  %s2954_s1 = inlined_call_operand.hbm [shape: f32[2,3,16,16], index: 1, kind: input, shape index: {}]   ;;  %s2955_s2 = inlined_call_operand.vmem [shape: f32[2,3,32,32], index: 2, kind: output, shape index: {0}]   ;;  %s2956_s3 = inlined_call_operand.vmem [shape: f32[2,3,32,32], index: 3, kind: output, shape index: {1}]  }
   0x1   :  { %11 = vsyncpa [#allocation3 + $0x1], 0 }
   0x2   :  { %12 = vsyncpa [#allocation5], 0 }
   0x3   :  { %14 = vsyncpa [#allocation5 + $0x1], 0  ;;  %s2017_s12 = smov 0   ;;  %s2019_s13 = smov 0  }
   0x4   :  { %s2021_s14 = smov 0   ;;  %s2023_s15 = smov 0  }
   0x5 LB: > { %s2036_s16 = sadd.s32 4294967295, %s1983_s15   ;;  %s2039_s17 = sadd.s32 1, %s1983_s15   ;;  %s1983_s15 = sphi %s2023_s15, %s2978_s15   ;;  %s1979_s14 = sphi %s2021_s14, %s2977_s14   ;;  %s1975_s13 = sphi %s2019_s13, %s2976_s13   ;;  %s1971_s12 = sphi %s2017_s12, %s2975_s12  }
   0x6   : > { %s24_s18 = ssub.s32 %s1983_s15, %s2039_s17  ;;  %s27_s19 = sadd.s32 1, %s1979_s14 }
   0x7   : > { %p25_p0 = scmp.eq.s32.totalorder %s24_s18, 0  ;;  %p34_p1 = scmp.ne.s32.totalorder %s1979_s14, %s1975_s13 }
   0x8   : > { %p35_p2 = scmp.eq.s32.totalorder %s1983_s15, 0  ;;  %p40_p3 = scmp.ne.s32.totalorder %s1975_s13, %s1971_s12 }
   0x9   : > { %s2049_s20 = scalar_select %p25_p0, %s1979_s14, %s27_s19  }
   0xa   : > { %p36_p4 = por %p35_p2, %p34_p1  ;;  %p41_p5 = scmp.eq.s32.totalorder %s2036_s16, 0 }
   0xb   : > { %p1818_p6 = scmp.lt.s32.totalorder %s1983_s15, 2  ;;  %s2058_s22 = sand.u32 1, %s1979_s14  }
   0xc   : > { %p2053_p7 = por %p41_p5, %p40_p3  ;;  %s1777_s23 = smul.u32 48, %s2058_s22 }
   0xd   : > { %s1778_s24 = smul.u32 768, %s1983_s15  ;;  %p2062_p8 = pnand %p1818_p6, %p36_p4 }
   0xe   : > { %s2958_s21 = scalar_select %p2053_p7, 1, 0 }
   0xf   : > { %s2071_s28 = scalar_lea.hbm %s2953_s0, %s1778_s24  ;;  %s146_s29 = scalar_lea.vmem [#allocation2], %s1777_s23 }
  0x10   : > { %s153_s30 = sshll.u32 %s146_s29, 4  ;;  %s143_s4 = scalar_lea.sflag [#allocation3], %s2058_s22  ;;  %s2075_s30 = int_to_ptr.vmem [resolvable:$true] %s153_s30 }
  0x11   : > { %s1885_s5 = scalar_lea.hbm %s2071_s28, 768  ;;  %p1887_p11 = pneg %p2062_p8 }
  0x12   : > { %p1886_p10 = scmp.ne.s32.totalorder %s2071_s28, %s1885_s5  ;;  %s1890_s8 = scalar_lea.hbm %s2953_s0, 1536 }
  0x13   : > { %p1891_p0 = scmp.lt.u32.totalorder %s2071_s28, %s2953_s0  ;;  %p1892_p1 = scmp.lt.u32.totalorder %s1890_s8, %s1885_s5 }
  0x14   : > { %p1888_p12 = pnand %p1887_p11, %p1886_p10  ;;  %p1894_p3 = scmp.lt.u32.totalorder %s1885_s5, %s2071_s28 }
  0x15   : > { %p1893_p2 = por %p1892_p1, %p1891_p0 }
  0x16   : > { %p1889_p13 = pneg %p1888_p12 }
  0x17   : > { %p1895_p4 = por %p1894_p3, %p1893_p2 }
  0x19   : > { %p1896_p5 = pnand %p1895_p4, %p1889_p13 }
  0x1b   : > { %1899 = shalt.err (!%p1896_p5)
}
  0x1c   : > { %s1900_s11 = scalar_lea.vmem %s2075_s30, 768  ;;  %s1985_s12 = smov [#allocation2]  }
  0x1d   : > { %p1901_p6 = scmp.ne.s32.totalorder %s2075_s30, %s1900_s11  ;;  %s1905_s18 = sshll.u32 %s1985_s12, 4  ;;  %s1906_s18 = int_to_ptr.vmem [resolvable:$false] %s1905_s18 }
  0x1e   : > { %s1907_s19 = scalar_lea.vmem %s1906_s18, 1536  ;;  %p1908_p9 = scmp.lt.s32.totalorder %s2075_s30, %s1906_s18 }
  0x1f   : > { %p1903_p10 = pnand %p1901_p6, %p1887_p11  ;;  %p1909_p0 = scmp.lt.s32.totalorder %s1907_s19, %s1900_s11 }
  0x21   : > { %p1904_p12 = pneg %p1903_p10  ;;  %p1910_p1 = por %p1909_p0, %p1908_p9 }
  0x23   : > { %p1911_p2 = pnand %p1910_p1, %p1904_p12 }
  0x25   : > { %1914 = shalt.err (!%p1911_p2)
}
  0x26   : > { %s1986_s26 = smov 128   ;;  %s1987_s27 = smov 8  }
  0x27   : > { %1814 = dma.hbm_to_vmem [thread:$0]  (!%p2062_p8), %s2071_s28, 768, %s2075_s30, %s143_s4, %s1986_s26, %s1986_s26, %s1987_s27  }
  0x28   : > { %p182_p9 = scmp.lt.s32.totalorder %s1983_s15, 3  ;;  %s2115_s6 = scalar_lea.hbm %s2954_s1, %s1778_s24 }
  0x29   : > { %p2960_p13 = scmp.ge.s32.totalorder %s1983_s15, 1  ;;  %s167_s8 = scalar_lea.vmem [#allocation4], %s1777_s23 }
  0x2a   : > { %s174_s9 = sshll.u32 %s167_s8, 4  ;;  %s164_s28 = scalar_lea.sflag [#allocation5], %s2058_s22  ;;  %s2125_s9 = int_to_ptr.vmem [resolvable:$true] %s174_s9 }
  0x2b   : > { %p2119_p3 = pnand %p2960_p13, %p182_p9  ;;  %s1915_s30 = scalar_lea.hbm %s2115_s6, 768 }
  0x2c   : > { %p1916_p4 = scmp.ne.s32.totalorder %s2115_s6, %s1915_s30  ;;  %s1920_s4 = scalar_lea.hbm %s2954_s1, 1536 }
  0x2d   : > { %p1921_p10 = scmp.lt.u32.totalorder %s2115_s6, %s2954_s1  ;;  %p1922_p12 = scmp.lt.u32.totalorder %s1920_s4, %s1915_s30 }
  0x2e   : > { %p1918_p5 = pnand %p1916_p4, %p1887_p11  ;;  %p1924_p1 = scmp.lt.u32.totalorder %s1915_s30, %s2115_s6 }
  0x2f   : > { %p1923_p0 = por %p1922_p12, %p1921_p10 }
  0x30   : > { %p1919_p6 = pneg %p1918_p5 }
  0x31   : > { %p1925_p2 = por %p1924_p1, %p1923_p0 }
  0x33   : > { %p1926_p9 = pnand %p1925_p2, %p1919_p6 }
  0x35   : > { %1929 = shalt.err (!%p1926_p9)
}
  0x36   : > { %s1930_s23 = scalar_lea.vmem %s2125_s9, 768  ;;  %s1988_s12 = smov [#allocation4]  }
  0x37   : > { %p1931_p13 = scmp.ne.s32.totalorder %s2125_s9, %s1930_s23  ;;  %s1935_s18 = sshll.u32 %s1988_s12, 4  ;;  %s1936_s18 = int_to_ptr.vmem [resolvable:$false] %s1935_s18 }
  0x38   : > { %s1937_s19 = scalar_lea.vmem %s1936_s18, 1536  ;;  %p1938_p7 = scmp.lt.s32.totalorder %s2125_s9, %s1936_s18 }
  0x39   : > { %p1933_p4 = pnand %p1931_p13, %p1887_p11  ;;  %p1939_p10 = scmp.lt.s32.totalorder %s1937_s19, %s1930_s23 }
  0x3b   : > { %p1934_p5 = pneg %p1933_p4  ;;  %p1940_p12 = por %p1939_p10, %p1938_p7 }
  0x3d   : > { %p1941_p0 = pnand %p1940_p12, %p1934_p5 }
  0x3f   : > { %1944 = shalt.err (!%p1941_p0)
}
  0x40   : > { %1817 = dma.hbm_to_vmem [thread:$0]  (!%p2062_p8), %s2115_s6, 768, %s2125_s9, %s164_s28, %s1986_s26, %s1986_s26, %s1987_s27  }
  0x41   : > { %186 = sbr.rel (%p2119_p3) target bundleno = 395 (0x18b), region = 28  ;;  %s188_s29 = sand.u32 (!%p2119_p3), 1, %s1975_s13  }
  0x42   : > { %s1781_s5 = smul.u32 (!%p2119_p3), 48, %s188_s29  ;;  %s189_s8 = scalar_lea.sflag (!%p2119_p3), [#allocation3], %s188_s29 }
  0x43   : > { %p2962_p7 = scmp.ne.s32.totalorder (!%p2119_p3), %s2958_s21, 0 }
  0x44   : > { %s2159_s30 = scalar_lea.vmem (!%p2119_p3), [#allocation2], %s1781_s5 }
  0x48   : > { %1962 = dma.done.wait (%p2962_p7), %s189_s8, 768  }
  0x49   : > { %1964 = vsyncadd (%p2962_p7), %s189_s8, 4294966528  ;;  %s198_s22 = scalar_lea.sflag [#allocation5], %s188_s29  ;;  %s2165_s25 = scalar_lea.vmem [#allocation4], %s1781_s5 }
  0x4a   : > { %1966 = dma.done.wait (%p2962_p7), %s198_s22, 768  }
  0x4b   : > { %1968 = vsyncadd (%p2962_p7), %s198_s22, 4294966528  ;;  %v2172_v0 = vld [vmem:[%s2165_s25 + $0x10] sm:$0xff]  ;;  %v2177_v3 = vld [vmem:[%s2165_s25] sm:$0xff]  ;;  %v1989_v31 = vmov 683565275   ;;  %s1995_s21 = smov 8  }
  0x4c   : > { %v487_v1 = vand.u32 2147483647, %v2172_v0  ;;  %v490_v2 = vand.u32 2139095040, %v2172_v0  ;;  %v281_v4 = vand.u32 2147483647, %v2177_v3  ;;  %v284_v5 = vand.u32 2139095040, %v2177_v3 }
  0x4d   : > { %v2182_v6 = vld [vmem:[%s2165_s25 + $0x18] sm:$0xff]  ;;  %v1990_v33 = vmov 2475754826   ;;  %v1991_v35 = vmov 2131351028   ;;  %vm489_vm13 = vcmp.lt.s32.totalorder %v2172_v0, 0 }
  0x4e   : > { %v491_v7 = vshrl.u32 %v490_v2, 23  ;;  %v494_v8 = vand.u32 8388607, %v487_v1  ;;  %v285_v9 = vshrl.u32 %v284_v5, 23  ;;  %v288_v10 = vand.u32 8388607, %v281_v4 }
  0x4f   : > { %v593_v11 = vand.u32 2139095040, %v2182_v6  ;;  %v590_v19 = vand.u32 2147483647, %v2182_v6  ;;  %v1992_v37 = vmov 2102212464   ;;  %p234_p8 = scmp.lt.s32.totalorder %s2036_s16, 1 }
  0x50   : > { %v1735_v12 = vadd.s32 4294967169, %v491_v7  ;;  %v1727_v13 = vadd.s32 4294967169, %v285_v9  ;;  %v495_v15 = vor.u32 8388608, %v494_v8  ;;  %v289_v17 = vor.u32 8388608, %v288_v10 }
  0x51   : > { %v594_v14 = vshrl.u32 %v593_v11, 23  ;;  %v2196_v28 = vand.u32 8388607, %v590_v19  ;;  %v1993_v39 = vmov 920167782   ;;  %s2980_s16 = smov (!%p234_p8, %s2036_s16), 1 }
  0x52   : > { %v497_v16 = vadd.s32 1, %v1735_v12  ;;  %v291_v18 = vadd.s32 1, %v1727_v13  ;;  %v2190_v24 = vshll.u32 %v495_v15, 8  ;;  %v2192_v27 = vshll.u32 %v289_v17, 8  ;;  %s1782_s26 = smul.u32 96, %s2980_s16 }
  0x53   : > { %v1739_v20 = vadd.s32 4294967169, %v594_v14  ;;  %v1994_v47 = vmov 1326507024   ;;  %vm2301_vm14 = vcmp.le.f32.partialorder %v487_v1, 0.7853982 }
  0x54   : > { %vm498_vm0 = vcmp.gt.s32.totalorder %v497_v16, 0  ;;  %vm292_vm1 = vcmp.gt.s32.totalorder %v291_v18, 0  ;;  %s2734_s7 = scalar_lea.vmem %s2955_s2, %s1782_s26  ;;  %s2861_s15 = scalar_lea.vmem %s2956_s3, %s1782_s26 }
  0x55   : > { %v499_v21 = vsel %vm498_vm0, %v497_v16, 0  ;;  %v293_v25 = vsel %vm292_vm1, %v291_v18, 0  ;;  %v2198_v29 = vadd.s32 1, %v1739_v20 }
  0x56   : > { %v500_v22 = vshrl.u32 %v499_v21, 5  ;;  %v501_v23 = vand.u32 31, %v499_v21  ;;  %v295_v26 = vand.u32 31, %v293_v25  ;;  %v2205_v41 = vshrl.u32 %v293_v25, 5 }
  0x57   : > { %vm601_vm6 = vcmp.gt.s32.totalorder %v2198_v29, 0 }
  0x58   : > { %v502_v30 = vsub.s32 32, %v501_v23  ;;  %v504_v32 = vshll.u32 %v1989_v31, %v501_v23  ;;  %v507_v34 = vshll.u32 %v1990_v33, %v501_v23  ;;  %v510_v36 = vshll.u32 %v1991_v35, %v501_v23 }
  0x59   : > { %v513_v38 = vshll.u32 %v1992_v37, %v501_v23  ;;  %v516_v40 = vshll.u32 %v1993_v39, %v501_v23  ;;  %vm519_vm2 = vcmp.lt.s32.totalorder %v500_v22, 1  ;;  %vm520_vm3 = vcmp.lt.s32.totalorder %v500_v22, 2 }
  0x5a   : > { %v503_v42 = vshrl.u32 %v1989_v31, %v502_v30  ;;  %v505_v43 = vshrl.u32 %v1990_v33, %v502_v30  ;;  %v508_v44 = vshrl.u32 %v1991_v35, %v502_v30  ;;  %v511_v45 = vshrl.u32 %v1992_v37, %v502_v30 }
  0x5b   : > { %v514_v46 = vshrl.u32 %v1993_v39, %v502_v30  ;;  %v517_v48 = vshrl.u32 %v1994_v47, %v502_v30  ;;  %vm522_vm4 = vcmp.lt.s32.totalorder %v500_v22, 4  ;;  %v296_v52 = vsub.s32 32, %v295_v26 }
  0x5c   : > { %v506_v49 = vor.u32 %v505_v43, %v504_v32  ;;  %v509_v50 = vor.u32 %v508_v44, %v507_v34  ;;  %v512_v51 = vor.u32 %v511_v45, %v510_v36  ;;  %vm521_vm5 = vcmp.lt.s32.totalorder %v500_v22, 3 }
  0x5d   : > { %v515_v53 = vor.u32 %v514_v46, %v513_v38  ;;  %v518_v54 = vor.u32 %v517_v48, %v516_v40  ;;  %v298_v55 = vshll.u32 %v1989_v31, %v295_v26  ;;  %v301_v63 = vshll.u32 %v1990_v33, %v295_v26 }
  0x5e   : > { %v523_v56 = vsel %vm519_vm2, %v503_v42, %v506_v49  ;;  %v524_v57 = vsel %vm522_vm4, %v512_v51, 2102212464  ;;  %v527_v58 = vsel %vm519_vm2, %v506_v49, %v509_v50  ;;  %v531_v59 = vsel %vm519_vm2, %v509_v50, %v512_v51 }
  0x5f   : > { %v525_v60 = vsel %vm521_vm5, %v509_v50, %v524_v57  ;;  %v528_v61 = vsel %vm522_vm4, %v515_v53, 920167782  ;;  %v532_v62 = vsel %vm522_vm4, %v518_v54, 1326507024  ;;  %v297_v7 = vshrl.u32 %v1989_v31, %v296_v52 }
  0x60   : > { %v529_v2 = vsel %vm521_vm5, %v512_v51, %v528_v61  ;;  %v533_v5 = vsel %vm521_vm5, %v515_v53, %v532_v62  ;;  %v299_v8 = vshrl.u32 %v1990_v33, %v296_v52  ;;  %v526_v9 = vsel %vm520_vm3, %v523_v56, %v525_v60  ;;  %v2266_v61 = vld [vmem:[%s2165_s25 + $0x8] sm:$0xff] }
  0x61   : > { %v530_v10 = vsel %vm520_vm3, %v527_v58, %v529_v2  ;;  %v534_v11 = vsel %vm520_vm3, %v531_v59, %v533_v5  ;;  %v302_v12 = vshrl.u32 %v1991_v35, %v296_v52  ;;  %v304_v20 = vshll.u32 %v1991_v35, %v295_v26 }
  0x62   : > { %v2226_v13 = vmul.u32.u64.low %v2190_v24, %v534_v11  ;;  %v2227_v14 = vmul.u32.u64.high %v2190_v24, %v534_v11, %v2226_v13  ;;  %v2230_v15 = vmul.u32.u64.low %v2190_v24, %v530_v10  ;;  %v2231_v16 = vmul.u32.u64.high %v2190_v24, %v530_v10, %v2230_v15 }
  0x63   : > { %v300_v17 = vor.u32 %v299_v8, %v298_v55  ;;  %v303_v18 = vor.u32 %v302_v12, %v301_v63  ;;  %v305_v21 = vshrl.u32 %v1992_v37, %v296_v52  ;;  %v307_v23 = vshll.u32 %v1992_v37, %v295_v26 }
  0x64   : > { %v308_v22 = vshrl.u32 %v1993_v39, %v296_v52  ;;  %v310_v25 = vshll.u32 %v1993_v39, %v295_v26  ;;  %v311_v30 = vshrl.u32 %v1994_v47, %v296_v52  ;;  %v542_v32 = vmul.u32 %v2190_v24, %v526_v9 }
  0x65   : > { %v306_v34 = vor.u32 %v305_v21, %v304_v20  ;;  %vm313_vm7 = vcmp.lt.s32.totalorder %v2205_v41, 1  ;;  %vm314_vm8 = vcmp.lt.s32.totalorder %v2205_v41, 2  ;;  %vm544_vm9 = vc.u32 %v2227_v14, %v2230_v15 }
  0x66   : > { %v545_v36 = vadd.s32 1, %v2231_v16  ;;  %v309_v38 = vor.u32 %v308_v22, %v307_v23  ;;  %vm315_vm10 = vcmp.lt.s32.totalorder %v2205_v41, 3  ;;  %v312_v40 = vor.u32 %v311_v30, %v310_v25 }
  0x67   : > { %vm316_vm11 = vcmp.lt.s32.totalorder %v2205_v41, 4  ;;  %v317_v26 = vsel %vm313_vm7, %v297_v7, %v300_v17  ;;  %v321_v42 = vsel %vm313_vm7, %v300_v17, %v303_v18  ;;  %v325_v45 = vsel %vm313_vm7, %v303_v18, %v306_v34 }
  0x68   : > { %v546_v43 = vsel %vm544_vm9, %v545_v36, %v2231_v16  ;;  %v318_v24 = vsel %vm316_vm11, %v306_v34, 2102212464  ;;  %v322_v44 = vsel %vm316_vm11, %v309_v38, 920167782  ;;  %v326_v50 = vsel %vm316_vm11, %v312_v40, 1326507024 }
  0x69   : > { %v547_v46 = vadd.s32 %v546_v43, %v542_v32  ;;  %v319_v48 = vsel %vm315_vm10, %v303_v18, %v318_v24  ;;  %v323_v49 = vsel %vm315_vm10, %v306_v34, %v322_v44  ;;  %v327_v53 = vsel %vm315_vm10, %v309_v38, %v326_v50 }
  0x6a   : > { %v320_v51 = vsel %vm314_vm8, %v317_v26, %v319_v48  ;;  %v324_v52 = vsel %vm314_vm8, %v321_v42, %v323_v49  ;;  %v602_v54 = vsel %vm601_vm6, %v2198_v29, 0  ;;  %v328_v56 = vsel %vm314_vm8, %v325_v45, %v327_v53 }
  0x6b   : > { %v548_v55 = vadd.s32 536870912, %v547_v46  ;;  %v2257_v57 = vmul.u32.u64.low %v2192_v27, %v324_v52  ;;  %v2258_v58 = vmul.u32.u64.high %v2192_v27, %v324_v52, %v2257_v57  ;;  %v604_v63 = vand.u32 31, %v602_v54 }
  0x6c   : > { %v2262_v59 = vmul.u32.u64.low %v2192_v27, %v328_v56  ;;  %v2263_v60 = vmul.u32.u64.high %v2192_v27, %v328_v56, %v2262_v59  ;;  %v336_v2 = vmul.u32 %v2192_v27, %v320_v51  ;;  %v384_v29 = vand.u32 2147483647, %v2266_v61 }
  0x6d   : > { %v549_v62 = vshrl.u32 %v548_v55, 30  ;;  %v339_v41 = vadd.s32 1, %v2258_v58  ;;  %v598_v7 = vor.u32 8388608, %v2196_v28  ;;  %v387_v8 = vand.u32 2139095040, %v2266_v61 }
  0x6e   : > { %vm338_vm12 = vc.u32 %v2263_v60, %v2257_v57  ;;  %v605_v11 = vsub.s32 32, %v604_v63  ;;  %v2284_v28 = vand.u32 8388607, %v384_v29  ;;  %v543_v17 = vadd.s32 %v2230_v15, %v2227_v14 }
  0x6f   : > { %v550_v5 = vshll.u32 %v549_v62, 30  ;;  %v340_v10 = vsel %vm338_vm12, %v339_v41, %v2258_v58  ;;  %v2280_v13 = vshll.u32 %v598_v7, 8  ;;  %v388_v16 = vshrl.u32 %v387_v8, 23 }
  0x70   : > { %v341_v12 = vadd.s32 %v340_v10, %v336_v2  ;;  %v2287_v20 = vshrl.u32 %v602_v54, 5  ;;  %v607_v21 = vshll.u32 %v1989_v31, %v604_v63  ;;  %v608_v22 = vshrl.u32 %v1990_v33, %v605_v11 }
  0x71   : > { %v2275_v9 = vsub.s32 %v547_v46, %v550_v5  ;;  %v610_v25 = vshll.u32 %v1990_v33, %v604_v63  ;;  %v611_v30 = vshrl.u32 %v1991_v35, %v605_v11  ;;  %v613_v34 = vshll.u32 %v1991_v35, %v604_v63 }
  0x72   : > { %v342_v18 = vadd.s32 536870912, %v341_v12  ;;  %v614_v36 = vshrl.u32 %v1992_v37, %v605_v11  ;;  %v616_v14 = vshll.u32 %v1992_v37, %v604_v63  ;;  %v617_v40 = vshrl.u32 %v1993_v39, %v605_v11 }
  0x73   : > { %v553_v27 = vsub.s32 0, %v2275_v9  ;;  %v1731_v26 = vadd.s32 4294967169, %v388_v16  ;;  %v392_v42 = vor.u32 8388608, %v2284_v28  ;;  %v573_v43 = vsub.s32 4, %v549_v62 }
  0x74   : > { %v2294_v32 = vshrl.u32 %v342_v18, 30  ;;  %vm622_vm15 = vcmp.lt.s32.totalorder %v2287_v20, 1  ;;  %vm625_vm0 = vcmp.lt.s32.totalorder %v2287_v20, 4  ;;  %v618_v45 = vor.u32 %v617_v40, %v616_v14 }
  0x75   : > { %v1736_v23 = vmin.u32 %v553_v27, %v2275_v9  ;;  %v619_v1 = vshll.u32 %v1993_v39, %v604_v63  ;;  %v620_v46 = vshrl.u32 %v1994_v47, %v605_v11  ;;  %v609_v49 = vor.u32 %v608_v22, %v607_v21 }
  0x76   : > { %v344_v24 = vshll.u32 %v2294_v32, 30  ;;  %v612_v50 = vor.u32 %v611_v30, %v610_v25  ;;  %v615_v51 = vor.u32 %v614_v36, %v613_v34  ;;  %v606_v52 = vshrl.u32 %v1989_v31, %v605_v11 }
  0x77   : > { %v555_v38 = vclz %v1736_v23  ;;  %vm624_vm2 = vcmp.lt.s32.totalorder %v2287_v20, 3  ;;  %v631_v53 = vsel %vm625_vm0, %v618_v45, 920167782  ;;  %v574_v55 = vsel %vm489_vm13, %v573_v43, %v549_v62 }
  0x78   : > { %v2312_v48 = vsub.s32 %v341_v12, %v344_v24  ;;  %v627_v58 = vsel %vm625_vm0, %v615_v51, 2102212464  ;;  %v621_v5 = vor.u32 %v620_v46, %v619_v1  ;;  %vm283_vm3 = vcmp.lt.s32.totalorder %v2177_v3, 0 }
  0x79   : > { %v1737_v44 = vadd.s32 4294967294, %v555_v38  ;;  %vm623_vm4 = vcmp.lt.s32.totalorder %v2287_v20, 2  ;;  %v630_v7 = vsel %vm622_vm15, %v609_v49, %v612_v50  ;;  %v632_v62 = vsel %vm624_vm2, %v615_v51, %v631_v53 }
  0x7a   : > { %v347_v56 = vsub.s32 0, %v2312_v48  ;;  %v626_v11 = vsel %vm622_vm15, %v606_v52, %v609_v49  ;;  %v576_v12 = vsel %vm2301_vm14, 0, %v574_v55  ;;  %v337_v27 = vadd.s32 %v2257_v57, %v2263_v60 }
  0x7b   : > { %vm1738_vm1 = vcmp.lt.s32.totalorder %v1737_v44, 0  ;;  %v634_v18 = vsel %vm622_vm15, %v612_v50, %v615_v51  ;;  %vm2343_vm5 = vcmp.le.f32.partialorder %v281_v4, 0.7853982  ;;  %v633_v22 = vsel %vm623_vm4, %v630_v7, %v632_v62 }
  0x7c   : > { %v558_v54 = vsel %vm1738_vm1, 0, %v1737_v44  ;;  %v1728_v41 = vmin.u32 %v347_v56, %v2312_v48  ;;  %v635_v25 = vsel %vm625_vm0, %v621_v5, 1326507024  ;;  %v1237_v30 = vadd.s32 3, %v576_v12 }
  0x7d   : > { %v559_v59 = vsub.s32 32, %v558_v54  ;;  %v560_v63 = vshll.u32 %v2275_v9, %v558_v54  ;;  %v563_v2 = vsub.s32 4294967266, %v558_v54  ;;  %v628_v9 = vsel %vm624_vm2, %v612_v50, %v627_v58 }
  0x7e   : > { %v349_v16 = vclz %v1728_v41  ;;  %v367_v60 = vsub.s32 4, %v2294_v32  ;;  %v629_v34 = vsel %vm623_vm4, %v626_v11, %v628_v9  ;;  %v636_v4 = vsel %vm624_vm2, %v618_v45, %v635_v25 }
  0x7f   : > { %v561_v8 = vshrl.u32 %v543_v17, %v559_v59  ;;  %v564_v10 = vadd.s32 127, %v563_v2  ;;  %v394_v38 = vadd.s32 1, %v1731_v26  ;;  %v637_v40 = vsel %vm623_vm4, %v634_v18, %v636_v4 }
  0x80   : > { %v1729_v57 = vadd.s32 4294967294, %v349_v16  ;;  %v2359_v43 = vmul.u32.u64.low %v2280_v13, %v633_v22  ;;  %v2360_v24 = vmul.u32.u64.high %v2280_v13, %v633_v22, %v2359_v43  ;;  %v368_v20 = vsel %vm283_vm3, %v367_v60, %v2294_v32 }
  0x81   : > { %v562_v21 = vor.u32 %v561_v8, %v560_v63  ;;  %v565_v23 = vshll.u32 %v564_v10, 23  ;;  %v2364_v46 = vmul.u32.u64.low %v2280_v13, %v637_v40  ;;  %v2365_v49 = vmul.u32.u64.high %v2280_v13, %v637_v40, %v2364_v46 }
  0x82   : > { %vm1730_vm6 = vcmp.lt.s32.totalorder %v1729_v57, 0  ;;  %vm395_vm7 = vcmp.gt.s32.totalorder %v394_v38, 0  ;;  %v645_v52 = vmul.u32 %v2280_v13, %v629_v34  ;;  %v2372_v54 = vand.u32 3, %v576_v12 }
  0x83   : > { %v566_v36 = vor.u32 4788187, %v565_v23  ;;  %v569_v14 = vcvt.s32.f32 %v562_v21  ;;  %v352_v1 = vsel %vm1730_vm6, 0, %v1729_v57  ;;  %v396_v53 = vsel %vm395_vm7, %v394_v38, 0 }
  0x84   : > { %v353_v50 = vsub.s32 32, %v352_v1  ;;  %v354_v51 = vshll.u32 %v2312_v48, %v352_v1  ;;  %v357_v45 = vsub.s32 4294967266, %v352_v1  ;;  %v648_v58 = vadd.s32 1, %v2360_v24 }
  0x85   : > { %v567_v44 = vand.u32 2147483647, %v566_v36  ;;  %v2375_v63 = vand.u32 3, %v1237_v30  ;;  %vm647_vm8 = vc.u32 %v2365_v49, %v2359_v43  ;;  %v398_v48 = vand.u32 31, %v396_v53 }
  0x86   : > { %v355_v55 = vshrl.u32 %v337_v27, %v353_v50  ;;  %v358_v56 = vadd.s32 127, %v357_v45  ;;  %v370_v32 = vsel %vm2343_vm5, 0, %v368_v20  ;;  %v649_v13 = vsel %vm647_vm8, %v648_v58, %v2360_v24 }
  0x87   : > { %v570_v26 = vmul.f32 %v569_v14, %v567_v44  ;;  %v1029_v7 = vadd.s32 3, %v370_v32  ;;  %v650_v62 = vadd.s32 %v649_v13, %v645_v52  ;;  %v399_v8 = vsub.s32 32, %v398_v48 }
  0x88   : > { %v356_v2 = vor.u32 %v355_v55, %v354_v51  ;;  %v359_v5 = vshll.u32 %v358_v56, 23  ;;  %v2387_v12 = vshrl.u32 %v396_v53, 5  ;;  %v401_v16 = vshll.u32 %v1989_v31, %v398_v48 }
  0x89   : > { %v571_v59 = vxor.u32 2147483648, %v570_v26  ;;  %v651_v27 = vadd.s32 536870912, %v650_v62  ;;  %v404_v18 = vshll.u32 %v1990_v33, %v398_v48  ;;  %v402_v23 = vshrl.u32 %v1990_v33, %v399_v8 }
  0x8a   : > { %v360_v11 = vor.u32 4788187, %v359_v5  ;;  %v363_v9 = vcvt.s32.f32 %v356_v2  ;;  %v407_v22 = vshll.u32 %v1991_v35, %v398_v48  ;;  %vm585_vm9 = vcmp.eq.s32.totalorder %v2372_v54, 2 }
  0x8b   : > { %v572_v41 = vsel %vm489_vm13, %v571_v59, %v570_v26  ;;  %v2394_v15 = vshrl.u32 %v651_v27, 30  ;;  %v405_v25 = vshrl.u32 %v1991_v35, %v399_v8  ;;  %v408_v30 = vshrl.u32 %v1992_v37, %v399_v8 }
  0x8c   : > { %v575_v10 = vsel %vm2301_vm14, %v2172_v0, %v572_v41  ;;  %v361_v21 = vand.u32 2147483647, %v360_v11  ;;  %v410_v57 = vshll.u32 %v1992_v37, %v398_v48  ;;  %vm582_vm10 = vcmp.eq.s32.totalorder %v2372_v54, 0 }
  0x8d   : > { %1861 = vcosq.f32 %v575_v10  ;;  %v2400_v34 = vand.u32 3, %v370_v32  ;;  %v411_v36 = vshrl.u32 %v1993_v39, %v399_v8  ;;  %v413_v14 = vshll.u32 %v1993_v39, %v398_v48 }
  0x8e   : > { %1863 = vsinq.f32 %v575_v10  ;;  %v364_v60 = vmul.f32 %v363_v9, %v361_v21  ;;  %vm581_vm11 = vcmp.lt.s32.totalorder %v2372_v54, 2  ;;  %vm1239_vm12 = vcmp.lt.s32.totalorder %v2375_v63, 2  ;;  %v246_v9 = vld [vmem:[%s2159_s30 + $0x10] sm:$0xff] }
  0x8f   : > { %v2406_v4 = vand.u32 3, %v1029_v7  ;;  %v653_v38 = vshll.u32 %v2394_v15, 30  ;;  %v400_v40 = vshrl.u32 %v1989_v31, %v399_v8  ;;  %v414_v24 = vshrl.u32 %v1994_v47, %v399_v8 }
  0x90   : > { %vm579_vm13 = vweird.f32 %v2172_v0  ;;  %v365_v44 = vxor.u32 2147483648, %v364_v60  ;;  %v403_v1 = vor.u32 %v402_v23, %v401_v16  ;;  %v409_v46 = vor.u32 %v408_v30, %v407_v22 }
  0x91   : > { %vm416_vm14 = vcmp.lt.s32.totalorder %v2387_v12, 1  ;;  %v2413_v50 = vsub.s32 %v650_v62, %v653_v38  ;;  %v406_v51 = vor.u32 %v405_v25, %v404_v18  ;;  %v412_v45 = vor.u32 %v411_v36, %v410_v57  ;;  %v2488_v36 = vld [vmem:[%s2165_s25 + $0x28] sm:$0xff] }
  0x92   : > { %vm419_vm15 = vcmp.lt.s32.totalorder %v2387_v12, 4  ;;  %v366_v26 = vsel %vm283_vm3, %v365_v44, %v364_v60  ;;  %v415_v20 = vor.u32 %v414_v24, %v413_v14  ;;  %vm418_vm0 = vcmp.lt.s32.totalorder %v2387_v12, 3 }
  0x93   : > { %v421_v52 = vsel %vm419_vm15, %v409_v46, 2102212464  ;;  %v369_v53 = vsel %vm2343_vm5, %v2177_v3, %v366_v26  ;;  %v656_v55 = vsub.s32 0, %v2413_v50  ;;  %v420_v56 = vsel %vm416_vm14, %v400_v40, %v403_v1 }
  0x94   : > { %v422_v58 = vsel %vm418_vm0, %v406_v51, %v421_v52  ;;  %vm1240_vm1 = vcmp.eq.s32.totalorder %v2375_v63, 0  ;;  %vm1243_vm2 = vcmp.eq.s32.totalorder %v2375_v63, 2  ;;  %1865 = vcosq.f32 %v369_v53 }
  0x95   : > { %v2433_v59 = vshll.u32 %v392_v42, 8  ;;  %1867 = vsinq.f32 %v369_v53  ;;  %v1740_v17 = vmin.u32 %v656_v55, %v2413_v50  ;;  %vm417_vm3 = vcmp.lt.s32.totalorder %v2387_v12, 2 }
  0x96   : > { %v425_v2 = vsel %vm419_vm15, %v412_v45, 920167782  ;;  %vm379_vm4 = vcmp.eq.s32.totalorder %v2400_v34, 2  ;;  %v646_v13 = vadd.s32 %v2359_v43, %v2365_v49  ;;  %v2444_v28 = vsel %vm417_vm3, %v420_v56, %v422_v58 }
  0x97   : > { %v1862_v48 = vpop.eup %1861  ;;  %v428_v42 = vsel %vm416_vm14, %v406_v51, %v409_v46  ;;  %vm376_vm5 = vcmp.eq.s32.totalorder %v2400_v34, 0  ;;  %vm1032_vm6 = vcmp.eq.s32.totalorder %v2406_v4, 0  ;;  %v658_v7 = vclz %v1740_v17 }
  0x98   : > { %v1864_v5 = vpop.eup %1863  ;;  %v586_v32 = vxor.u32 2147483648, %v1862_v48  ;;  %v424_v62 = vsel %vm416_vm14, %v403_v1, %v406_v51  ;;  %v429_v8 = vsel %vm419_vm15, %v415_v20, 1326507024  ;;  %vm375_vm7 = vcmp.lt.s32.totalorder %v2400_v34, 2 }
  0x99   : > { %v583_v41 = vxor.u32 2147483648, %v1864_v5  ;;  %vm1031_vm8 = vcmp.lt.s32.totalorder %v2406_v4, 2  ;;  %v426_v10 = vsel %vm418_vm0, %v409_v46, %v425_v2  ;;  %v430_v11 = vsel %vm418_vm0, %v412_v45, %v429_v8 }
  0x9a   : > { %v587_v43 = vsel %vm585_vm9, %v586_v32, %v1864_v5  ;;  %v1245_v49 = vsel %vm1243_vm2, %v586_v32, %v1864_v5  ;;  %vm373_vm9 = vweird.f32 %v2177_v3  ;;  %v1741_v18 = vadd.s32 4294967294, %v658_v7  ;;  %v244_v32 = vld [vmem:[%s2159_s30] sm:$0xff] }
  0x9b   : > { %v584_v27 = vsel %vm582_vm10, %v1862_v48, %v583_v41  ;;  %v1242_v16 = vsel %vm1240_vm1, %v1862_v48, %v583_v41  ;;  %v431_v21 = vsel %vm417_vm3, %v428_v42, %v430_v11  ;;  %vm592_vm10 = vcmp.lt.s32.totalorder %v2182_v6, 0 }
  0x9c   : > { %v588_v23 = vsel %vm581_vm11, %v584_v27, %v587_v43  ;;  %v1246_v22 = vsel %vm1239_vm12, %v1242_v16, %v1245_v49  ;;  %v2477_v25 = vmul.u32.u64.low %v2433_v59, %v431_v21  ;;  %v2478_v30 = vmul.u32.u64.high %v2433_v59, %v431_v21, %v2477_v25 }
  0x9d   : > { %v589_v57 = vsel %vm579_vm13, nan, %v588_v23  ;;  %v1247_v60 = vsel %vm579_vm13, nan, %v1246_v22  ;;  %vm1742_vm14 = vcmp.lt.s32.totalorder %v1741_v18, 0  ;;  %v427_v54 = vsel %vm417_vm3, %v424_v62, %v426_v10 }
  0x9e   : > { %v901_v63 = vmul.f32 %v589_v57, %v246_v9  ;;  %v2490_v14 = vmul.f32 %v1247_v60, %v246_v9  ;;  %v661_v38 = vsel %vm1742_vm14, 0, %v1741_v18  ;;  %v796_v40 = vand.u32 2147483647, %v2488_v36  ;;  %v1866_v1 = vpop.eup %1865  ;;  %v2540_v18 = vld [vmem:[%s2165_s25 + $0x20] sm:$0xff] }
  0x9f   : > { %vm1035_vm11 = vcmp.eq.s32.totalorder %v2406_v4, 2  ;;  %v662_v24 = vsub.s32 32, %v661_v38  ;;  %v663_v0 = vshll.u32 %v2413_v50, %v661_v38  ;;  %v666_v44 = vsub.s32 4294967266, %v661_v38  ;;  %v1868_v26 = vpop.eup %1867 }
  0xa0   : > { %915 = vrot.lane.b32.xlu1 %v901_v63, %s1995_s21  ;;  %v676_v12 = vsub.s32 4, %v2394_v15  ;;  %v2498_v46 = vmul.u32.u64.low %v2433_v59, %v427_v54  ;;  %v2499_v51 = vmul.u32.u64.high %v2433_v59, %v427_v54, %v2498_v46  ;;  %v799_v45 = vand.u32 2139095040, %v2488_v36 }
  0xa1   : > { %v380_v20 = vxor.u32 2147483648, %v1866_v1  ;;  %v664_v52 = vshrl.u32 %v646_v13, %v662_v24  ;;  %v667_v53 = vadd.s32 127, %v666_v44  ;;  %v439_v50 = vmul.u32 %v2433_v59, %v2444_v28 }
  0xa2   : > { %v377_v55 = vxor.u32 2147483648, %v1868_v26  ;;  %vm441_vm12 = vc.u32 %v2478_v30, %v2498_v46  ;;  %v800_v56 = vshrl.u32 %v799_v45, 23  ;;  %v803_v58 = vand.u32 8388607, %v796_v40 }
  0xa3   : > { %v381_v48 = vsel %vm379_vm4, %v380_v20, %v1868_v26  ;;  %v1037_v17 = vsel %vm1035_vm11, %v380_v20, %v1868_v26  ;;  %v665_v2 = vor.u32 %v664_v52, %v663_v0  ;;  %v668_v5 = vshll.u32 %v667_v53, 23 }
  0xa4   : > { %v378_v13 = vsel %vm376_vm5, %v1866_v1, %v377_v55  ;;  %v1034_v59 = vsel %vm1032_vm6, %v1866_v1, %v377_v55  ;;  %v442_v28 = vadd.s32 1, %v2499_v51  ;;  %v1747_v42 = vadd.s32 4294967169, %v800_v56 }
  0xa5   : > { %v382_v41 = vsel %vm375_vm7, %v378_v13, %v381_v48  ;;  %v1038_v7 = vsel %vm1031_vm8, %v1034_v59, %v1037_v17  ;;  %v669_v62 = vor.u32 4788187, %v668_v5  ;;  %v672_v8 = vcvt.s32.f32 %v665_v2 }
  0xa6   : > { %v383_v43 = vsel %vm373_vm9, nan, %v382_v41  ;;  %v1039_v49 = vsel %vm373_vm9, nan, %v1038_v7  ;;  %v677_v10 = vsel %vm592_vm10, %v676_v12, %v2394_v15  ;;  %v443_v34 = vsel %vm441_vm12, %v442_v28, %v2499_v51 }
  0xa7   : > { %v899_v11 = vmul.f32 %v383_v43, %v244_v32  ;;  %v2531_v9 = vmul.f32 %v1039_v49, %v244_v32  ;;  %v670_v4 = vand.u32 2147483647, %v669_v62  ;;  %v444_v27 = vadd.s32 %v443_v34, %v439_v50 }
  0xa8   : > { %vm2535_vm13 = vcmp.le.f32.partialorder %v590_v19, 0.7853982  ;;  %v806_v3 = vadd.s32 1, %v1747_v42  ;;  %v804_v22 = vor.u32 8388608, %v803_v58  ;;  %v693_v25 = vand.u32 2147483647, %v2540_v18 }
  0xa9   : > { %911 = vrot.lane.b32.xlu0 %v899_v11, %s1995_s21  ;;  %v673_v15 = vmul.f32 %v672_v8, %v670_v4  ;;  %v679_v21 = vsel %vm2535_vm13, 0, %v677_v10  ;;  %v445_v23 = vadd.s32 536870912, %v444_v27  ;;  %v696_v54 = vand.u32 2139095040, %v2540_v18 }
  0xaa   : > { %vm807_vm15 = vcmp.gt.s32.totalorder %v806_v3, 0  ;;  %v2549_v63 = vand.u32 3, %v679_v21  ;;  %v2554_v0 = vadd.s32 %v2498_v46, %v2478_v30  ;;  %v2557_v1 = vshll.u32 %v804_v22, 8 }
  0xab   : > { %v674_v57 = vxor.u32 2147483648, %v673_v15  ;;  %v2546_v60 = vshrl.u32 %v445_v23, 30  ;;  %v808_v19 = vsel %vm807_vm15, %v806_v3, 0  ;;  %v2565_v26 = vand.u32 8388607, %v693_v25 }
  0xac   : > { %v810_v38 = vand.u32 31, %v808_v19  ;;  %v809_v30 = vshrl.u32 %v808_v19, 5  ;;  %v697_v46 = vshrl.u32 %v696_v54, 23  ;;  %vm688_vm0 = vcmp.eq.s32.totalorder %v2549_v63, 2 }
  0xad   : > { %v675_v24 = vsel %vm592_vm10, %v674_v57, %v673_v15  ;;  %v447_v44 = vshll.u32 %v2546_v60, 30  ;;  %vm685_vm1 = vcmp.eq.s32.totalorder %v2549_v63, 0  ;;  %vm684_vm2 = vcmp.lt.s32.totalorder %v2549_v63, 2 }
  0xae   : > { %v678_v12 = vsel %vm2535_vm13, %v2182_v6, %v675_v24  ;;  %v811_v51 = vsub.s32 32, %v810_v38  ;;  %v813_v45 = vshll.u32 %v1989_v31, %v810_v38  ;;  %v816_v53 = vshll.u32 %v1990_v33, %v810_v38 }
  0xaf   : > { %1869 = vcosq.f32 %v678_v12  ;;  %v2567_v20 = vsub.s32 %v444_v27, %v447_v44  ;;  %v819_v50 = vshll.u32 %v1991_v35, %v810_v38  ;;  %v822_v2 = vshll.u32 %v1992_v37, %v810_v38 }
  0xb0   : > { %1871 = vsinq.f32 %v678_v12  ;;  %v814_v52 = vshrl.u32 %v1990_v33, %v811_v51  ;;  %v812_v56 = vshrl.u32 %v1989_v31, %v811_v51  ;;  %v817_v58 = vshrl.u32 %v1991_v35, %v811_v51 }
  0xb1   : > { %v450_v55 = vsub.s32 0, %v2567_v20  ;;  %v820_v48 = vshrl.u32 %v1992_v37, %v811_v51  ;;  %v823_v5 = vshrl.u32 %v1993_v39, %v811_v51  ;;  %v825_v32 = vshll.u32 %v1993_v39, %v810_v38 }
  0xb2   : > { %v815_v17 = vor.u32 %v814_v52, %v813_v45  ;;  %v1743_v59 = vadd.s32 4294967169, %v697_v46  ;;  %v701_v28 = vor.u32 8388608, %v2565_v26  ;;  %v1341_v42 = vadd.s32 3, %v679_v21 }
  0xb3   : > { %v1732_v13 = vmin.u32 %v450_v55, %v2567_v20  ;;  %vm682_vm3 = vweird.f32 %v2182_v6  ;;  %v818_v41 = vor.u32 %v817_v58, %v816_v53  ;;  %v821_v7 = vor.u32 %v820_v48, %v819_v50  ;;  %v2611_v58 = vld [vmem:[%s2159_s30 + $0x18] sm:$0xff] }
  0xb4   : > { %v824_v62 = vor.u32 %v823_v5, %v822_v2  ;;  %v826_v8 = vshrl.u32 %v1994_v47, %v811_v51  ;;  %vm828_vm4 = vcmp.lt.s32.totalorder %v809_v30, 1  ;;  %vm829_vm5 = vcmp.lt.s32.totalorder %v809_v30, 2 }
  0xb5   : > { %v452_v43 = vclz %v1732_v13  ;;  %vm830_vm6 = vcmp.lt.s32.totalorder %v809_v30, 3  ;;  %vm831_vm7 = vcmp.lt.s32.totalorder %v809_v30, 4  ;;  %v832_v10 = vsel %vm828_vm4, %v812_v56, %v815_v17 }
  0xb6   : > { %v827_v49 = vor.u32 %v826_v8, %v825_v32  ;;  %v836_v34 = vsel %vm828_vm4, %v815_v17, %v818_v41  ;;  %v833_v4 = vsel %vm831_vm7, %v821_v7, 2102212464  ;;  %v837_v27 = vsel %vm831_vm7, %v824_v62, 920167782 }
  0xb7   : > { %v1733_v11 = vadd.s32 4294967294, %v452_v43  ;;  %v840_v16 = vsel %vm828_vm4, %v818_v41, %v821_v7  ;;  %v834_v3 = vsel %vm830_vm6, %v818_v41, %v833_v4  ;;  %v838_v15 = vsel %vm830_vm6, %v821_v7, %v837_v27 }
  0xb8   : > { %v841_v21 = vsel %vm831_vm7, %v827_v49, 1326507024  ;;  %v703_v23 = vadd.s32 1, %v1743_v59  ;;  %v835_v57 = vsel %vm829_vm5, %v832_v10, %v834_v3  ;;  %v2592_v54 = vand.u32 3, %v1341_v42 }
  0xb9   : > { %v2588_v22 = vpop.eup %1869  ;;  %vm1734_vm8 = vcmp.lt.s32.totalorder %v1733_v11, 0  ;;  %v842_v19 = vsel %vm830_vm6, %v824_v62, %v841_v21  ;;  %v839_v12 = vsel %vm829_vm5, %v836_v34, %v838_v15  ;;  %vm386_vm10 = vcmp.lt.s32.totalorder %v2266_v61, 0 }
  0xba   : > { %v2594_v38 = vpop.eup %1871  ;;  %v689_v24 = vxor.u32 2147483648, %v2588_v22  ;;  %v455_v44 = vsel %vm1734_vm8, 0, %v1733_v11  ;;  %v843_v51 = vsel %vm829_vm5, %v840_v16, %v842_v19  ;;  %vm704_vm9 = vcmp.gt.s32.totalorder %v703_v23, 0 }
  0xbb   : > { %v686_v45 = vxor.u32 2147483648, %v2594_v38  ;;  %v456_v46 = vsub.s32 32, %v455_v44  ;;  %v457_v52 = vshll.u32 %v2567_v20, %v455_v44  ;;  %v460_v53 = vsub.s32 4294967266, %v455_v44 }
  0xbc   : > { %v690_v50 = vsel %vm688_vm0, %v689_v24, %v2594_v38  ;;  %v2607_v55 = vmul.u32.u64.low %v2557_v1, %v843_v51  ;;  %v2608_v56 = vmul.u32.u64.high %v2557_v1, %v843_v51, %v2607_v55  ;;  %v705_v17 = vsel %vm704_vm9, %v703_v23, 0 }
  0xbd   : > { %v687_v20 = vsel %vm685_vm1, %v2588_v22, %v686_v45  ;;  %v458_v30 = vshrl.u32 %v2554_v0, %v456_v46  ;;  %v461_v48 = vadd.s32 127, %v460_v53  ;;  %v2627_v13 = vshrl.u32 %v705_v17, 5 }
  0xbe   : > { %v691_v2 = vsel %vm684_vm2, %v687_v20, %v690_v50  ;;  %v2623_v5 = vmul.u32.u64.low %v2557_v1, %v839_v12  ;;  %v2624_v32 = vmul.u32.u64.high %v2557_v1, %v839_v12, %v2623_v5  ;;  %vm2633_vm14 = vcmp.le.f32.partialorder %v384_v29, 0.7853982 }
  0xbf   : > { %v692_v59 = vsel %vm682_vm3, nan, %v691_v2  ;;  %v459_v63 = vor.u32 %v458_v30, %v457_v52  ;;  %v462_v42 = vshll.u32 %v461_v48, 23  ;;  %v707_v41 = vand.u32 31, %v705_v17 }
  0xc0   : > { %v902_v7 = vmul.f32 %v692_v59, %v2611_v58  ;;  %v470_v62 = vsub.s32 4, %v2546_v60  ;;  %v851_v8 = vmul.u32 %v2557_v1, %v835_v57  ;;  %vm853_vm11 = vc.u32 %v2608_v56, %v2623_v5 }
  0xc1   : > { %v463_v43 = vor.u32 4788187, %v462_v42  ;;  %v466_v49 = vcvt.s32.f32 %v459_v63  ;;  %v708_v10 = vsub.s32 32, %v707_v41  ;;  %v710_v29 = vshll.u32 %v1989_v31, %v707_v41 }
  0xc2   : > { %917 = vrot.lane.b32.xlu1 %v902_v7, %s1995_s21  ;;  %v854_v34 = vadd.s32 1, %v2624_v32  ;;  %v713_v11 = vshll.u32 %v1990_v33, %v707_v41  ;;  %v716_v4 = vshll.u32 %v1991_v35, %v707_v41  ;;  %v719_v27 = vshll.u32 %v1992_v37, %v707_v41 }
  0xc3   : > { %v464_v16 = vand.u32 2147483647, %v463_v43  ;;  %v711_v1 = vshrl.u32 %v1990_v33, %v708_v10  ;;  %v714_v3 = vshrl.u32 %v1991_v35, %v708_v10  ;;  %vm725_vm12 = vcmp.lt.s32.totalorder %v2627_v13, 1 }
  0xc4   : > { %v855_v15 = vsel %vm853_vm11, %v854_v34, %v2624_v32  ;;  %v717_v21 = vshrl.u32 %v1992_v37, %v708_v10  ;;  %v720_v23 = vshrl.u32 %v1993_v39, %v708_v10  ;;  %v722_v57 = vshll.u32 %v1993_v39, %v707_v41 }
  0xc5   : > { %v467_v19 = vmul.f32 %v466_v49, %v464_v16  ;;  %v856_v44 = vadd.s32 %v855_v15, %v851_v8  ;;  %v712_v12 = vor.u32 %v711_v1, %v710_v29  ;;  %v715_v51 = vor.u32 %v714_v3, %v713_v11 }
  0xc6   : > { %v709_v46 = vshrl.u32 %v1989_v31, %v708_v10  ;;  %v718_v33 = vor.u32 %v717_v21, %v716_v4  ;;  %v721_v52 = vor.u32 %v720_v23, %v719_v27  ;;  %v723_v35 = vshrl.u32 %v1994_v47, %v708_v10 }
  0xc7   : > { %v468_v53 = vxor.u32 2147483648, %v467_v19  ;;  %v857_v50 = vadd.s32 536870912, %v856_v44  ;;  %vm727_vm13 = vcmp.lt.s32.totalorder %v2627_v13, 3  ;;  %vm728_vm15 = vcmp.lt.s32.totalorder %v2627_v13, 4 }
  0xc8   : > { %v724_v37 = vor.u32 %v723_v35, %v722_v57  ;;  %vm726_vm0 = vcmp.lt.s32.totalorder %v2627_v13, 2  ;;  %v730_v39 = vsel %vm728_vm15, %v718_v33, 2102212464  ;;  %v733_v31 = vsel %vm725_vm12, %v712_v12, %v715_v51 }
  0xc9   : > { %v469_v47 = vsel %vm386_vm10, %v468_v53, %v467_v19  ;;  %v471_v55 = vsel %vm386_vm10, %v470_v62, %v2546_v60  ;;  %v2670_v20 = vshrl.u32 %v857_v50, 30  ;;  %v734_v30 = vsel %vm728_vm15, %v721_v52, 920167782 }
  0xca   : > { %v472_v48 = vsel %vm2633_vm14, %v2266_v61, %v469_v47  ;;  %v729_v17 = vsel %vm725_vm12, %v709_v46, %v712_v12  ;;  %v731_v2 = vsel %vm727_vm13, %v715_v51, %v730_v39  ;;  %v735_v32 = vsel %vm727_vm13, %v718_v33, %v734_v30  ;;  %v2795_v12 = vld [vmem:[%s2159_s30 + $0x8] sm:$0xff] }
  0xcb   : > { %1873 = vcosq.f32 %v472_v48  ;;  %v859_v60 = vshll.u32 %v2670_v20, 30  ;;  %v736_v59 = vsel %vm726_vm0, %v733_v31, %v735_v32  ;;  %v737_v63 = vsel %vm725_vm12, %v715_v51, %v718_v33 }
  0xcc   : > { %v2695_v42 = vsel %vm2633_vm14, 0, %v471_v55  ;;  %1875 = vsinq.f32 %v472_v48  ;;  %v738_v41 = vsel %vm728_vm15, %v724_v37, 1326507024  ;;  %v741_v7 = vshll.u32 %v701_v28, 8 }
  0xcd   : > { %v2701_v62 = vsub.s32 %v856_v44, %v859_v60  ;;  %v739_v8 = vsel %vm727_vm13, %v721_v52, %v738_v41  ;;  %v732_v43 = vsel %vm726_vm0, %v729_v17, %v731_v2  ;;  %v477_v29 = vand.u32 3, %v2695_v42 }
  0xce   : > { %v740_v0 = vsel %vm726_vm0, %v737_v63, %v739_v8  ;;  %v2709_v49 = vmul.u32.u64.low %v741_v7, %v736_v59  ;;  %v2710_v10 = vmul.u32.u64.high %v741_v7, %v736_v59, %v2709_v49  ;;  %vm1344_vm1 = vcmp.eq.s32.totalorder %v2592_v54, 0 }
  0xcf   : > { %v862_v26 = vsub.s32 0, %v2701_v62  ;;  %v2715_v28 = vmul.u32.u64.low %v741_v7, %v740_v0  ;;  %v2716_v34 = vmul.u32.u64.high %v741_v7, %v740_v0, %v2715_v28  ;;  %v748_v4 = vmul.u32 %v741_v7, %v732_v43 }
  0xd0   : > { %vm1347_vm2 = vcmp.eq.s32.totalorder %v2592_v54, 2  ;;  %v751_v13 = vadd.s32 1, %v2710_v10  ;;  %vm1343_vm4 = vcmp.lt.s32.totalorder %v2592_v54, 2  ;;  %vm478_vm5 = vcmp.lt.s32.totalorder %v477_v29, 2 }
  0xd1   : > { %v1748_v11 = vmin.u32 %v862_v26, %v2701_v62  ;;  %vm750_vm6 = vc.u32 %v2716_v34, %v2709_v49  ;;  %v1346_v16 = vsel %vm1344_vm1, %v2588_v22, %v686_v45  ;;  %vm482_vm7 = vcmp.eq.s32.totalorder %v477_v29, 2 }
  0xd2   : > { %v752_v54 = vsel %vm750_vm6, %v751_v13, %v2710_v10  ;;  %v1349_v1 = vsel %vm1347_vm2, %v689_v24, %v2594_v38  ;;  %vm256_vm8 = vcmask 261120   ;;  %vm479_vm9 = vcmp.eq.s32.totalorder %v477_v29, 0 }
  0xd3   : > { %v864_v27 = vclz %v1748_v11  ;;  %v753_v15 = vadd.s32 %v752_v54, %v748_v4  ;;  %v1350_v21 = vsel %vm1343_vm4, %v1346_v16, %v1349_v1  ;;  %v852_v38 = vadd.s32 %v2623_v5, %v2608_v56 }
  0xd4   : > { %v1351_v24 = vsel %vm682_vm3, nan, %v1350_v21  ;;  %v1996_v57 = vmov 0.0   ;;  %vm476_vm10 = vweird.f32 %v2266_v61  ;;  %vm798_vm14 = vcmp.lt.s32.totalorder %v2488_v36, 0 }
  0xd5   : > { %v2740_v45 = vpop.eup %1873  ;;  %v1749_v3 = vadd.s32 4294967294, %v864_v27  ;;  %257 = vst.msk [vmem:[%s2734_s7] sm:$0xff] %vm256_vm8, %v1996_v57  ;;  %260 = vst.msk [vmem:[%s2734_s7 + $0x18] sm:$0xff] %vm256_vm8, %v1996_v57  ;;  %v754_v56 = vadd.s32 536870912, %v753_v15  ;;  %v2787_v5 = vmul.f32 %v1351_v24, %v2611_v58  ;;  %vm2813_vm11 = vcmp.le.f32.partialorder %v796_v40, 0.7853982 }
  0xd6   : > { %v2742_v23 = vpop.eup %1875  ;;  %v483_v22 = vxor.u32 2147483648, %v2740_v45  ;;  %261 = vst.msk [vmem:[%s2734_s7 + $0x20] sm:$0xff] %vm256_vm8, %v1996_v57  ;;  %262 = vst.msk [vmem:[%s2734_s7 + $0x28] sm:$0xff] %vm256_vm8, %v1996_v57  ;;  %v1133_v0 = vadd.s32 3, %v2695_v42  ;;  %v749_v29 = vadd.s32 %v2709_v49, %v2716_v34  ;;  %vm888_vm0 = vweird.f32 %v2488_v36 }
  0xd7   : > { %264 = vst.msk [vmem:[%s2734_s7 + $0x38] sm:$0xff] %vm256_vm8, %v1996_v57  ;;  %265 = vst.msk [vmem:[%s2734_s7 + $0x40] sm:$0xff] %vm256_vm8, %v1996_v57  ;;  %v480_v6 = vxor.u32 2147483648, %v2742_v23  ;;  %vm1750_vm3 = vcmp.lt.s32.totalorder %v1749_v3, 0  ;;  %v2803_v35 = vshrl.u32 %v754_v56, 30 }
  0xd8   : > { %268 = vst.msk [vmem:[%s2734_s7 + $0x58] sm:$0xff] %vm256_vm8, %v1996_v57  ;;  %258 = vst.msk [vmem:[%s2734_s7 + $0x8] sm:$0xff] %vm256_vm8, %v1996_v57  ;;  %v484_v19 = vsel %vm482_vm7, %v483_v22, %v2742_v23  ;;  %v867_v44 = vsel %vm1750_vm3, 0, %v1749_v3  ;;  %v1134_v13 = vand.u32 3, %v1133_v0  ;;  %vm2836_vm6 = vcmp.le.f32.partialorder %v693_v25, 0.7853982 }
  0xd9   : > { %259 = vst.msk [vmem:[%s2734_s7 + $0x10] sm:$0xff] %vm256_vm8, %v1996_v57  ;;  %263 = vst.msk [vmem:[%s2734_s7 + $0x30] sm:$0xff] %vm256_vm8, %v1996_v57  ;;  %v481_v51 = vsel %vm479_vm9, %v2740_v45, %v480_v6  ;;  %v868_v46 = vsub.s32 32, %v867_v44  ;;  %v869_v33 = vshll.u32 %v2701_v62, %v867_v44  ;;  %v872_v58 = vsub.s32 4294967266, %v867_v44 }
  0xda   : > { %266 = vst.msk [vmem:[%s2734_s7 + $0x48] sm:$0xff] %vm256_vm8, %v1996_v57  ;;  %267 = vst.msk [vmem:[%s2734_s7 + $0x50] sm:$0xff] %vm256_vm8, %v1996_v57  ;;  %v485_v52 = vsel %vm478_vm5, %v481_v51, %v484_v19  ;;  %v756_v31 = vshll.u32 %v2803_v35, 30  ;;  %v882_v62 = vsub.s32 4, %v2670_v20  ;;  %vm1136_vm13 = vcmp.eq.s32.totalorder %v1134_v13, 0 }
  0xdb   : > { %v486_v53 = vsel %vm476_vm10, nan, %v485_v52  ;;  %v870_v50 = vshrl.u32 %v852_v38, %v868_v46  ;;  %v873_v37 = vadd.s32 127, %v872_v58  ;;  %vm1139_vm15 = vcmp.eq.s32.totalorder %v1134_v13, 2  ;;  %269 = vst.msk [vmem:[%s2861_s15] sm:$0xff] %vm256_vm8, %v1996_v57  ;;  %271 = vst.msk [vmem:[%s2861_s15 + $0x10] sm:$0xff] %vm256_vm8, %v1996_v57 }
  0xdc   : > { %v900_v39 = vmul.f32 %v486_v53, %v2795_v12  ;;  %v757_v30 = vsub.s32 %v753_v15, %v756_v31  ;;  %v883_v40 = vsel %vm798_vm14, %v882_v62, %v2670_v20  ;;  %vm1135_vm2 = vcmp.lt.s32.totalorder %v1134_v13, 2  ;;  %272 = vst.msk [vmem:[%s2861_s15 + $0x18] sm:$0xff] %vm256_vm8, %v1996_v57  ;;  %273 = vst.msk [vmem:[%s2861_s15 + $0x20] sm:$0xff] %vm256_vm8, %v1996_v57  ;;  %v248_v62 = vld [vmem:[%s2159_s30 + $0x20] sm:$0xff] }
  0xdd   : > { %v871_v47 = vor.u32 %v870_v50, %v869_v33  ;;  %v874_v55 = vshll.u32 %v873_v37, 23  ;;  %v885_v42 = vsel %vm2813_vm11, 0, %v883_v40  ;;  %v1138_v38 = vsel %vm1136_vm13, %v2740_v45, %v480_v6  ;;  %276 = vst.msk [vmem:[%s2861_s15 + $0x38] sm:$0xff] %vm256_vm8, %v1996_v57  ;;  %277 = vst.msk [vmem:[%s2861_s15 + $0x40] sm:$0xff] %vm256_vm8, %v1996_v57 }
  0xde   : > { %913 = vrot.lane.b32.xlu0 %v900_v39, %s1995_s21  ;;  %v759_v2 = vsub.s32 0, %v757_v30  ;;  %v889_v3 = vand.u32 3, %v885_v42  ;;  %v1549_v20 = vadd.s32 3, %v885_v42  ;;  %v1141_v24 = vsel %vm1139_vm15, %v483_v22, %v2742_v23  ;;  %v249_v22 = vld [vmem:[%s2159_s30 + $0x28] sm:$0xff]  ;;  %280 = vst.msk [vmem:[%s2861_s15 + $0x58] sm:$0xff] %vm256_vm8, %v1996_v57  ;;  %270 = vst.msk [vmem:[%s2861_s15 + $0x8] sm:$0xff] %vm256_vm8, %v1996_v57 }
  0xdf   : > { %v875_v48 = vor.u32 4788187, %v874_v55  ;;  %v878_v17 = vcvt.s32.f32 %v871_v47  ;;  %vm695_vm7 = vcmp.lt.s32.totalorder %v2540_v18, 0  ;;  %v779_v45 = vsub.s32 4, %v2803_v35  ;;  %274 = vst.msk [vmem:[%s2861_s15 + $0x28] sm:$0xff] %vm256_vm8, %v1996_v57  ;;  %275 = vst.msk [vmem:[%s2861_s15 + $0x30] sm:$0xff] %vm256_vm8, %v1996_v57 }
  0xe0   : > { %v1744_v60 = vmin.u32 %v759_v2, %v757_v30  ;;  %vm894_vm1 = vcmp.eq.s32.totalorder %v889_v3, 2  ;;  %vm891_vm4 = vcmp.eq.s32.totalorder %v889_v3, 0  ;;  %v1550_v51 = vand.u32 3, %v1549_v20  ;;  %278 = vst.msk [vmem:[%s2861_s15 + $0x48] sm:$0xff] %vm256_vm8, %v1996_v57  ;;  %279 = vst.msk [vmem:[%s2861_s15 + $0x50] sm:$0xff] %vm256_vm8, %v1996_v57 }
  0xe1   : > { %v876_v32 = vand.u32 2147483647, %v875_v48  ;;  %vm890_vm5 = vcmp.lt.s32.totalorder %v889_v3, 2  ;;  %v1142_v23 = vsel %vm1135_vm2, %v1138_v38, %v1141_v24  ;;  %v780_v47 = vsel %vm695_vm7, %v779_v45, %v2803_v35 }
  0xe2   : > { %v761_v63 = vclz %v1744_v60  ;;  %vm1552_vm9 = vcmp.eq.s32.totalorder %v1550_v51, 0  ;;  %vm1555_vm3 = vcmp.eq.s32.totalorder %v1550_v51, 2  ;;  %v1143_v39 = vsel %vm476_vm10, nan, %v1142_v23 }
  0xe3   : > { %v879_v59 = vmul.f32 %v878_v17, %v876_v32  ;;  %v1561_v48 = vmul.f32 %v1143_v39, %v2795_v12  ;;  %v782_v17 = vsel %vm2836_vm6, 0, %v780_v47  ;;  %vm785_vm13 = vweird.f32 %v2540_v18 }
  0xe4   : > { %v1745_v8 = vadd.s32 4294967294, %v761_v63  ;;  %v786_v32 = vand.u32 3, %v782_v17  ;;  %v1445_v12 = vadd.s32 3, %v782_v17 }
  0xe5   : > { %v880_v7 = vxor.u32 2147483648, %v879_v59 }
  0xe6   : > { %vm1746_vm12 = vcmp.lt.s32.totalorder %v1745_v8, 0  ;;  %vm791_vm10 = vcmp.eq.s32.totalorder %v786_v32, 2  ;;  %v1446_v63 = vand.u32 3, %v1445_v12 }
  0xe7   : > { %v881_v43 = vsel %vm798_vm14, %v880_v7, %v879_v59  ;;  %v764_v26 = vsel %vm1746_vm12, 0, %v1745_v8  ;;  %vm1551_vm14 = vcmp.lt.s32.totalorder %v1550_v51, 2  ;;  %vm787_vm12 = vcmp.lt.s32.totalorder %v786_v32, 2 }
  0xe8   : > { %v884_v10 = vsel %vm2813_vm11, %v2488_v36, %v881_v43  ;;  %v765_v28 = vsub.s32 32, %v764_v26  ;;  %v766_v11 = vshll.u32 %v757_v30, %v764_v26  ;;  %v769_v4 = vsub.s32 4294967266, %v764_v26 }
  0xe9   : > { %1877 = vcosq.f32 %v884_v10  ;;  %vm788_vm11 = vcmp.eq.s32.totalorder %v786_v32, 0  ;;  %vm1448_vm8 = vcmp.eq.s32.totalorder %v1446_v63, 0  ;;  %vm1451_vm15 = vcmp.eq.s32.totalorder %v1446_v63, 2 }
  0xea   : > { %1879 = vsinq.f32 %v884_v10  ;;  %v767_v27 = vshrl.u32 %v749_v29, %v765_v28  ;;  %v770_v16 = vadd.s32 127, %v769_v4 }
  0xec   : > { %v768_v54 = vor.u32 %v767_v27, %v766_v11  ;;  %v771_v1 = vshll.u32 %v770_v16, 23 }
  0xee   : > { %v772_v49 = vor.u32 4788187, %v771_v1  ;;  %v775_v34 = vcvt.s32.f32 %v768_v54 }
  0xf0   : > { %v773_v15 = vand.u32 2147483647, %v772_v49 }
  0xf2   : > { %v776_v44 = vmul.f32 %v775_v34, %v773_v15 }
  0xf3   : > { %v1878_v21 = vpop.eup %1877 }
  0xf4   : > { %v1880_v56 = vpop.eup %1879  ;;  %v895_v19 = vxor.u32 2147483648, %v1878_v21  ;;  %v777_v58 = vxor.u32 2147483648, %v776_v44 }
  0xf5   : > { %v892_v46 = vxor.u32 2147483648, %v1880_v56 }
  0xf6   : > { %v896_v6 = vsel %vm894_vm1, %v895_v19, %v1880_v56  ;;  %v778_v50 = vsel %vm695_vm7, %v777_v58, %v776_v44  ;;  %v1557_v30 = vsel %vm1555_vm3, %v895_v19, %v1880_v56  ;;  %vm929_vm1 = vcmask 195648  }
  0xf7   : > { %v893_v52 = vsel %vm891_vm4, %v1878_v21, %v892_v46  ;;  %v781_v25 = vsel %vm2836_vm6, %v2540_v18, %v778_v50  ;;  %v1554_v55 = vsel %vm1552_vm9, %v1878_v21, %v892_v46 }
  0xf8   : > { %v897_v53 = vsel %vm890_vm5, %v893_v52, %v896_v6  ;;  %1881 = vcosq.f32 %v781_v25  ;;  %v1558_v2 = vsel %vm1551_vm14, %v1554_v55, %v1557_v30 }
  0xf9   : > { %v898_v37 = vsel %vm888_vm0, nan, %v897_v53  ;;  %1883 = vsinq.f32 %v781_v25  ;;  %v1559_v61 = vsel %vm888_vm0, nan, %v1558_v2  ;;  %vm1447_vm0 = vcmp.lt.s32.totalorder %v1446_v63, 2 }
  0xfa   : > { %v904_v31 = vmul.f32 %v898_v37, %v249_v22  ;;  %v1565_v35 = vmul.f32 %v1559_v61, %v249_v22 }
  0xfc   : > { %921 = vrot.lane.b32.xlu1 %v904_v31, %s1995_s21 }
 0x100   : > { %1574 = vrot.lane.b32.xlu1 %v1561_v48, %s1995_s21 }
 0x102   : > { %v1882_v36 = vpop.eup %1881 }
 0x103   : > { %v1884_v60 = vpop.eup %1883  ;;  %v792_v59 = vxor.u32 2147483648, %v1882_v36 }
 0x104   : > { %1578 = vrot.lane.b32.xlu1 %v2787_v5, %s1995_s21  ;;  %v789_v41 = vxor.u32 2147483648, %v1884_v60 }
 0x105   : > { %v793_v7 = vsel %vm791_vm10, %v792_v59, %v1884_v60  ;;  %v1453_v10 = vsel %vm1451_vm15, %v792_v59, %v1884_v60 }
 0x106   : > { %v790_v8 = vsel %vm788_vm11, %v1882_v36, %v789_v41  ;;  %v1450_v0 = vsel %vm1448_vm8, %v1882_v36, %v789_v41 }
 0x107   : > { %v794_v57 = vsel %vm787_vm12, %v790_v8, %v793_v7  ;;  %v1454_v29 = vsel %vm1447_vm0, %v1450_v0, %v1453_v10 }
 0x108   : > { %1582 = vrot.lane.b32.xlu1 %v1565_v35, %s1995_s21  ;;  %v795_v5 = vsel %vm785_vm13, nan, %v794_v57  ;;  %v1455_v40 = vsel %vm785_vm13, nan, %v1454_v29 }
 0x109   : > { %v903_v43 = vmul.f32 %v795_v5, %v248_v62  ;;  %v1564_v28 = vmul.f32 %v1455_v40, %v248_v62 }
 0x10b   : > { %919 = vrot.lane.b32.xlu0 %v903_v43, %s1995_s21 }
 0x10f   : > { %1572 = vrot.lane.b32.xlu0 %v2531_v9, %s1995_s21 }
 0x112   : > { %v916_v26 = vpop.permute.xlu1 %915 }
 0x113   : > { %932 = vst.msk [vmem:[%s2734_s7 + $0x28] sm:$0xff] %vm929_vm1, %v916_v26  ;;  %1576 = vrot.lane.b32.xlu0 %v2490_v14, %s1995_s21 }
 0x117   : > { %1580 = vrot.lane.b32.xlu0 %v1564_v28, %s1995_s21 }
 0x11b   : > { %v912_v11 = vpop.permute.xlu0 %911 }
 0x11c   : > { %930 = vst.msk [vmem:[%s2734_s7 + $0x8] sm:$0xff] %vm929_vm1, %v912_v11 }
 0x134   : > { %v918_v9 = vpop.permute.xlu1 %917 }
 0x135   : > { %933 = vst.msk [vmem:[%s2734_s7 + $0x30] sm:$0xff] %vm929_vm1, %v918_v9 }
 0x150   : > { %v914_v18 = vpop.permute.xlu0 %913 }
 0x151   : > { %931 = vst.msk [vmem:[%s2734_s7 + $0x10] sm:$0xff] %vm929_vm1, %v914_v18 }
 0x16e   : > { %v922_v4 = vpop.permute.xlu1 %921 }
 0x16f   : > { %935 = vst.msk [vmem:[%s2734_s7 + $0x50] sm:$0xff] %vm929_vm1, %v922_v4 }
 0x172   : > { %v1575_v14 = vpop.permute.xlu1 %1574 }
 0x173   : > { %1591 = vst.msk [vmem:[%s2861_s15 + $0x10] sm:$0xff] %vm929_vm1, %v1575_v14 }
 0x176   : > { %v1579_v13 = vpop.permute.xlu1 %1578 }
 0x177   : > { %1593 = vst.msk [vmem:[%s2861_s15 + $0x30] sm:$0xff] %vm929_vm1, %v1579_v13 }
 0x17a   : > { %v1583_v42 = vpop.permute.xlu1 %1582 }
 0x17b   : > { %1595 = vst.msk [vmem:[%s2861_s15 + $0x50] sm:$0xff] %vm929_vm1, %v1583_v42 }
 0x17d   : > { %v920_v27 = vpop.permute.xlu0 %919 }
 0x17e   : > { %934 = vst.msk [vmem:[%s2734_s7 + $0x48] sm:$0xff] %vm929_vm1, %v920_v27 }
 0x181   : > { %v1573_v16 = vpop.permute.xlu0 %1572 }
 0x182   : > { %1590 = vst.msk [vmem:[%s2861_s15 + $0x8] sm:$0xff] %vm929_vm1, %v1573_v16 }
 0x185   : > { %v1577_v54 = vpop.permute.xlu0 %1576 }
 0x186   : > { %1592 = vst.msk [vmem:[%s2861_s15 + $0x28] sm:$0xff] %vm929_vm1, %v1577_v54 }
 0x189   : > { %v1581_v1 = vpop.permute.xlu0 %1580 }
 0x18a   : > { %1594 = vst.msk [vmem:[%s2861_s15 + $0x48] sm:$0xff] %vm929_vm1, %v1581_v1 }
 0x18b PF: > { %p17_p11 = scmp.ge.s32.totalorder %s2039_s17, 4   ;;  %s2975_s12 = smov %s1975_s13 }
 0x18c   : > { %s2976_s13 = smov %s1979_s14  ;;  %s2977_s14 = smov %s2049_s20 }
 0x18d   : > { %s2978_s15 = smov %s2039_s17  ;;  %19 = sbr.rel (!%p17_p11) target bundleno = 5 (0x5), region = 93 }
 0x194   :  { %1633 = vsyncpa [#allocation3], 1 }
 0x195   :  { %1635 = vsyncpa [#allocation3 + $0x1], 1 }
 0x196   :  { %1636 = vsyncpa [#allocation5], 1 }
 0x197   :  { %1638 = vsyncpa [#allocation5 + $0x1], 1 }

// kernel: ap2poh_forward.3
= control target key start
LH: loop header
LB: loop body
LE: loop exit
PB: predicated region body
PF: predicated region fallthrough
CT: control target
= control target key end

     0   :  { %10 = vsyncpa [#allocation6], 0  ;;  %s3674_s0 = inlined_call_operand.vmem [shape: f32[27], index: 0, kind: input, shape index: {}]   ;;  %s3675_s1 = inlined_call_operand.vmem [shape: f32[3], index: 1, kind: input, shape index: {}]   ;;  %s3676_s2 = inlined_call_operand.vmem [shape: f32[2,3,16,16], index: 2, kind: input, shape index: {}]   ;;  %s3677_s3 = inlined_call_operand.vmem [shape: f32[2,3,16,16], index: 3, kind: input, shape index: {}]   ;;  %s3678_s4 = inlined_call_operand.vmem [shape: f32[16,16], index: 4, kind: input, shape index: {}]   ;;  %s3679_s5 = inlined_call_operand.hbm [shape: f32[2,3,16,16], index: 5, kind: output, shape index: {}]  }
   0x1   :  { %11 = vsyncpa [#allocation8], 0 }
   0x2   :  { %12 = vsyncpa [#allocation5], 0 }
   0x3   :  { %14 = vsyncpa [#allocation5 + $0x1], 0  ;;  %s2170_s18 = smov 0   ;;  %s2172_s19 = smov 0  }
   0x4   :  { %s2174_s20 = smov 0   ;;  %s2176_s21 = smov 0  }
   0x5 LB: > { %s2191_s22 = sadd.s32 4294967295, %s2128_s21   ;;  %s1853_s23 = sadd.s32 4294967294, %s2128_s21   ;;  %s2128_s21 = sphi %s2176_s21, %s3837_s21   ;;  %s2124_s20 = sphi %s2174_s20, %s3836_s20   ;;  %s2120_s19 = sphi %s2172_s19, %s3835_s19   ;;  %s2116_s18 = sphi %s2170_s18, %s3834_s18  }
   0x6   : > { %s2195_s24 = sadd.s32 1, %s2128_s21   ;;  %s142_s25 = sadd.s32 1, %s2124_s20 }
   0x7   : > { %s139_s26 = ssub.s32 %s2128_s21, %s2195_s24  ;;  %p152_p0 = scmp.ne.s32.totalorder %s2124_s20, %s2120_s19 }
   0x8   : > { %p140_p1 = scmp.eq.s32.totalorder %s139_s26, 0  ;;  %p153_p2 = scmp.eq.s32.totalorder %s2191_s22, 1 }
   0x9   : > { %p158_p3 = scmp.ne.s32.totalorder %s2120_s19, %s2116_s18  ;;  %p159_p4 = scmp.eq.s32.totalorder %s1853_s23, 1 }
   0xa   : > { %s2206_s27 = scalar_select %p140_p1, %s2124_s20, %s142_s25  }
   0xb   : > { %p2208_p5 = por %p153_p2, %p152_p0  ;;  %p2212_p6 = por %p159_p4, %p158_p3 }
   0xc   : > { %p1854_p7 = scmp.ge.s32.totalorder %s2128_s21, 1  ;;  %p166_p8 = scmp.lt.s32.totalorder %s2128_s21, 3 }
   0xd   : > { %s3715_s28 = scalar_select %p2208_p5, 1, 0 }
   0xe   : > { %s3716_s29 = scalar_select %p2212_p6, 1, 0 }
   0xf   : > { %p3680_p9 = scmp.eq.s32.totalorder %s2191_s22, 0  ;;  %p2219_p10 = pnand %p1854_p7, %p166_p8 }
  0x10   : > { %s179_s8 = sshll.u32 %s3674_s0, 4  ;;  %s190_s11 = sshll.u32 %s3675_s1, 4  ;;  %s180_s8 = int_to_ptr.vmem [resolvable:$true] %s179_s8  ;;  %s191_s11 = int_to_ptr.vmem [resolvable:$true] %s190_s11 }
  0x11   : > { %s3717_s30 = scalar_select %p2219_p10, 1, 0 }
  0x12   : > { %p1917_p11 = pneg %p2219_p10  ;;  %s2028_s13 = scalar_lea.vmem %s180_s8, 16 }
  0x13   : > { %p2029_p13 = scmp.ne.s32.totalorder %s180_s8, %s2028_s13  ;;  %p2036_p3 = scmp.lt.s32.totalorder %s180_s8, %s180_s8 }
  0x14   : > { %p2233_p12 = pnand %p3680_p9, %p1917_p11  ;;  %p2037_p4 = scmp.lt.s32.totalorder %s2028_s13, %s2028_s13 }
  0x16   : > { %p2030_p0 = pneg %p2233_p12  ;;  %p2038_p7 = por %p2037_p4, %p2036_p3 }
  0x18   : > { %p2031_p1 = pnand %p2030_p0, %p2029_p13 }
  0x1a   : > { %p2032_p2 = pneg %p2031_p1 }
  0x1c   : > { %p2039_p8 = pnand %p2038_p7, %p2032_p2 }
  0x1e   : > { %2042 = shalt.err (!%p2039_p8)
}
  0x1f   : > { %s2130_s14 = smov [#allocation4]   ;;  %s2043_s15 = scalar_lea.vmem %s191_s11, 16 }
  0x20   : > { %1920 = dma.vmem_to_smem (!%p2233_p12), %s180_s8, 16, %s2130_s14, [#allocation6]  }
  0x21   : > { %p2044_p11 = scmp.ne.s32.totalorder %s191_s11, %s2043_s15  ;;  %p2051_p5 = scmp.lt.s32.totalorder %s191_s11, %s191_s11 }
  0x22   : > { %p2052_p10 = scmp.lt.s32.totalorder %s2043_s15, %s2043_s15 }
  0x23   : > { %p2046_p9 = pnand %p2044_p11, %p2030_p0 }
  0x24   : > { %p2053_p13 = por %p2052_p10, %p2051_p5 }
  0x25   : > { %p2047_p6 = pneg %p2046_p9 }
  0x27   : > { %p2054_p1 = pnand %p2053_p13, %p2047_p6 }
  0x29   : > { %2057 = shalt.err (!%p2054_p1)
}
  0x2a   : > { %s2131_s16 = smov [#allocation7]   ;;  %p3719_p2 = scmp.ne.s32.totalorder %s3717_s30, 0 }
  0x2b   : > { %1923 = dma.vmem_to_smem (!%p2233_p12), %s191_s11, 16, %s2131_s16, [#allocation8]  }
  0x2c   : > { %222 = sbr.rel (%p3719_p2) target bundleno = 871 (0x367), region = 40 }
  0x33   : > { %p3720_p3 = scmp.eq.s32.totalorder %s2191_s22, 0 }
  0x35   : > { %2103 = dma.done.wait (%p3720_p3), [#allocation6], 16   ;;  %p3721_p4 = pmov %p3720_p3 }
  0x36   : > { %p3722_p9 = pmov %p3720_p3 }
  0x37   : > { %2105 = vsyncadd (%p3721_p4), [#allocation6], 4294967280 }
  0x38   : > { %2107 = dma.done.wait (%p3722_p9), [#allocation8], 16   ;;  %p3723_p5 = pmov %p3720_p3 }
  0x3a   : > { %2109 = vsyncadd (%p3723_p5), [#allocation8], 4294967280 }
  0x3b   : > { %232 = sfence }
  0x3c   : > { %p260_p6 = scmp.lt.s32.totalorder %s2191_s22, 1  ;;  %vm270_vm0 = vcmask 146432   ;;  %vm273_vm1 = vcmask 140288   ;;  %v3688_v0 = vmov 0.0   ;;  %s2133_s6 = smov 1   ;;  %vm320_vm2 = vcmask 138248  }
  0x3d   : > { %275 = vst.msk [vmem:[#allocation2 + $0x18] sm:$0xff] %vm270_vm0, %v3688_v0  ;;  %276 = vst.msk [vmem:[#allocation2 + $0x20] sm:$0xff] %vm270_vm0, %v3688_v0  ;;  %s1863_s10 = sld [smem:[#allocation4 + $0x1]]  ;;  %s2134_s11 = smov 127  }
  0x3e   : > { %271 = vst.msk [vmem:[#allocation2] sm:$0xff] %vm270_vm0, %v3688_v0  ;;  %272 = vst.msk [vmem:[#allocation2 + $0x8] sm:$0xff] %vm270_vm0, %v3688_v0  ;;  %s261_s17 = scalar_select %p260_p6, %s2191_s22, 1 }
  0x3f   : > { %278 = vst.msk [vmem:[#allocation2 + $0x30] sm:$0xff] %vm270_vm0, %v3688_v0  ;;  %279 = vst.msk [vmem:[#allocation2 + $0x38] sm:$0xff] %vm270_vm0, %v3688_v0  ;;  %s1872_s12 = sld [smem:[#allocation4 + $0xa]]  ;;  %s1884_s13 = sld [smem:[#allocation4 + $0x13]] }
  0x40   : > { %281 = vst.msk [vmem:[#allocation3] sm:$0xff] %vm270_vm0, %v3688_v0  ;;  %282 = vst.msk [vmem:[#allocation3 + $0x8] sm:$0xff] %vm270_vm0, %v3688_v0  ;;  %s1899_s23 = smul.u32 48, %s261_s17  ;;  %s1864_s14 = sld [smem:[#allocation4 + $0x2]] }
  0x41   : > { %284 = vst.msk [vmem:[#allocation3 + $0x18] sm:$0xff] %vm270_vm0, %v3688_v0  ;;  %285 = vst.msk [vmem:[#allocation3 + $0x20] sm:$0xff] %vm270_vm0, %v3688_v0  ;;  %s1873_s15 = sld [smem:[#allocation4 + $0xb]]  ;;  %s2135_s16 = smov 126  }
  0x42   : > { %287 = vst.msk [vmem:[#allocation3 + $0x30] sm:$0xff] %vm270_vm0, %v3688_v0  ;;  %288 = vst.msk [vmem:[#allocation3 + $0x38] sm:$0xff] %vm270_vm0, %v3688_v0  ;;  %s264_s30 = scalar_lea.vmem %s3676_s2, %s1899_s23  ;;  %s269_s9 = scalar_lea.vmem %s3677_s3, %s1899_s23 }
  0x43   : > { %277 = vst.msk [vmem:[#allocation2 + $0x28] sm:$0x3] %vm273_vm1, %v3688_v0  ;;  %274 = vst.msk [vmem:[#allocation2 + $0x10] sm:$0x3] %vm273_vm1, %v3688_v0  ;;  %v292_v1 = vld [vmem:[%s264_s30 + $0x10] sm:$0xff]  ;;  %v290_v2 = vld [vmem:[%s264_s30] sm:$0xff]  ;;  %v380_v17 = vstv %s1863_s10 }
  0x44   : > { %280 = vst.msk [vmem:[#allocation2 + $0x40] sm:$0x3] %vm273_vm1, %v3688_v0  ;;  %283 = vst.msk [vmem:[#allocation3 + $0x10] sm:$0x3] %vm273_vm1, %v3688_v0  ;;  %306 = vrot.lane.b32.xlu1 %v292_v1, %s2133_s6  ;;  %302 = vrot.lane.b32.xlu0 %v290_v2, %s2133_s6  ;;  %v293_v3 = vld [vmem:[%s264_s30 + $0x18] sm:$0xff]  ;;  %v291_v4 = vld [vmem:[%s264_s30 + $0x8] sm:$0xff] }
  0x45   : > { %286 = vst.msk [vmem:[#allocation3 + $0x28] sm:$0x3] %vm273_vm1, %v3688_v0  ;;  %289 = vst.msk [vmem:[#allocation3 + $0x40] sm:$0x3] %vm273_vm1, %v3688_v0  ;;  %v295_v5 = vld [vmem:[%s264_s30 + $0x28] sm:$0xff]  ;;  %v294_v6 = vld [vmem:[%s264_s30 + $0x20] sm:$0xff]  ;;  %v840_v35 = vstv %s1872_s12  ;;  %v1300_v44 = vstv %s1884_s13 }
  0x46   : > { %v328_v7 = vld [vmem:[%s269_s9 + $0x8] sm:$0xff]  ;;  %v327_v8 = vld [vmem:[%s269_s9] sm:$0xff]  ;;  %v330_v9 = vld [vmem:[%s269_s9 + $0x18] sm:$0xff]  ;;  %v406_v52 = vstv %s1864_s14  ;;  %s1885_s17 = sld [smem:[#allocation4 + $0x14]]  ;;  %s1875_s25 = sld [smem:[#allocation4 + $0xd]] }
  0x47   : > { %v329_v10 = vld [vmem:[%s269_s9 + $0x10] sm:$0xff]  ;;  %v332_v11 = vld [vmem:[%s269_s9 + $0x28] sm:$0xff]  ;;  %v331_v12 = vld [vmem:[%s269_s9 + $0x20] sm:$0xff]  ;;  %v866_v57 = vstv %s1873_s15  ;;  %s1866_s23 = sld [smem:[#allocation4 + $0x4]]  ;;  %s1887_s26 = sld [smem:[#allocation4 + $0x16]] }
  0x48   : > { %308 = vrot.lane.b32.xlu1 %v293_v3, %s2133_s6  ;;  %304 = vrot.lane.b32.xlu0 %v291_v4, %s2133_s6  ;;  %s1867_s30 = sld [smem:[#allocation4 + $0x5]]  ;;  %s1888_s7 = sld [smem:[#allocation4 + $0x17]] }
  0x49   : > { %s1869_s8 = sld [smem:[#allocation4 + $0x7]]  ;;  %s1878_s9 = sld [smem:[#allocation4 + $0x10]] }
  0x4a   : > { %s365_s10 = sld [smem:[#allocation4]]  ;;  %s1890_s12 = sld [smem:[#allocation4 + $0x19]] }
  0x4b   : > { %s1870_s13 = sld [smem:[#allocation4 + $0x8]]  ;;  %s1871_s14 = sld [smem:[#allocation4 + $0x9]] }
  0x4c   : > { %312 = vrot.lane.b32.xlu1 %v295_v5, %s2133_s6  ;;  %310 = vrot.lane.b32.xlu0 %v294_v6, %s2133_s6  ;;  %v1326_v62 = vstv %s1885_s17  ;;  %s1879_s15 = sld [smem:[#allocation4 + $0x11]]  ;;  %s1883_s17 = sld [smem:[#allocation4 + $0x12]] }
  0x4d   : > { %v446_v5 = vstv %s1866_s23  ;;  %s1865_s23 = sld [smem:[#allocation4 + $0x3]]  ;;  %p3832_p12 = scmp.ne.s32.totalorder %s3715_s28, 0 }
  0x50   : > { %341 = vrot.lane.b32.xlu1 %v328_v7, %s2133_s6  ;;  %339 = vrot.lane.b32.xlu0 %v327_v8, %s2133_s6 }
  0x54   : > { %345 = vrot.lane.b32.xlu1 %v330_v9, %s2133_s6  ;;  %343 = vrot.lane.b32.xlu0 %v329_v10, %s2133_s6 }
  0x58   : > { %349 = vrot.lane.b32.xlu1 %v332_v11, %s2133_s6  ;;  %347 = vrot.lane.b32.xlu0 %v331_v12, %s2133_s6  ;;  %s1876_s6 = sld [smem:[#allocation4 + $0xe]] }
  0xb6   : > { %v307_v13 = vpop.permute.xlu1 %306  ;;  %v303_v14 = vpop.permute.xlu0 %302 }
  0xb7   : > { %323 = vst.msk [vmem:[#allocation2 + $0x19] sm:$0xff] %vm320_vm2, %v307_v13  ;;  %321 = vst.msk [vmem:[#allocation2 + $0x1] sm:$0xff] %vm320_vm2, %v303_v14  ;;  %v906_v14 = vstv %s1875_s25  ;;  %s1874_s25 = sld [smem:[#allocation4 + $0xc]] }
  0xba   : > { %v309_v15 = vpop.permute.xlu1 %308  ;;  %v305_v16 = vpop.permute.xlu0 %304 }
  0xbb   : > { %324 = vst.msk [vmem:[#allocation2 + $0x21] sm:$0xff] %vm320_vm2, %v309_v15  ;;  %322 = vst.msk [vmem:[#allocation2 + $0x9] sm:$0xff] %vm320_vm2, %v305_v16 }
  0xbe   : > { %v313_v18 = vpop.permute.xlu1 %312  ;;  %v311_v19 = vpop.permute.xlu0 %310  ;;  %v2291_v20 = vld [vmem:[#allocation2] sm:$0xff]  ;;  %v2315_v36 = vld [vmem:[#allocation2 + $0x18] sm:$0xff] }
  0xbf   : > { %326 = vst.msk [vmem:[#allocation2 + $0x39] sm:$0xff] %vm320_vm2, %v313_v18  ;;  %325 = vst.msk [vmem:[#allocation2 + $0x31] sm:$0xff] %vm320_vm2, %v311_v19  ;;  %v381_v21 = vmul.f32 %v380_v17, %v2291_v20  ;;  %v841_v40 = vmul.f32 %v840_v35, %v2315_v36  ;;  %v407_v54 = vmul.f32 %v406_v52, %v2291_v20  ;;  %v2371_v6 = vld [vmem:[#allocation2 + $0x1] sm:$0xff]  ;;  %v2387_v15 = vld [vmem:[#allocation2 + $0x19] sm:$0xff] }
  0xc0   : > { %v867_v59 = vmul.f32 %v866_v57, %v2315_v36  ;;  %v447_v8 = vmul.f32 %v446_v5, %v2371_v6 }
  0xc1   : > { %385 = vrot.lane.b32.xlu0 %v381_v21, %s2134_s11 }
  0xc2   : > { %v342_v22 = vpop.permute.xlu1 %341  ;;  %v340_v23 = vpop.permute.xlu0 %339  ;;  %v2297_v24 = vld [vmem:[#allocation2 + $0x8] sm:$0xff]  ;;  %v2313_v34 = vld [vmem:[#allocation2 + $0x20] sm:$0xff] }
  0xc3   : > { %358 = vst.msk [vmem:[#allocation3 + $0x9] sm:$0xff] %vm320_vm2, %v342_v22  ;;  %357 = vst.msk [vmem:[#allocation3 + $0x1] sm:$0xff] %vm320_vm2, %v340_v23  ;;  %v382_v25 = vmul.f32 %v380_v17, %v2297_v24  ;;  %v842_v39 = vmul.f32 %v840_v35, %v2313_v34  ;;  %v408_v53 = vmul.f32 %v406_v52, %v2297_v24  ;;  %v2369_v4 = vld [vmem:[#allocation2 + $0x9] sm:$0xff]  ;;  %v2385_v13 = vld [vmem:[#allocation2 + $0x21] sm:$0xff] }
  0xc4   : > { %v868_v58 = vmul.f32 %v866_v57, %v2313_v34  ;;  %v448_v7 = vmul.f32 %v446_v5, %v2369_v4  ;;  %v908_v16 = vmul.f32 %v906_v14, %v2385_v13 }
  0xc5   : > { %387 = vrot.lane.b32.xlu1 %v382_v25, %s2134_s11  ;;  %v1366_v25 = vstv %s1887_s26  ;;  %s1886_s26 = sld [smem:[#allocation4 + $0x15]] }
  0xc6   : > { %v346_v26 = vpop.permute.xlu1 %345  ;;  %v344_v27 = vpop.permute.xlu0 %343  ;;  %v2329_v43 = vld [vmem:[#allocation2 + $0x38] sm:$0xff]  ;;  %v2331_v45 = vld [vmem:[#allocation2 + $0x30] sm:$0xff] }
  0xc7   : > { %360 = vst.msk [vmem:[#allocation3 + $0x21] sm:$0xff] %vm320_vm2, %v346_v26  ;;  %359 = vst.msk [vmem:[#allocation3 + $0x19] sm:$0xff] %vm320_vm2, %v344_v27  ;;  %v1302_v48 = vmul.f32 %v1300_v44, %v2329_v43  ;;  %v1301_v49 = vmul.f32 %v1300_v44, %v2331_v45  ;;  %v1328_v63 = vmul.f32 %v1326_v62, %v2329_v43  ;;  %v2401_v23 = vld [vmem:[#allocation2 + $0x39] sm:$0xff]  ;;  %v2403_v26 = vld [vmem:[#allocation2 + $0x31] sm:$0xff] }
  0xc8   : > { %v1327_v1 = vmul.f32 %v1326_v62, %v2331_v45  ;;  %v1368_v27 = vmul.f32 %v1366_v25, %v2401_v23 }
  0xca   : > { %v2305_v28 = vld [vmem:[#allocation3 + $0x8] sm:$0xff]  ;;  %v2307_v29 = vld [vmem:[#allocation3] sm:$0xff]  ;;  %v350_v30 = vpop.permute.xlu1 %349  ;;  %v348_v31 = vpop.permute.xlu0 %347 }
  0xcb   : > { %v394_v32 = vmul.f32 %v380_v17, %v2305_v28  ;;  %v393_v33 = vmul.f32 %v380_v17, %v2307_v29  ;;  %362 = vst.msk [vmem:[#allocation3 + $0x39] sm:$0xff] %vm320_vm2, %v350_v30  ;;  %361 = vst.msk [vmem:[#allocation3 + $0x31] sm:$0xff] %vm320_vm2, %v348_v31  ;;  %v420_v55 = vmul.f32 %v406_v52, %v2305_v28  ;;  %v2377_v9 = vld [vmem:[#allocation3 + $0x9] sm:$0xff]  ;;  %v2379_v10 = vld [vmem:[#allocation3 + $0x1] sm:$0xff] }
  0xcc   : > { %v419_v56 = vmul.f32 %v406_v52, %v2307_v29  ;;  %v460_v11 = vmul.f32 %v446_v5, %v2377_v9  ;;  %v459_v12 = vmul.f32 %v446_v5, %v2379_v10  ;;  %v907_v17 = vmul.f32 %v906_v14, %v2387_v15  ;;  %v2457_v5 = vld [vmem:[#allocation2 + $0x22] sm:$0xff] }
  0xcd   : > { %399 = vrot.lane.b32.xlu1 %v394_v32, %s2134_s11  ;;  %397 = vrot.lane.b32.xlu0 %v393_v33, %s2134_s11  ;;  %v1367_v30 = vmul.f32 %v1366_v25, %v2403_v26 }
  0xce   : > { %v2319_v37 = vld [vmem:[#allocation3 + $0x20] sm:$0xff]  ;;  %v2321_v38 = vld [vmem:[#allocation3 + $0x18] sm:$0xff] }
  0xcf   : > { %v854_v41 = vmul.f32 %v840_v35, %v2319_v37  ;;  %v853_v42 = vmul.f32 %v840_v35, %v2321_v38  ;;  %v880_v60 = vmul.f32 %v866_v57, %v2319_v37  ;;  %v879_v61 = vmul.f32 %v866_v57, %v2321_v38  ;;  %v2393_v18 = vld [vmem:[#allocation3 + $0x21] sm:$0xff]  ;;  %v2395_v19 = vld [vmem:[#allocation3 + $0x19] sm:$0xff] }
  0xd0   : > { %v920_v21 = vmul.f32 %v906_v14, %v2393_v18  ;;  %v919_v22 = vmul.f32 %v906_v14, %v2395_v19  ;;  %v368_v14 = vstv %s365_s10 }
  0xd1   : > { %847 = vrot.lane.b32.xlu1 %v842_v39, %s2134_s11  ;;  %845 = vrot.lane.b32.xlu0 %v841_v40, %s2134_s11  ;;  %v472_v39 = vstv %s1867_s30  ;;  %s1877_s30 = sld [smem:[#allocation4 + $0xf]] }
  0xd2   : > { %v2335_v46 = vld [vmem:[#allocation3 + $0x38] sm:$0xff]  ;;  %v2337_v47 = vld [vmem:[#allocation3 + $0x30] sm:$0xff]  ;;  %v474_v40 = vmul.f32 %v472_v39, %v2369_v4 }
  0xd3   : > { %v1314_v50 = vmul.f32 %v1300_v44, %v2335_v46  ;;  %v1313_v51 = vmul.f32 %v1300_v44, %v2337_v47  ;;  %v1340_v2 = vmul.f32 %v1326_v62, %v2335_v46  ;;  %v1339_v3 = vmul.f32 %v1326_v62, %v2337_v47  ;;  %v2409_v31 = vld [vmem:[#allocation3 + $0x39] sm:$0xff]  ;;  %v2411_v32 = vld [vmem:[#allocation3 + $0x31] sm:$0xff] }
  0xd4   : > { %v1380_v33 = vmul.f32 %v1366_v25, %v2409_v31  ;;  %v1379_v35 = vmul.f32 %v1366_v25, %v2411_v32  ;;  %v485_v44 = vmul.f32 %v472_v39, %v2379_v10 }
  0xd5   : > { %859 = vrot.lane.b32.xlu1 %v854_v41, %s2134_s11  ;;  %857 = vrot.lane.b32.xlu0 %v853_v42, %s2134_s11  ;;  %v473_v41 = vmul.f32 %v472_v39, %v2371_v6  ;;  %v486_v42 = vmul.f32 %v472_v39, %v2377_v9  ;;  %v2478_v39 = vld [vmem:[#allocation2 + $0x32] sm:$0xff] }
  0xd9   : > { %1307 = vrot.lane.b32.xlu1 %v1302_v48, %s2134_s11  ;;  %1305 = vrot.lane.b32.xlu0 %v1301_v49, %s2134_s11  ;;  %v932_v48 = vstv %s1876_s6  ;;  %s1889_s6 = sld [smem:[#allocation4 + $0x18]] }
  0xda   : > { %v934_v49 = vmul.f32 %v932_v48, %v2385_v13  ;;  %v945_v52 = vmul.f32 %v932_v48, %v2395_v19 }
  0xdd   : > { %1319 = vrot.lane.b32.xlu1 %v1314_v50, %s2134_s11  ;;  %1317 = vrot.lane.b32.xlu0 %v1313_v51, %s2134_s11  ;;  %v933_v50 = vmul.f32 %v932_v48, %v2387_v15  ;;  %v946_v51 = vmul.f32 %v932_v48, %v2393_v18  ;;  %v2487_v48 = vld [vmem:[#allocation3 + $0x3a] sm:$0xff] }
  0xe1   : > { %413 = vrot.lane.b32.xlu1 %v408_v53, %s2135_s16  ;;  %411 = vrot.lane.b32.xlu0 %v407_v54, %s2135_s16  ;;  %v1392_v53 = vstv %s1888_s7  ;;  %s563_s7 = sld [smem:[#allocation7]] }
  0xe2   : > { %v1394_v54 = vmul.f32 %v1392_v53, %v2401_v23  ;;  %v1405_v57 = vmul.f32 %v1392_v53, %v2411_v32 }
  0xe5   : > { %425 = vrot.lane.b32.xlu1 %v420_v55, %s2135_s16  ;;  %423 = vrot.lane.b32.xlu0 %v419_v56, %s2135_s16  ;;  %v1393_v55 = vmul.f32 %v1392_v53, %v2403_v26  ;;  %v1406_v56 = vmul.f32 %v1392_v53, %v2409_v31  ;;  %v375_v53 = vmul.f32 %v2307_v29, %v368_v14 }
  0xe9   : > { %873 = vrot.lane.b32.xlu1 %v868_v58, %s2135_s16  ;;  %871 = vrot.lane.b32.xlu0 %v867_v59, %s2135_s16  ;;  %v2441_v58 = vld [vmem:[#allocation2 + $0xa] sm:$0xff]  ;;  %v512_v59 = vstv %s1869_s8  ;;  %s1880_s8 = sld [smem:[#allocation7 + $0x1]] }
  0xed   : > { %885 = vrot.lane.b32.xlu1 %v880_v60, %s2135_s16  ;;  %883 = vrot.lane.b32.xlu0 %v879_v61, %s2135_s16  ;;  %v2443_v60 = vld [vmem:[#allocation2 + $0x2] sm:$0xff]  ;;  %v514_v61 = vmul.f32 %v512_v59, %v2441_v58 }
  0xee   : > { %v513_v62 = vmul.f32 %v512_v59, %v2443_v60 }
  0xf1   : > { %1333 = vrot.lane.b32.xlu1 %v1328_v63, %s2135_s16  ;;  %1331 = vrot.lane.b32.xlu0 %v1327_v1, %s2135_s16  ;;  %v2449_v63 = vld [vmem:[#allocation3 + $0xa] sm:$0xff]  ;;  %v2451_v1 = vld [vmem:[#allocation3 + $0x2] sm:$0xff] }
  0xf5   : > { %1345 = vrot.lane.b32.xlu1 %v1340_v2, %s2135_s16  ;;  %1343 = vrot.lane.b32.xlu0 %v1339_v3, %s2135_s16  ;;  %v526_v2 = vmul.f32 %v512_v59, %v2449_v63  ;;  %v525_v3 = vmul.f32 %v512_v59, %v2451_v1  ;;  %v827_v59 = vstv %s1871_s14  ;;  %s257_s14 = sand.u32 1, %s2120_s19  }
  0xf6   : > { %v828_v29 = vmul.f32 %v827_v59, %v2315_v36  ;;  %v835_v36 = vmul.f32 %v2321_v38, %v827_v59 }
  0xf9   : > { %453 = vrot.lane.b32.xlu1 %v448_v7, %s2134_s11  ;;  %451 = vrot.lane.b32.xlu0 %v447_v8, %s2134_s11  ;;  %v972_v7 = vstv %s1878_s9  ;;  %v2459_v8 = vld [vmem:[#allocation2 + $0x1a] sm:$0xff]  ;;  %s2617_s9 = sld [smem:[#allocation7 + $0x2]] }
  0xfd   : > { %465 = vrot.lane.b32.xlu1 %v460_v11, %s2134_s11  ;;  %463 = vrot.lane.b32.xlu0 %v459_v12, %s2134_s11  ;;  %v974_v11 = vmul.f32 %v972_v7, %v2457_v5  ;;  %v973_v12 = vmul.f32 %v972_v7, %v2459_v8 }
 0x101   : > { %913 = vrot.lane.b32.xlu1 %v908_v16, %s2134_s11  ;;  %911 = vrot.lane.b32.xlu0 %v907_v17, %s2134_s11  ;;  %v2465_v16 = vld [vmem:[#allocation3 + $0x22] sm:$0xff]  ;;  %v2467_v17 = vld [vmem:[#allocation3 + $0x1a] sm:$0xff] }
 0x102   : > { %v986_v25 = vmul.f32 %v972_v7, %v2465_v16 }
 0x105   : > { %925 = vrot.lane.b32.xlu1 %v920_v21, %s2134_s11  ;;  %923 = vrot.lane.b32.xlu0 %v919_v22, %s2134_s11  ;;  %v369_v21 = vmul.f32 %v368_v14, %v2291_v20 }
 0x109   : > { %1373 = vrot.lane.b32.xlu1 %v1368_v27, %s2134_s11  ;;  %1371 = vrot.lane.b32.xlu0 %v1367_v30, %s2134_s11  ;;  %v985_v27 = vmul.f32 %v972_v7, %v2467_v17 }
 0x10d   : > { %1385 = vrot.lane.b32.xlu1 %v1380_v33, %s2134_s11  ;;  %1383 = vrot.lane.b32.xlu0 %v1379_v35, %s2134_s11  ;;  %v2476_v33 = vld [vmem:[#allocation2 + $0x3a] sm:$0xff]  ;;  %v1432_v35 = vstv %s1890_s12 }
 0x111   : > { %479 = vrot.lane.b32.xlu1 %v474_v40, %s2135_s16  ;;  %477 = vrot.lane.b32.xlu0 %v473_v41, %s2135_s16  ;;  %v370_v40 = vmul.f32 %v368_v14, %v2297_v24  ;;  %v1434_v41 = vmul.f32 %v1432_v35, %v2476_v33 }
 0x115   : > { %491 = vrot.lane.b32.xlu1 %v486_v42, %s2135_s16  ;;  %489 = vrot.lane.b32.xlu0 %v485_v44, %s2135_s16  ;;  %v1433_v42 = vmul.f32 %v1432_v35, %v2478_v39 }
 0x119   : > { %939 = vrot.lane.b32.xlu1 %v934_v49, %s2135_s16  ;;  %937 = vrot.lane.b32.xlu0 %v933_v50, %s2135_s16  ;;  %v2489_v49 = vld [vmem:[#allocation3 + $0x32] sm:$0xff]  ;;  %v1446_v50 = vmul.f32 %v1432_v35, %v2487_v48 }
 0x11a   : > { %v1445_v24 = vmul.f32 %v1432_v35, %v2489_v49 }
 0x11d   : > { %951 = vrot.lane.b32.xlu1 %v946_v51, %s2135_s16  ;;  %949 = vrot.lane.b32.xlu0 %v945_v52, %s2135_s16  ;;  %v538_v51 = vstv %s1870_s13  ;;  %v376_v52 = vmul.f32 %v2305_v28, %v368_v14  ;;  %v829_v28 = vmul.f32 %v827_v59, %v2313_v34  ;;  %v836_v34 = vmul.f32 %v2319_v37, %v827_v59 }
 0x11e   : > { %v552_v7 = vmul.f32 %v538_v51, %v2449_v63 }
 0x121   : > { %1399 = vrot.lane.b32.xlu1 %v1394_v54, %s2135_s16  ;;  %1397 = vrot.lane.b32.xlu0 %v1393_v55, %s2135_s16 }
 0x125   : > { %1411 = vrot.lane.b32.xlu1 %v1406_v56, %s2135_s16  ;;  %1409 = vrot.lane.b32.xlu0 %v1405_v57, %s2135_s16  ;;  %v540_v56 = vmul.f32 %v538_v51, %v2441_v58  ;;  %v539_v57 = vmul.f32 %v538_v51, %v2443_v60 }
 0x129   : > { %519 = vrot.lane.b32.xlu1 %v514_v61, %s2134_s11  ;;  %517 = vrot.lane.b32.xlu0 %v513_v62, %s2134_s11 }
 0x12d   : > { %531 = vrot.lane.b32.xlu1 %v526_v2, %s2134_s11  ;;  %529 = vrot.lane.b32.xlu0 %v525_v3, %s2134_s11 }
 0x131   : > { %979 = vrot.lane.b32.xlu1 %v974_v11, %s2134_s11  ;;  %977 = vrot.lane.b32.xlu0 %v973_v12, %s2134_s11  ;;  %v551_v11 = vmul.f32 %v538_v51, %v2451_v1 }
 0x133   : > { %v386_v22 = vpop.permute.xlu0 %385 }
 0x134   : > { %v2474_v30 = vadd.f32 %v386_v22, %v369_v21  ;;  %v998_v21 = vstv %s1879_s15 }
 0x135   : > { %991 = vrot.lane.b32.xlu1 %v986_v25, %s2134_s11  ;;  %989 = vrot.lane.b32.xlu0 %v985_v27, %s2134_s11  ;;  %v1000_v27 = vmul.f32 %v998_v21, %v2457_v5  ;;  %v999_v35 = vmul.f32 %v998_v21, %v2459_v8  ;;  %v1011_v51 = vmul.f32 %v998_v21, %v2467_v17 }
 0x137   : > { %v388_v20 = vpop.permute.xlu1 %387 }
 0x138   : > { %v2485_v44 = vadd.f32 %v388_v20, %v370_v40  ;;  %v1287_v40 = vstv %s1883_s17 }
 0x139   : > { %1439 = vrot.lane.b32.xlu1 %v1434_v41, %s2134_s11  ;;  %1437 = vrot.lane.b32.xlu0 %v1433_v42, %s2134_s11  ;;  %v1289_v42 = vmul.f32 %v1287_v40, %v2329_v43  ;;  %v1288_v37 = vmul.f32 %v1287_v40, %v2331_v45 }
 0x13d   : > { %1451 = vrot.lane.b32.xlu1 %v1446_v50, %s2134_s11  ;;  %1449 = vrot.lane.b32.xlu0 %v1445_v24, %s2134_s11  ;;  %s1891_s11 = sld [smem:[#allocation4 + $0x1a]]  ;;  %v1012_v24 = vmul.f32 %v998_v21, %v2465_v16 }
 0x13f   : > { %v400_v54 = vpop.permute.xlu1 %399  ;;  %v398_v55 = vpop.permute.xlu0 %397 }
 0x140   : > { %v2501_v61 = vadd.f32 %v400_v54, %v376_v52  ;;  %v2503_v62 = vadd.f32 %v398_v55, %v375_v53  ;;  %v1296_v55 = vmul.f32 %v2335_v46, %v1287_v40 }
 0x141   : > { %545 = vrot.lane.b32.xlu1 %v540_v56, %s2135_s16  ;;  %543 = vrot.lane.b32.xlu0 %v539_v57, %s2135_s16  ;;  %v1295_v56 = vmul.f32 %v2337_v47, %v1287_v40 }
 0x143   : > { %v848_v2 = vpop.permute.xlu1 %847  ;;  %v846_v3 = vpop.permute.xlu0 %845  ;;  %v1458_v54 = vstv %s1891_s11  ;;  %s3487_s11 = smul.u32 48, %s257_s14 }
 0x144   : > { %v2511_v12 = vadd.f32 %v848_v2, %v829_v28  ;;  %v2513_v14 = vadd.f32 %v846_v3, %v828_v29  ;;  %v1460_v45 = vmul.f32 %v1458_v54, %v2476_v33  ;;  %v1459_v59 = vmul.f32 %v1458_v54, %v2478_v39 }
 0x145   : > { %557 = vrot.lane.b32.xlu1 %v552_v7, %s2135_s16  ;;  %555 = vrot.lane.b32.xlu0 %v551_v11, %s2135_s16  ;;  %v434_v2 = vstv %s1865_s23  ;;  %v1472_v46 = vmul.f32 %v1458_v54, %v2487_v48  ;;  %v1471_v47 = vmul.f32 %v1458_v54, %v2489_v49 }
 0x147   : > { %v860_v22 = vpop.permute.xlu1 %859  ;;  %v858_v25 = vpop.permute.xlu0 %857 }
 0x148   : > { %v864_v20 = vadd.f32 %v860_v22, %v836_v34  ;;  %v863_v41 = vadd.f32 %v858_v25, %v835_v36  ;;  %v436_v34 = vmul.f32 %v434_v2, %v2369_v4  ;;  %v435_v36 = vmul.f32 %v434_v2, %v2371_v6 }
 0x149   : > { %1005 = vrot.lane.b32.xlu1 %v1000_v27, %s2135_s16  ;;  %1003 = vrot.lane.b32.xlu0 %v999_v35, %s2135_s16 }
 0x14b   : > { %v1308_v50 = vpop.permute.xlu1 %1307  ;;  %v1306_v38 = vpop.permute.xlu0 %1305 }
 0x14c   : > { %v1312_v52 = vadd.f32 %v1308_v50, %v1289_v42  ;;  %v1311_v53 = vadd.f32 %v1306_v38, %v1288_v37  ;;  %v894_v37 = vstv %s1874_s25 }
 0x14d   : > { %1017 = vrot.lane.b32.xlu1 %v1012_v24, %s2135_s16  ;;  %1015 = vrot.lane.b32.xlu0 %v1011_v51, %s2135_s16  ;;  %v896_v54 = vmul.f32 %v894_v37, %v2385_v13 }
 0x14f   : > { %v1320_v43 = vpop.permute.xlu1 %1319  ;;  %v1318_v57 = vpop.permute.xlu0 %1317 }
 0x150   : > { %v1324_v28 = vadd.f32 %v1320_v43, %v1296_v55  ;;  %v1323_v29 = vadd.f32 %v1318_v57, %v1295_v56  ;;  %v902_v57 = vmul.f32 %v2393_v18, %v894_v37 }
 0x151   : > { %1465 = vrot.lane.b32.xlu1 %v1460_v45, %s2135_s16  ;;  %1463 = vrot.lane.b32.xlu0 %v1459_v59, %s2135_s16  ;;  %v901_v45 = vmul.f32 %v2395_v19, %v894_v37  ;;  %v1354_v59 = vstv %s1886_s26  ;;  %s3529_s26 = scalar_lea.vmem [#allocation9], %s3487_s11 }
 0x152   : > { %v1356_v13 = vmul.f32 %v1354_v59, %v2401_v23  ;;  %v1362_v18 = vmul.f32 %v2409_v31, %v1354_v59  ;;  %v1361_v19 = vmul.f32 %v2411_v32, %v1354_v59 }
 0x153   : > { %v414_v3 = vpop.permute.xlu1 %413  ;;  %v412_v7 = vpop.permute.xlu0 %411 }
 0x154   : > { %v418_v11 = vadd.f32 %v414_v3, %v2485_v44  ;;  %v417_v21 = vadd.f32 %v412_v7, %v2474_v30  ;;  %v442_v44 = vmul.f32 %v2377_v9, %v434_v2  ;;  %v441_v30 = vmul.f32 %v2379_v10, %v434_v2 }
 0x155   : > { %1477 = vrot.lane.b32.xlu1 %v1472_v46, %s2135_s16  ;;  %1475 = vrot.lane.b32.xlu0 %v1471_v47, %s2135_s16  ;;  %s1868_s16 = sld [smem:[#allocation4 + $0x6]] }
 0x156   : > { %v438_v22 = vadd.f32 %v436_v34, %v418_v11  ;;  %v437_v25 = vadd.f32 %v435_v36, %v417_v21 }
 0x157   : > { %v426_v27 = vpop.permute.xlu1 %425  ;;  %v424_v35 = vpop.permute.xlu0 %423 }
 0x158   : > { %v430_v40 = vadd.f32 %v426_v27, %v2501_v61  ;;  %v429_v42 = vadd.f32 %v424_v35, %v2503_v62  ;;  %v895_v61 = vmul.f32 %v894_v37, %v2387_v15  ;;  %v1355_v15 = vmul.f32 %v1354_v59, %v2403_v26 }
 0x15a   : > { %v444_v4 = vadd.f32 %v442_v44, %v430_v40  ;;  %v443_v6 = vadd.f32 %v441_v30, %v429_v42 }
 0x15b   : > { %v874_v50 = vpop.permute.xlu1 %873  ;;  %v872_v38 = vpop.permute.xlu0 %871 }
 0x15c   : > { %v878_v24 = vadd.f32 %v874_v50, %v2511_v12  ;;  %v877_v51 = vadd.f32 %v872_v38, %v2513_v14 }
 0x15e   : > { %v898_v55 = vadd.f32 %v896_v54, %v878_v24  ;;  %v897_v62 = vadd.f32 %v895_v61, %v877_v51 }
 0x15f   : > { %v886_v56 = vpop.permute.xlu1 %885  ;;  %v884_v9 = vpop.permute.xlu0 %883 }
 0x160   : > { %v890_v43 = vadd.f32 %v886_v56, %v864_v20  ;;  %v889_v10 = vadd.f32 %v884_v9, %v863_v41 }
 0x162   : > { %v904_v2 = vadd.f32 %v902_v57, %v890_v43  ;;  %v903_v3 = vadd.f32 %v901_v45, %v889_v10  ;;  %v500_v43 = vstv %s1868_s16  ;;  %s1906_s16 = smul.u32 768, %s2191_s22  ;;  %s3633_s22 = scalar_lea.sflag [#allocation5], %s257_s14 }
 0x163   : > { %v1334_v12 = vpop.permute.xlu1 %1333  ;;  %v1332_v7 = vpop.permute.xlu0 %1331  ;;  %v501_v57 = vmul.f32 %v500_v43, %v2443_v60 }
 0x164   : > { %v1338_v14 = vadd.f32 %v1334_v12, %v1312_v52  ;;  %v1337_v46 = vadd.f32 %v1332_v7, %v1311_v53 }
 0x166   : > { %v1358_v47 = vadd.f32 %v1356_v13, %v1338_v14  ;;  %v1357_v11 = vadd.f32 %v1355_v15, %v1337_v46  ;;  %v508_v14 = vmul.f32 %v2449_v63, %v500_v43  ;;  %v507_v46 = vmul.f32 %v2451_v1, %v500_v43 }
 0x167   : > { %v1346_v21 = vpop.permute.xlu1 %1345  ;;  %v1344_v20 = vpop.permute.xlu0 %1343  ;;  %v960_v13 = vstv %s1877_s30  ;;  %s1757_s30 = sshll.u32 %s3529_s26, 4  ;;  %s3626_s30 = int_to_ptr.vmem [resolvable:$true] %s1757_s30 }
 0x168   : > { %v1350_v41 = vadd.f32 %v1346_v21, %v1324_v28  ;;  %v1349_v34 = vadd.f32 %v1344_v20, %v1323_v29  ;;  %v962_v60 = vmul.f32 %v960_v13, %v2457_v5  ;;  %v968_v1 = vmul.f32 %v2465_v16, %v960_v13 }
 0x16a   : > { %v1364_v36 = vadd.f32 %v1362_v18, %v1350_v41  ;;  %v1363_v27 = vadd.f32 %v1361_v19, %v1349_v34  ;;  %v961_v41 = vmul.f32 %v960_v13, %v2459_v8 }
 0x16b   : > { %v454_v35 = vpop.permute.xlu1 %453  ;;  %v452_v40 = vpop.permute.xlu0 %451 }
 0x16c   : > { %v458_v52 = vadd.f32 %v454_v35, %v438_v22  ;;  %v457_v53 = vadd.f32 %v452_v40, %v437_v25  ;;  %v967_v35 = vmul.f32 %v2467_v17, %v960_v13  ;;  %v1420_v40 = vstv %s1889_s6 }
 0x16d   : > { %v1422_v8 = vmul.f32 %v1420_v40, %v2476_v33 }
 0x16f   : > { %v466_v42 = vpop.permute.xlu1 %465  ;;  %v464_v23 = vpop.permute.xlu0 %463 }
 0x170   : > { %v470_v44 = vadd.f32 %v466_v42, %v444_v4  ;;  %v469_v26 = vadd.f32 %v464_v23, %v443_v6 }
 0x173   : > { %v914_v30 = vpop.permute.xlu1 %913  ;;  %v912_v37 = vpop.permute.xlu0 %911 }
 0x174   : > { %v918_v50 = vadd.f32 %v914_v30, %v898_v55  ;;  %v917_v38 = vadd.f32 %v912_v37, %v897_v62  ;;  %v502_v62 = vmul.f32 %v500_v43, %v2441_v58 }
 0x177   : > { %v926_v28 = vpop.permute.xlu1 %925  ;;  %v924_v29 = vpop.permute.xlu0 %923 }
 0x178   : > { %v930_v24 = vadd.f32 %v926_v28, %v904_v2  ;;  %v929_v31 = vadd.f32 %v924_v29, %v903_v3  ;;  %v1428_v28 = vmul.f32 %v2487_v48, %v1420_v40  ;;  %v1427_v29 = vmul.f32 %v2489_v49, %v1420_v40 }
 0x17b   : > { %v1374_v32 = vpop.permute.xlu1 %1373  ;;  %v1372_v51 = vpop.permute.xlu0 %1371 }
 0x17c   : > { %v1378_v54 = vadd.f32 %v1374_v32, %v1358_v47  ;;  %v1377_v61 = vadd.f32 %v1372_v51, %v1357_v11 }
 0x17f   : > { %v1386_v56 = vpop.permute.xlu1 %1385  ;;  %v1384_v22 = vpop.permute.xlu0 %1383 }
 0x180   : > { %v1390_v25 = vadd.f32 %v1386_v56, %v1364_v36  ;;  %v1389_v9 = vadd.f32 %v1384_v22, %v1363_v27 }
 0x183   : > { %v480_v4 = vpop.permute.xlu1 %479  ;;  %v478_v6 = vpop.permute.xlu0 %477 }
 0x184   : > { %v484_v10 = vadd.f32 %v480_v4, %v458_v52  ;;  %v483_v55 = vadd.f32 %v478_v6, %v457_v53 }
 0x186   : > { %v504_v45 = vadd.f32 %v502_v62, %v484_v10  ;;  %v503_v59 = vadd.f32 %v501_v57, %v483_v55  ;;  %v564_v55 = vstv %s563_s7 }
 0x187   : > { %v492_v2 = vpop.permute.xlu1 %491  ;;  %v490_v3 = vpop.permute.xlu0 %489 }
 0x188   : > { %v496_v12 = vadd.f32 %v492_v2, %v470_v44  ;;  %v495_v7 = vadd.f32 %v490_v3, %v469_v26  ;;  %v1421_v26 = vmul.f32 %v1420_v40, %v2478_v39 }
 0x18a   : > { %v510_v15 = vadd.f32 %v508_v14, %v496_v12  ;;  %v509_v47 = vadd.f32 %v507_v46, %v495_v7 }
 0x18b   : > { %v940_v11 = vpop.permute.xlu1 %939  ;;  %v938_v21 = vpop.permute.xlu0 %937 }
 0x18c   : > { %v944_v20 = vadd.f32 %v940_v11, %v918_v50  ;;  %v943_v58 = vadd.f32 %v938_v21, %v917_v38 }
 0x18e   : > { %v964_v34 = vadd.f32 %v962_v60, %v944_v20  ;;  %v963_v18 = vadd.f32 %v961_v41, %v943_v58 }
 0x18f   : > { %v952_v19 = vpop.permute.xlu1 %951  ;;  %v950_v36 = vpop.permute.xlu0 %949 }
 0x190   : > { %v956_v27 = vadd.f32 %v952_v19, %v930_v24  ;;  %v955_v63 = vadd.f32 %v950_v36, %v929_v31 }
 0x192   : > { %v2565_v52 = vadd.f32 %v968_v1, %v956_v27  ;;  %v2567_v53 = vadd.f32 %v967_v35, %v955_v63 }
 0x193   : > { %v1400_v42 = vpop.permute.xlu1 %1399  ;;  %v1398_v23 = vpop.permute.xlu0 %1397 }
 0x194   : > { %v1404_v5 = vadd.f32 %v1400_v42, %v1378_v54  ;;  %v1403_v44 = vadd.f32 %v1398_v23, %v1377_v61 }
 0x196   : > { %v2571_v30 = vadd.f32 %v1422_v8, %v1404_v5  ;;  %v2573_v37 = vadd.f32 %v1421_v26, %v1403_v44 }
 0x197   : > { %v1412_v16 = vpop.permute.xlu1 %1411  ;;  %v1410_v50 = vpop.permute.xlu0 %1409 }
 0x198   : > { %v1416_v17 = vadd.f32 %v1412_v16, %v1390_v25  ;;  %v1415_v38 = vadd.f32 %v1410_v50, %v1389_v9 }
 0x19a   : > { %v2577_v24 = vadd.f32 %v1428_v28, %v1416_v17  ;;  %v2579_v31 = vadd.f32 %v1427_v29, %v1415_v38 }
 0x19b   : > { %v520_v32 = vpop.permute.xlu1 %519  ;;  %v518_v33 = vpop.permute.xlu0 %517 }
 0x19c   : > { %v524_v43 = vadd.f32 %v520_v32, %v504_v45  ;;  %v523_v10 = vadd.f32 %v518_v33, %v503_v59  ;;  %v2600_v59 = vstv %s1880_s8  ;;  %s3624_s8 = scalar_lea.hbm %s3679_s5, %s1906_s16 }
 0x19f   : > { %v532_v51 = vpop.permute.xlu1 %531  ;;  %v530_v39 = vpop.permute.xlu0 %529 }
 0x1a0   : > { %v536_v7 = vadd.f32 %v532_v51, %v510_v15  ;;  %v535_v14 = vadd.f32 %v530_v39, %v509_v47 }
 0x1a3   : > { %v980_v54 = vpop.permute.xlu1 %979  ;;  %v978_v61 = vpop.permute.xlu0 %977 }
 0x1a4   : > { %v984_v46 = vadd.f32 %v980_v54, %v964_v34  ;;  %v983_v60 = vadd.f32 %v978_v61, %v963_v18  ;;  %v2688_v54 = vstv %s2617_s9  ;;  %s2058_s9 = scalar_lea.vmem %s3626_s30, 768 }
 0x1a5   : > { %p2059_p10 = scmp.ne.s32.totalorder %s3626_s30, %s2058_s9 }
 0x1a7   : > { %v2581_v56 = vpop.permute.xlu1 %991  ;;  %v2583_v22 = vpop.permute.xlu0 %989  ;;  %p2060_p0 = pnand %p2059_p10, %p3832_p12 }
 0x1a8   : > { %v996_v29 = vadd.f32 %v2581_v56, %v2565_v52  ;;  %v995_v33 = vadd.f32 %v2583_v22, %v2567_v53 }
 0x1a9   : > { %p2061_p7 = pneg %p2060_p0 }
 0x1ab   : > { %v2585_v25 = vpop.permute.xlu1 %1439  ;;  %v2587_v9 = vpop.permute.xlu0 %1437 }
 0x1ac   : > { %v1444_v51 = vadd.f32 %v2585_v25, %v2571_v30  ;;  %v1443_v52 = vadd.f32 %v2587_v9, %v2573_v37 }
 0x1af   : > { %v2589_v48 = vpop.permute.xlu1 %1451  ;;  %v2591_v49 = vpop.permute.xlu0 %1449 }
 0x1b0   : > { %v1456_v61 = vadd.f32 %v2589_v48, %v2577_v24  ;;  %v1455_v53 = vadd.f32 %v2591_v49, %v2579_v31 }
 0x1b3   : > { %v546_v4 = vpop.permute.xlu1 %545  ;;  %v544_v6 = vpop.permute.xlu0 %543 }
 0x1b4   : > { %v550_v62 = vadd.f32 %v546_v4, %v524_v43  ;;  %v549_v57 = vadd.f32 %v544_v6, %v523_v10 }
 0x1b6   : > { %v2593_v2 = vadd.f32 %v564_v55, %v550_v62  ;;  %v2595_v13 = vadd.f32 %v564_v55, %v549_v57 }
 0x1b7   : > { %v558_v3 = vpop.permute.xlu1 %557  ;;  %v556_v12 = vpop.permute.xlu0 %555 }
 0x1b8   : > { %v2598_v11 = vand.u32 2147483647, %v2593_v2  ;;  %v562_v45 = vadd.f32 %v558_v3, %v536_v7  ;;  %v561_v20 = vadd.f32 %v556_v12, %v535_v14  ;;  %v570_v41 = vmul.f32 %v2593_v2, %v2593_v2 }
 0x1b9   : > { %vm690_vm3 = vcmp.ne.f32.partialorder %v2593_v2, %v2593_v2  ;;  %v569_v34 = vmul.f32 %v2595_v13, %v2595_v13  ;;  %v2611_v19 = vand.u32 2147483647, %v2595_v13  ;;  %vm643_vm4 = vcmp.ne.f32.partialorder %v2595_v13, %v2595_v13 }
 0x1ba   : > { %v2606_v15 = vadd.f32 %v564_v55, %v562_v45  ;;  %v2615_v36 = vadd.f32 %v564_v55, %v561_v20  ;;  %vm696_vm5 = vcmp.eq.s32.totalorder %v2598_v11, inf  ;;  %vm686_vm0 = vcmp.lt.s32.totalorder %v2593_v2, 0 }
 0x1bb   : > { %v1006_v21 = vpop.permute.xlu1 %1005  ;;  %v1004_v47 = vpop.permute.xlu0 %1003  ;;  %vm649_vm14 = vcmp.eq.s32.totalorder %v2611_v19, inf  ;;  %vm3685_vm2 = vcmp.lt.f32.partialorder %v2593_v2, 0.0  ;;  %v2701_v30 = vsel %vm686_vm0, 3.1415927, %v3688_v0 }
 0x1bc   : > { %v1010_v58 = vadd.f32 %v1006_v21, %v984_v46  ;;  %v572_v18 = vmul.f32 %v2606_v15, %v2606_v15  ;;  %v2623_v27 = vand.u32 2147483647, %v2606_v15  ;;  %vm691_vm6 = vcmp.ne.f32.partialorder %v2606_v15, %v2606_v15 }
 0x1bd   : > { %vm2627_vm7 = vmor %vm690_vm3, %vm691_vm6  ;;  %v571_v1 = vmul.f32 %v2615_v36, %v2615_v36  ;;  %v2634_v35 = vand.u32 2147483647, %v2615_v36  ;;  %v1009_v42 = vadd.f32 %v1004_v47, %v983_v60  ;;  %vm644_vm12 = vcmp.ne.f32.partialorder %v2615_v36, %v2615_v36 }
 0x1be   : > { %v2637_v40 = vadd.f32 %v2600_v59, %v1010_v58  ;;  %v2639_v23 = vadd.f32 %v572_v18, %v570_v41  ;;  %v658_v5 = vmin.f32 %v2598_v11, %v2623_v27  ;;  %v659_v44 = vmax.f32 %v2598_v11, %v2623_v27  ;;  %vm2669_vm15 = vmor %vm643_vm4, %vm644_vm12 }
 0x1bf   : > { %v1018_v8 = vpop.permute.xlu1 %1017  ;;  %vm697_vm9 = vcmp.eq.s32.totalorder %v2623_v27, inf  ;;  %v2648_v26 = vadd.f32 %v571_v1, %v569_v34  ;;  %v611_v16 = vmin.f32 %v2611_v19, %v2634_v35  ;;  %v612_v50 = vmax.f32 %v2611_v19, %v2634_v35  ;;  %v1016_v38 = vpop.permute.xlu0 %1015 }
 0x1c0   : > { %1974 = vrcp.f32 %v659_v44  ;;  %vm2656_vm10 = vmand %vm696_vm5, %vm697_vm9  ;;  %vm650_vm13 = vcmp.eq.s32.totalorder %v2634_v35, inf  ;;  %v2685_v39 = vadd.f32 %v2600_v59, %v1009_v42  ;;  %v2695_v56 = vand.u32 2147483647, %v2637_v40 }
 0x1c1   : > { %1976 = vrcp.f32 %v612_v50  ;;  %vm2676_vm1 = vmand %vm649_vm14, %vm650_vm13  ;;  %v1022_v43 = vadd.f32 %v1018_v8, %v996_v29  ;;  %v1021_v22 = vadd.f32 %v1016_v38, %v995_v33  ;;  %vm639_vm3 = vcmp.lt.s32.totalorder %v2595_v13, 0 }
 0x1c2   : > { %v1030_v37 = vmul.f32 %v2637_v40, %v2637_v40  ;;  %vm1149_vm4 = vcmp.ne.f32.partialorder %v2637_v40, %v2637_v40  ;;  %v1029_v31 = vmul.f32 %v2685_v39, %v2685_v39  ;;  %v2714_v9 = vand.u32 2147483647, %v2685_v39 }
 0x1c3   : > { %v1466_v4 = vpop.permute.xlu1 %1465  ;;  %v2709_v24 = vadd.f32 %v2600_v59, %v1022_v43  ;;  %v1464_v25 = vpop.permute.xlu0 %1463  ;;  %vm1102_vm5 = vcmp.ne.f32.partialorder %v2685_v39, %v2685_v39  ;;  %v2719_v48 = vadd.f32 %v2600_v59, %v1021_v22  ;;  %vm1155_vm6 = vcmp.eq.s32.totalorder %v2695_v56, inf }
 0x1c4   : > { %v1470_v57 = vadd.f32 %v1466_v4, %v1444_v51  ;;  %v1469_v3 = vadd.f32 %v1464_v25, %v1443_v52  ;;  %v3686_v8 = vmov 0.7853982   ;;  %v3740_v38 = vmov 0 }
 0x1c5   : > { %v1032_v49 = vmul.f32 %v2709_v24, %v2709_v24  ;;  %v2725_v6 = vand.u32 2147483647, %v2709_v24  ;;  %vm1150_vm9 = vcmp.ne.f32.partialorder %v2709_v24, %v2709_v24  ;;  %v1031_v55 = vmul.f32 %v2719_v48, %v2719_v48 }
 0x1c6   : > { %vm2729_vm12 = vmor %vm1149_vm4, %vm1150_vm9  ;;  %v2736_v62 = vand.u32 2147483647, %v2719_v48  ;;  %vm1103_vm9 = vcmp.ne.f32.partialorder %v2719_v48, %v2719_v48  ;;  %v2785_v44 = vadd.f32 %v2688_v54, %v1470_v57  ;;  %vm3684_vm4 = vcmp.lt.f32.partialorder %v2595_v13, 0.0 }
 0x1c7   : > { %v2738_v7 = vadd.f32 %v1032_v49, %v1030_v37  ;;  %v1117_v14 = vmin.f32 %v2695_v56, %v2725_v6  ;;  %v1118_v46 = vmax.f32 %v2695_v56, %v2725_v6  ;;  %v1478_v45 = vpop.permute.xlu1 %1477  ;;  %vm1156_vm14 = vcmp.eq.s32.totalorder %v2725_v6, inf  ;;  %v1476_v1 = vpop.permute.xlu0 %1475 }
 0x1c8   : > { %v2749_v59 = vadd.f32 %v1031_v55, %v1029_v31  ;;  %v1070_v58 = vmin.f32 %v2714_v9, %v2736_v62  ;;  %vm2757_vm0 = vmand %vm1155_vm6, %vm1156_vm14  ;;  %v1071_v47 = vmax.f32 %v2714_v9, %v2736_v62  ;;  %vm1109_vm13 = vcmp.eq.s32.totalorder %v2736_v62, inf  ;;  %3739 = vst [vmem:[#allocation14_spill] sm:$0xff] %v2785_v44 }
 0x1c9   : > { %1978 = vrcp.f32 %v1118_v46  ;;  %v1482_v18 = vadd.f32 %v1478_v45, %v1456_v61  ;;  %vm1108_vm6 = vcmp.eq.s32.totalorder %v2714_v9, inf  ;;  %vm2780_vm14 = vmor %vm1102_vm5, %vm1103_vm9  ;;  %vm3683_vm5 = vcmp.lt.f32.partialorder %v2637_v40, 0.0 }
 0x1ca   : > { %v1975_v12 = vpop.eup %1974  ;;  %1980 = vrcp.f32 %v1071_v47  ;;  %vm2794_vm11 = vmand %vm1108_vm6, %vm1109_vm13  ;;  %vm1145_vm9 = vcmp.lt.s32.totalorder %v2637_v40, 0  ;;  %v1481_v33 = vadd.f32 %v1476_v1, %v1455_v53  ;;  %v2804_v51 = vsel %vm639_vm3, 3.1415927, %v3688_v0 }
 0x1cb   : > { %v1977_v21 = vpop.eup %1976  ;;  %v2746_v20 = vmul.f32 %v1975_v12, %v658_v5  ;;  %v3736_v5 = vmov 0  ;;  %v3741_v38 = vsel %vm2794_vm11, 4294967295, %v3740_v38  ;;  %v2807_v61 = vadd.f32 %v2688_v54, %v1469_v3 }
 0x1cc   : > { %v2753_v60 = vmul.f32 %v1977_v21, %v611_v16  ;;  %v3737_v5 = vsel %vm2780_vm14, 4294967295, %v3736_v5  ;;  %v2790_v16 = vsel %vm3685_vm2, 2.3561945, %v3686_v8  ;;  %3742 = vst [vmem:[#allocation15_spill] sm:$0xff] %v3741_v38  ;;  %v2810_v43 = vadd.f32 %v2688_v54, %v1482_v18 }
 0x1cd   : > { %v2767_v34 = vmul.f32 %v2746_v20, %v2746_v20  ;;  %3738 = vst [vmem:[#allocation13_spill] sm:$0xff] %v3737_v5  ;;  %3743 = vst [vmem:[#allocation16_spill] sm:$0xff] %v2807_v61  ;;  %v2815_v4 = vsel %vm3684_vm4, 2.3561945, %v3686_v8  ;;  %v2818_v53 = vand.u32 2147483647, %v2785_v44  ;;  %1982 = vrsqrt.f32 %v2648_v26 }
 0x1ce   : > { %v2774_v42 = vmul.f32 %v2753_v60, %v2753_v60  ;;  %3744 = vst [vmem:[#allocation17_spill] sm:$0xff] %v2810_v43  ;;  %v2824_v31 = vsel %vm1145_vm9, 3.1415927, %v3688_v0  ;;  %v2829_v49 = vsel %vm3683_vm5, 2.3561945, %v3686_v8  ;;  %v1490_v57 = vmul.f32 %v2785_v44, %v2785_v44 }
 0x1cf   : > { %v663_v50 = vmul.f32 0.002785687, %v2767_v34  ;;  %3745 = vst [vmem:[#allocation18_spill] sm:$0xff] %v2818_v53  ;;  %vm1609_vm3 = vcmp.ne.f32.partialorder %v2785_v44, %v2785_v44  ;;  %v2837_v3 = vadd.f32 %v2688_v54, %v1481_v33  ;;  %v1489_v46 = vmul.f32 %v2807_v61, %v2807_v61 }
 0x1d0   : > { %v616_v29 = vmul.f32 0.002785687, %v2774_v42  ;;  %v1492_v45 = vmul.f32 %v2810_v43, %v2810_v43  ;;  %v2844_v21 = vand.u32 2147483647, %v2810_v43  ;;  %v2847_v1 = vand.u32 2147483647, %v2807_v61 }
 0x1d1   : > { %v664_v52 = vadd.f32 -0.015866, %v663_v50  ;;  %3746 = vst [vmem:[#allocation19_spill] sm:$0xff] %v2837_v3  ;;  %vm1615_vm13 = vcmp.eq.s32.totalorder %v2818_v53, inf  ;;  %vm1610_vm6 = vcmp.ne.f32.partialorder %v2810_v43, %v2810_v43  ;;  %vm3711_vm4 = vcmask 130048  }
 0x1d2   : > { %v617_v22 = vadd.f32 -0.015866, %v616_v29  ;;  %3747 = vst [vmem:[#allocation20_spill] sm:$0xff] %v2844_v21  ;;  %3748 = vst [vmem:[#allocation21_spill] sm:$0xff] %v2847_v1  ;;  %v2856_v29 = vadd.f32 %v1492_v45, %v1490_v57  ;;  %vm1616_vm2 = vcmp.eq.s32.totalorder %v2844_v21, inf  ;;  %v3752_v45 = vmov 0 }
 0x1d3   : > { %v665_v37 = vmul.f32 %v664_v52, %v2767_v34  ;;  %v1979_v47 = vpop.eup %1978  ;;  %vm2863_vm5 = vmor %vm1609_vm3, %vm1610_vm6  ;;  %v3749_v52 = vmov 0  ;;  %vm1562_vm6 = vcmp.ne.f32.partialorder %v2807_v61, %v2807_v61  ;;  %vm1568_vm8 = vcmp.eq.s32.totalorder %v2847_v1, inf }
 0x1d4   : > { %v618_v55 = vmul.f32 %v617_v22, %v2774_v42  ;;  %v2854_v50 = vmul.f32 %v1979_v47, %v1117_v14  ;;  %v3750_v52 = vsel %vm2863_vm5, 4294967295, %v3749_v52  ;;  %v1981_v22 = vpop.eup %1980  ;;  %vm2884_vm3 = vmand %vm1615_vm13, %vm1616_vm2  ;;  %v1491_v47 = vmul.f32 %v2837_v3, %v2837_v3 }
 0x1d5   : > { %v666_v12 = vadd.f32 0.04247222, %v665_v37  ;;  %3751 = vst [vmem:[#allocation22_spill] sm:$0xff] %v3750_v52  ;;  %v3753_v45 = vsel %vm2884_vm3, 4294967295, %v3752_v45  ;;  %vm1563_vm13 = vcmp.ne.f32.partialorder %v2837_v3, %v2837_v3  ;;  %v3759_v0 = vmov 0 }
 0x1d6   : > { %v619_v18 = vadd.f32 0.04247222, %v618_v55  ;;  %v1578_v55 = vmax.f32 %v2818_v53, %v2844_v21  ;;  %v2875_v57 = vmul.f32 %v2854_v50, %v2854_v50  ;;  %3754 = vst [vmem:[#allocation23_spill] sm:$0xff] %v3753_v45  ;;  %v2901_v33 = vadd.f32 %v1491_v47, %v1489_v46  ;;  %vm2917_vm9 = vmor %vm1562_vm6, %vm1563_vm13 }
 0x1d7   : > { %v667_v54 = vmul.f32 %v666_v12, %v2767_v34  ;;  %v2880_v12 = vmul.f32 %v1981_v22, %v1070_v58  ;;  %v1983_v8 = vpop.eup %1982  ;;  %v3756_v47 = vmov 0  ;;  %vm3710_vm6 = vcmp.lt.f32.partialorder %v2685_v39, 0.0 }
 0x1d8   : > { %v620_v37 = vmul.f32 %v619_v18, %v2774_v42  ;;  %1984 = vrcp.f32 %v1578_v55  ;;  %v1122_v22 = vmul.f32 0.002785687, %v2875_v57  ;;  %v3757_v47 = vsel %vm2917_vm9, 4294967295, %v3756_v47 }
 0x1d9   : > { %v668_v14 = vadd.f32 -0.074975304, %v667_v54  ;;  %v2893_v54 = vand.u32 2147483647, %v2837_v3  ;;  %v2899_v25 = vmul.f32 %v2880_v12, %v2880_v12  ;;  %3758 = vst [vmem:[#allocation25_spill] sm:$0xff] %v3757_v47  ;;  %vm577_vm13 = vcmp.eq.f32.partialorder %v2648_v26, inf }
 0x1da   : > { %v621_v18 = vadd.f32 -0.074975304, %v620_v37  ;;  %v1123_v45 = vadd.f32 -0.015866, %v1122_v22 }
 0x1db   : > { %3755 = vst [vmem:[#allocation24_spill] sm:$0xff] %v2893_v54  ;;  %v669_v58 = vmul.f32 %v668_v14, %v2767_v34  ;;  %v1531_v55 = vmax.f32 %v2847_v1, %v2893_v54  ;;  %v1075_v52 = vmul.f32 0.002785687, %v2899_v25  ;;  %vm1569_vm2 = vcmp.eq.s32.totalorder %v2893_v54, inf }
 0x1dc   : > { %v622_v37 = vmul.f32 %v621_v18, %v2774_v42  ;;  %vm2924_vm3 = vmand %vm1568_vm8, %vm1569_vm2  ;;  %vm3763_vm8 = vcmp.lt.s32.totalorder %v2685_v39, 0  ;;  %vm579_vm2 = vcmp.eq.f32.partialorder %v2648_v26, 0.0 }
 0x1dd   : > { %v670_v14 = vadd.f32 0.1064488, %v669_v58  ;;  %1986 = vrcp.f32 %v1531_v55  ;;  %v1124_v58 = vmul.f32 %v1123_v45, %v2875_v57  ;;  %v1076_v22 = vadd.f32 -0.015866, %v1075_v52 }
 0x1de   : > { %v623_v46 = vadd.f32 0.1064488, %v622_v37  ;;  %v3760_v0 = vsel %vm2924_vm3, 4294967295, %v3759_v0  ;;  %v576_v37 = vmul.f32 %v1983_v8, %v2648_v26  ;;  %1988 = vrsqrt.f32 %v2639_v23 }
 0x1df   : > { %v671_v18 = vmul.f32 %v670_v14, %v2767_v34  ;;  %3761 = vst [vmem:[#allocation26_spill] sm:$0xff] %v3760_v0  ;;  %v1125_v3 = vadd.f32 0.04247222, %v1124_v58  ;;  %v1077_v14 = vmul.f32 %v1076_v22, %v2899_v25  ;;  %v3762_v0 = vmov 0.0  }
 0x1e0   : > { %v624_v55 = vmul.f32 %v623_v46, %v2774_v42  ;;  %v578_v52 = vsel %vm577_vm13, %v2648_v26, %v576_v37  ;;  %v2939_v8 = vsel %vm3763_vm8, 3.1415927, %v3762_v0  ;;  %v580_v46 = vand.u32 2147483648, %v2648_v26 }
 0x1e1   : > { %v672_v47 = vadd.f32 -0.14207031, %v671_v18  ;;  %v1126_v44 = vmul.f32 %v1125_v3, %v2875_v57  ;;  %v1078_v18 = vadd.f32 0.04247222, %v1077_v14  ;;  %v3764_v37 = vmov 0.7853982  }
 0x1e2   : > { %v625_v45 = vadd.f32 -0.14207031, %v624_v55  ;;  %v1985_v58 = vpop.eup %1984  ;;  %v2949_v55 = vsel %vm3710_vm6, 2.3561945, %v3764_v37  ;;  %v2951_v43 = vsel %vm579_vm2, %v580_v46, %v578_v52  ;;  %1990 = vrsqrt.f32 %v2749_v59 }
 0x1e3   : > { %v673_v61 = vmul.f32 %v672_v47, %v2767_v34  ;;  %3765 = vst [vmem:[#allocation27_spill] sm:$0xff] %v2949_v55  ;;  %3766 = vst [vmem:[#allocation28_spill] sm:$0xff] %v2951_v43  ;;  %v1127_v38 = vadd.f32 -0.074975304, %v1126_v44  ;;  %v1079_v47 = vmul.f32 %v1078_v18, %v2899_v25  ;;  %v3767_v3 = vmin.f32 %v2818_v53, %v2844_v21 }
 0x1e4   : > { %v626_v22 = vmul.f32 %v625_v45, %v2774_v42  ;;  %vm584_vm13 = vcmp.eq.f32.partialorder %v2639_v23, inf  ;;  %v587_v37 = vand.u32 2147483648, %v2639_v23  ;;  %vm586_vm8 = vcmp.eq.f32.partialorder %v2639_v23, 0.0 }
 0x1e5   : > { %v674_v0 = vadd.f32 0.19993454, %v673_v61  ;;  %v2958_v26 = vmul.f32 %v1985_v58, %v3767_v3  ;;  %v1128_v46 = vmul.f32 %v1127_v38, %v2875_v57  ;;  %v1080_v61 = vadd.f32 -0.074975304, %v1079_v47 }
 0x1e6   : > { %v627_v14 = vadd.f32 0.19993454, %v626_v22  ;;  %v2973_v22 = vsel %vm3711_vm4, %v2951_v43, -inf  ;;  %1992 = vrsqrt.f32 %v2738_v7  ;;  %vm3772_vm4 = vcmp.eq.f32.partialorder %v2749_v59, inf }
 0x1e7   : > { %3768 = vst [vmem:[#allocation29_spill] sm:$0xff] %v2958_v26  ;;  %v675_v52 = vmul.f32 %v674_v0, %v2767_v34  ;;  %v2967_v44 = vmul.f32 %v2958_v26, %v2958_v26  ;;  %v1987_v18 = vpop.eup %1986  ;;  %v1129_v38 = vadd.f32 0.1064488, %v1128_v46  ;;  %v1081_v47 = vmul.f32 %v1080_v61, %v2899_v25 }
 0x1e8   : > { %v628_v58 = vmul.f32 %v627_v14, %v2774_v42  ;;  %v1989_v53 = vpop.eup %1988  ;;  %v3769_v14 = vmin.f32 %v2847_v1, %v2893_v54  ;;  %1994 = vrsqrt.f32 %v2901_v33  ;;  %vm3773_vm2 = vcmp.gt.f32.partialorder %v2623_v27, %v2598_v11 }
 0x1e9   : > { %v676_v0 = vadd.f32 -0.33333147, %v675_v52  ;;  %v1582_v45 = vmul.f32 0.002785687, %v2967_v44  ;;  %v1130_v46 = vmul.f32 %v1129_v38, %v2875_v57  ;;  %v1082_v61 = vadd.f32 0.1064488, %v1081_v47 }
 0x1ea   : > { %v629_v21 = vadd.f32 -0.33333147, %v628_v58  ;;  %v2983_v26 = vmul.f32 %v1987_v18, %v3769_v14  ;;  %v583_v1 = vmul.f32 %v1989_v53, %v2639_v23  ;;  %1996 = vrsqrt.f32 %v2856_v29 }
 0x1eb   : > { %v677_v52 = vmul.f32 %v676_v0, %v2767_v34  ;;  %v1583_v3 = vadd.f32 -0.015866, %v1582_v45  ;;  %v1131_v43 = vadd.f32 -0.14207031, %v1130_v46  ;;  %v1083_v54 = vmul.f32 %v1082_v61, %v2899_v25 }
 0x1ec   : > { %3770 = vst [vmem:[#allocation30_spill] sm:$0xff] %v2983_v26  ;;  %v630_v55 = vmul.f32 %v629_v21, %v2774_v42  ;;  %v2992_v58 = vmul.f32 %v2983_v26, %v2983_v26  ;;  %v1991_v45 = vpop.eup %1990  ;;  %v585_v53 = vsel %vm584_vm13, %v2639_v23, %v583_v1  ;;  %vm3771_vm13 = vcmask 130048  }
 0x1ed   : > { %v678_v14 = vmul.f32 %v677_v52, %v2746_v20  ;;  %v1584_v34 = vmul.f32 %v1583_v3, %v2967_v44  ;;  %v1132_v3 = vmul.f32 %v1131_v43, %v2875_v57  ;;  %v1084_v38 = vadd.f32 -0.14207031, %v1083_v54 }
 0x1ee   : > { %v631_v42 = vmul.f32 %v630_v55, %v2753_v60  ;;  %v1535_v21 = vmul.f32 0.002785687, %v2992_v58  ;;  %v3013_v55 = vsel %vm586_vm8, %v587_v37, %v585_v53  ;;  %v1036_v61 = vmul.f32 %v1991_v45, %v2749_v59 }
 0x1ef   : > { %v679_v0 = vadd.f32 %v678_v14, %v2746_v20  ;;  %v1585_v47 = vadd.f32 0.04247222, %v1584_v34  ;;  %v1133_v18 = vadd.f32 0.19993454, %v1132_v3  ;;  %v1085_v26 = vmul.f32 %v1084_v38, %v2899_v25 }
 0x1f0   : > { %v632_v52 = vadd.f32 %v631_v42, %v2753_v60  ;;  %v1536_v46 = vadd.f32 -0.015866, %v1535_v21  ;;  %v1993_v14 = vpop.eup %1992  ;;  %v591_v60 = vsel %vm3771_vm13, %v3013_v55, -inf  ;;  %v1038_v23 = vsel %vm3772_vm4, %v2749_v59, %v1036_v61 }
 0x1f1   : > { %v681_v1 = vsub.f32 1.5707964, %v679_v0  ;;  %v1586_v20 = vmul.f32 %v1585_v47, %v2967_v44  ;;  %vm1044_vm8 = vcmp.eq.f32.partialorder %v2738_v7, inf  ;;  %v1134_v37 = vmul.f32 %v1133_v18, %v2875_v57 }
 0x1f2   : > { %v634_v5 = vsub.f32 1.5707964, %v632_v52  ;;  %v1537_v43 = vmul.f32 %v1536_v46, %v2992_v58  ;;  %v1086_v34 = vadd.f32 0.19993454, %v1085_v26  ;;  %v1995_v42 = vpop.eup %1994  ;;  %vm3774_vm13 = vcmp.gt.f32.partialorder %v2634_v35, %v2611_v19 }
 0x1f3   : > { %v682_v54 = vsel %vm3773_vm2, %v681_v1, %v679_v0  ;;  %v1587_v45 = vadd.f32 -0.074975304, %v1586_v20  ;;  %v592_v38 = vmax.f32 %v2973_v22, %v591_v60  ;;  %v1135_v46 = vadd.f32 -0.33333147, %v1134_v37 }
 0x1f4   : > { %v684_v21 = vsub.f32 3.1415927, %v682_v54  ;;  %v635_v53 = vsel %vm3774_vm13, %v634_v5, %v632_v52  ;;  %v1538_v3 = vadd.f32 0.04247222, %v1537_v43  ;;  %v1087_v11 = vmul.f32 %v1086_v34, %v2899_v25  ;;  %v1997_v61 = vpop.eup %1996 }
 0x1f5   : > { %v637_v47 = vsub.f32 3.1415927, %v635_v53  ;;  %v1588_v27 = vmul.f32 %v1587_v45, %v2967_v44  ;;  %vm3775_vm4 = vcmp.lt.f32.partialorder %v2593_v2, 0.0  ;;  %593 = vmax.xlane.f32.xlu0 %v592_v38  ;;  %v3776_v0 = vand.u32 2147483648, %v2749_v59 }
 0x1f6   : > { %v685_v26 = vsel %vm3775_vm4, %v684_v21, %v682_v54  ;;  %v1539_v18 = vmul.f32 %v1538_v3, %v2992_v58  ;;  %vm3777_vm2 = vcmp.eq.f32.partialorder %v2749_v59, 0.0  ;;  %v1043_v35 = vmul.f32 %v1993_v14, %v2738_v7 }
 0x1f7   : > { %v3043_v19 = vsel %vm3777_vm2, %v3776_v0, %v1038_v23  ;;  %vm3778_vm13 = vcmp.eq.f32.partialorder %v2606_v15, 0.0  ;;  %vm3779_vm6 = vcmp.lt.f32.partialorder %v2595_v13, 0.0  ;;  %v1136_v2 = vmul.f32 %v1135_v46, %v2875_v57 }
 0x1f8   : > { %v689_v5 = vsel %vm3778_vm13, %v2701_v30, %v685_v26  ;;  %v638_v22 = vsel %vm3779_vm6, %v637_v47, %v635_v53  ;;  %v1088_v52 = vadd.f32 -0.33333147, %v1087_v11  ;;  %vm1497_vm4 = vcmp.eq.f32.partialorder %v2901_v33, inf }
 0x1f9   : > { %v693_v59 = vsel %vm2627_vm7, nan, %v689_v5  ;;  %vm3780_vm2 = vcmp.eq.f32.partialorder %v2615_v36, 0.0  ;;  %v1589_v20 = vadd.f32 0.1064488, %v1588_v27  ;;  %v1540_v14 = vadd.f32 -0.074975304, %v1539_v18 }
 0x1fa   : > { %v642_v1 = vsel %vm3780_vm2, %v2804_v51, %v638_v22  ;;  %vm1499_vm13 = vcmp.eq.f32.partialorder %v2901_v33, 0.0  ;;  %v699_v13 = vsel %vm2656_vm10, %v2790_v16, %v693_v59  ;;  %v1137_v57 = vmul.f32 %v1136_v2, %v2854_v50 }
 0x1fb   : > { %v646_v30 = vsel %vm2669_vm15, nan, %v642_v1  ;;  %v1089_v63 = vmul.f32 %v1088_v52, %v2899_v25  ;;  %v700_v43 = vand.u32 2147483647, %v699_v13  ;;  %vm1147_vm7 = vcmp.eq.f32.partialorder %v2709_v24, 0.0 }
 0x1fc   : > { %v652_v51 = vsel %vm2676_vm1, %v2815_v4, %v646_v30  ;;  %v1590_v60 = vmul.f32 %v1589_v20, %v2967_v44  ;;  %v1541_v23 = vmul.f32 %v1540_v14, %v2992_v58  ;;  %v1138_v16 = vadd.f32 %v1137_v57, %v2854_v50 }
 0x1fd   : > { %v653_v17 = vand.u32 2147483647, %v652_v51  ;;  %v1090_v28 = vmul.f32 %v1089_v63, %v2880_v12  ;;  %v1045_v25 = vsel %vm1044_vm8, %v2738_v7, %v1043_v35  ;;  %v3781_v54 = vand.u32 2147483648, %v2606_v15  ;;  %v3794_v63 = vld [vmem:[#allocation27_spill] sm:$0xff] }
 0x1fe   : > { %v1591_v32 = vadd.f32 -0.14207031, %v1590_v60  ;;  %v1542_v4 = vadd.f32 0.1064488, %v1541_v23  ;;  %v3782_v34 = vand.u32 2147483648, %v2738_v7  ;;  %vm3783_vm10 = vcmp.eq.f32.partialorder %v2738_v7, 0.0 }
 0x1ff   : > { %v3079_v37 = vor.u32 %v3781_v54, %v700_v43  ;;  %v3784_v50 = vand.u32 2147483648, %v2615_v36  ;;  %v1140_v53 = vsub.f32 1.5707964, %v1138_v16  ;;  %v1091_v3 = vadd.f32 %v1090_v28, %v2880_v12 }
 0x200   : > { %v3085_v45 = vsel %vm3783_vm10, %v3782_v34, %v1045_v25  ;;  %vm3785_vm15 = vcmask 130048   ;;  %v1592_v38 = vmul.f32 %v1591_v32, %v2967_v44  ;;  %v1543_v47 = vmul.f32 %v1542_v4, %v2992_v58  ;;  %v3799_v4 = vld [vmem:[#allocation30_spill] sm:$0xff] }
 0x201   : > { %v3089_v21 = vor.u32 %v3784_v50, %v653_v17  ;;  %v1049_v15 = vsel %vm3785_vm15, %v3043_v19, -inf  ;;  %vm3786_vm1 = vmmov %vm3785_vm15  ;;  %v1496_v7 = vmul.f32 %v1995_v42, %v2901_v33  ;;  %vm3787_vm6 = vcmp.gt.f32.partialorder %v2725_v6, %v2695_v56  ;;  %v3798_v17 = vld [vmem:[#allocation29_spill] sm:$0xff]  ;;  %v3800_v50 = vld [vmem:[#allocation14_spill] sm:$0xff] }
 0x202   : > { %v1050_v46 = vsel %vm3786_vm1, %v3085_v45, -inf  ;;  %v1141_v36 = vsel %vm3787_vm6, %v1140_v53, %v1138_v16  ;;  %v1093_v11 = vsub.f32 1.5707964, %v1091_v3  ;;  %v1503_v12 = vmul.f32 %v1997_v61, %v2856_v29  ;;  %v3802_v53 = vld [vmem:[#allocation18_spill] sm:$0xff] }
 0x203   : > { %v1051_v27 = vmax.f32 %v1049_v15, %v1050_v46  ;;  %v1143_v26 = vsub.f32 3.1415927, %v1141_v36  ;;  %v1593_v18 = vadd.f32 0.19993454, %v1592_v38  ;;  %v1544_v0 = vadd.f32 -0.14207031, %v1543_v47 }
 0x204   : > { %v1498_v35 = vsel %vm1497_vm4, %v2901_v33, %v1496_v7  ;;  %vm3788_vm8 = vcmp.gt.f32.partialorder %v2736_v62, %v2714_v9  ;;  %vm1100_vm2 = vcmp.eq.f32.partialorder %v2719_v48, 0.0  ;;  %v3789_v56 = vand.u32 2147483648, %v2901_v33 }
 0x205   : > { %v1094_v5 = vsel %vm3788_vm8, %v1093_v11, %v1091_v3  ;;  %1052 = vmax.xlane.f32.xlu1 %v1051_v27  ;;  %vm1504_vm10 = vcmp.eq.f32.partialorder %v2856_v29, inf  ;;  %vm3790_vm15 = vcmp.lt.f32.partialorder %v2637_v40, 0.0  ;;  %v1594_v2 = vmul.f32 %v1593_v18, %v2967_v44  ;;  %v3806_v11 = vld [vmem:[#allocation17_spill] sm:$0xff] }
 0x206   : > { %v3114_v6 = vsel %vm1499_vm13, %v3789_v56, %v1498_v35  ;;  %v1144_v42 = vsel %vm3790_vm15, %v1143_v26, %v1141_v36  ;;  %v1096_v22 = vsub.f32 3.1415927, %v1094_v5  ;;  %v1545_v9 = vmul.f32 %v1544_v0, %v2992_v58  ;;  %v3805_v36 = vld [vmem:[#allocation16_spill] sm:$0xff]  ;;  %v3808_v26 = vld [vmem:[#allocation21_spill] sm:$0xff] }
 0x207   : > { %v1148_v62 = vsel %vm1147_vm7, %v2824_v31, %v1144_v42  ;;  %v1505_v52 = vsel %vm1504_vm10, %v2856_v29, %v1503_v12  ;;  %vm1506_vm4 = vcmp.eq.f32.partialorder %v2856_v29, 0.0  ;;  %v1507_v33 = vand.u32 2147483648, %v2856_v29  ;;  %vm3792_vm7 = vmmov %vm3786_vm1  ;;  %v3807_v12 = vld [vmem:[#allocation24_spill] sm:$0xff] }
 0x208   : > { %v1152_v61 = vsel %vm2729_vm12, nan, %v1148_v62  ;;  %vm3791_vm13 = vcmp.lt.f32.partialorder %v2685_v39, 0.0  ;;  %v1595_v59 = vadd.f32 -0.33333147, %v1594_v2  ;;  %v1546_v1 = vadd.f32 0.19993454, %v1545_v9  ;;  %vm3796_vm12 = vmmov %vm3786_vm1 }
 0x209   : > { %v1097_v40 = vsel %vm3791_vm13, %v1096_v22, %v1094_v5  ;;  %v1158_v20 = vsel %vm2757_vm0, %v2829_v49, %v1152_v61  ;;  %v3137_v14 = vsel %vm1506_vm4, %v1507_v33, %v1505_v52  ;;  %v1509_v29 = vsel %vm3792_vm7, %v3114_v6, -inf  ;;  %v3812_v2 = vld [vmem:[#allocation23_spill] sm:$0xff] }
 0x20a   : > { %v1101_v31 = vsel %vm1100_vm2, %v2939_v8, %v1097_v40  ;;  %v1159_v10 = vand.u32 2147483647, %v1158_v20  ;;  %v1596_v30 = vmul.f32 %v1595_v59, %v2967_v44  ;;  %v1547_v57 = vmul.f32 %v1546_v1, %v2992_v58  ;;  %v3814_v61 = vld [vmem:[#allocation19_spill] sm:$0xff] }
 0x20b   : > { %v1105_v39 = vsel %vm2780_vm14, nan, %v1101_v31  ;;  %v1113_v43 = vand.u32 2147483648, %v2719_v48  ;;  %v1510_v8 = vsel %vm3796_vm12, %v3137_v14, -inf  ;;  %v3797_v51 = vand.u32 2147483648, %v2709_v24  ;;  %v3801_v24 = vld [vmem:[#allocation20_spill] sm:$0xff] }
 0x20c   : > { %v1111_v49 = vsel %vm2794_vm11, %v3794_v63, %v1105_v39  ;;  %v1597_v16 = vmul.f32 %v1596_v30, %v3798_v17  ;;  %v1548_v28 = vadd.f32 -0.33333147, %v1547_v57  ;;  %v1511_v44 = vmax.f32 %v1509_v29, %v1510_v8 }
 0x20d   : > { %v3153_v60 = vor.u32 %v3797_v51, %v1159_v10  ;;  %v1112_v23 = vand.u32 2147483647, %v1111_v49  ;;  %vm1605_vm11 = vcmp.lt.s32.totalorder %v3800_v50, 0  ;;  %vm3803_vm0 = vcmp.gt.f32.partialorder %v3801_v24, %v3802_v53 }
 0x20e   : > { %v1598_v54 = vadd.f32 %v1597_v16, %v3798_v17  ;;  %v1549_v32 = vmul.f32 %v1548_v28, %v2992_v58  ;;  %1512 = vmax.xlane.f32.xlu0 %v1511_v44  ;;  %vm1602_vm14 = vcmp.lt.f32.partialorder %v3800_v50, 0.0  ;;  %v3804_v46 = vmov 0.0  }
 0x20f   : > { %v3156_v25 = vor.u32 %v1113_v43, %v1112_v23  ;;  %v1606_v7 = vsel %vm1605_vm11, 3.1415927, %v3804_v46  ;;  %vm1558_vm1 = vcmp.lt.s32.totalorder %v3805_v36, 0  ;;  %vm1607_vm6 = vcmp.eq.f32.partialorder %v3806_v11, 0.0 }
 0x210   : > { %v1600_v48 = vsub.f32 1.5707964, %v1598_v54  ;;  %v1550_v34 = vmul.f32 %v1549_v32, %v3799_v4  ;;  %vm3809_vm8 = vcmp.gt.f32.partialorder %v3807_v12, %v3808_v26  ;;  %v3810_v0 = vmov 0.7853982  }
 0x211   : > { %v1614_v35 = vsel %vm1602_vm14, 2.3561945, %v3810_v0  ;;  %vm1555_vm2 = vcmp.lt.f32.partialorder %v3805_v36, 0.0  ;;  %v1559_v22 = vsel %vm1558_vm1, 3.1415927, %v3804_v46  ;;  %vm3813_vm10 = vnez %v3812_v2 }
 0x212   : > { %v1601_v3 = vsel %vm3803_vm0, %v1600_v48, %v1598_v54  ;;  %v1551_v15 = vadd.f32 %v1550_v34, %v3799_v4  ;;  %v1620_v52 = vand.u32 2147483648, %v3806_v11  ;;  %vm1560_vm15 = vcmp.eq.f32.partialorder %v3814_v61, 0.0 }
 0x213   : > { %v1603_v38 = vsub.f32 3.1415927, %v1601_v3  ;;  %v1567_v59 = vsel %vm1555_vm2, 2.3561945, %v3810_v0  ;;  %v1573_v39 = vand.u32 2147483648, %v3814_v61 }
 0x214   : > { %v1553_v47 = vsub.f32 1.5707964, %v1551_v15 }
 0x215   : > { %v1604_v58 = vsel %vm1602_vm14, %v1603_v38, %v1601_v3 }
 0x216   : > { %v1608_v27 = vsel %vm1607_vm6, %v1606_v7, %v1604_v58  ;;  %v1554_v18 = vsel %vm3809_vm8, %v1553_v47, %v1551_v15  ;;  %v3817_v58 = vld [vmem:[#allocation28_spill] sm:$0xff] }
 0x217   : > { %v1612_v56 = vsel %vm2863_vm5, nan, %v1608_v27  ;;  %v1556_v42 = vsub.f32 3.1415927, %v1554_v18 }
 0x218   : > { %v1618_v9 = vsel %vm3813_vm10, %v1614_v35, %v1612_v56 }
 0x219   : > { %v1619_v62 = vand.u32 2147483647, %v1618_v9  ;;  %v1557_v33 = vsel %vm1555_vm2, %v1556_v42, %v1554_v18 }
 0x21a   : > { %v1561_v40 = vsel %vm1560_vm15, %v1559_v22, %v1557_v33 }
 0x21b   : > { %v3183_v1 = vor.u32 %v1620_v52, %v1619_v62  ;;  %v1565_v31 = vsel %vm2917_vm9, nan, %v1561_v40 }
 0x21c   : > { %v1571_v10 = vsel %vm2924_vm3, %v1567_v59, %v1565_v31 }
 0x21d   : > { %v1572_v13 = vand.u32 2147483647, %v1571_v10 }
 0x21f   : > { %v3190_v30 = vor.u32 %v1573_v39, %v1572_v13 }
 0x282   : > { %v594_v57 = vpop.xlane.xlu0 %593 }
 0x283   : > { %v595_v63 = vrot.slane %v594_v57, 4 }
 0x285   : > { %v596_v41 = vmax.f32 %v594_v57, %v595_v63 }
 0x287   : > { %v597_v49 = vrot.slane %v596_v41, 2 }
 0x289   : > { %v598_v43 = vmax.f32 %v596_v41, %v597_v49 }
 0x28b   : > { %v599_v8 = vrot.slane %v598_v43, 1 }
 0x28d   : > { %v600_v23 = vmax.f32 %v598_v43, %v599_v8 }
 0x28f   : > { %1900 = vpush %v600_v23 }
 0x292   : > { %v1053_v51 = vpop.xlane.xlu1 %1052 }
 0x293   : > { %v1054_v17 = vrot.slane %v1053_v51, 4 }
 0x295   : > { %v1055_v16 = vmax.f32 %v1053_v51, %v1054_v17 }
 0x297   : > { %v1056_v28 = vrot.slane %v1055_v16, 2 }
 0x299   : > { %v1057_v44 = vmax.f32 %v1055_v16, %v1056_v28 }
 0x29b   : > { %v1058_v54 = vrot.slane %v1057_v44, 1  ;;  %v1513_v32 = vpop.xlane.xlu0 %1512 }
 0x29c   : > { %v1514_v48 = vrot.slane %v1513_v32, 4 }
 0x29d   : > { %v1059_v4 = vmax.f32 %v1057_v44, %v1058_v54 }
 0x29e   : > { %v1515_v34 = vmax.f32 %v1513_v32, %v1514_v48 }
 0x29f   : > { %1902 = vpush %v1059_v4 }
 0x2a0   : > { %v1516_v50 = vrot.slane %v1515_v34, 2 }
 0x2a2   : > { %v1517_v24 = vmax.f32 %v1515_v34, %v1516_v50 }
 0x2a4   : > { %v1518_v53 = vrot.slane %v1517_v24, 1 }
 0x2a6   : > { %v1519_v3 = vmax.f32 %v1517_v24, %v1518_v53 }
 0x2a8   : > { %1904 = vpush %v1519_v3 }
 0x2c0   : > { %s1901_s10 = spop %1900 }
 0x2c1   : > { %v602_v15 = vstv %s1901_s10  ;;  %s2137_s10 = smov [#allocation9]  }
 0x2c2   : > { %v603_v38 = vmax.f32 %v602_v15, 1e-12 }
 0x2c4   : > { %1998 = vrcp.f32 %v603_v38 }
 0x2ce   : > { %v1999_v36 = vpop.eup %1998 }
 0x2cf   : > { %v605_v11 = vmul.f32 %v1999_v36, %v3817_v58  ;;  %v606_v27 = vmul.f32 %v1999_v36, %v3013_v55 }
 0x2d0   : > { %s1903_s12 = spop %1902 }
 0x2d1   : > { %v1061_v47 = vstv %s1903_s12  ;;  %v3194_v12 = vmin.f32 %v605_v11, 1.0  ;;  %v3196_v26 = vmin.f32 %v606_v27, 1.0  ;;  %s2062_s12 = sshll.u32 %s2137_s10, 4  ;;  %s2063_s12 = int_to_ptr.vmem [resolvable:$false] %s2062_s12 }
 0x2d2   : > { %v1062_v7 = vmax.f32 %v1061_v47, 1e-12  ;;  %p2065_p8 = scmp.lt.s32.totalorder %s3626_s30, %s2063_s12 }
 0x2d3   : > { %v703_v18 = vmul.f32 %v3194_v12, %v3194_v12  ;;  %v704_v35 = vmul.f32 %v3196_v26, %v3196_v26  ;;  %v3217_v51 = vand.u32 2147483647, %v3194_v12  ;;  %v3223_v16 = vand.u32 2147483647, %v3196_v26 }
 0x2d4   : > { %2000 = vrcp.f32 %v1062_v7  ;;  %vm750_vm8 = vcmp.lt.f32.partialorder %v3194_v12, 0.0  ;;  %vm753_vm2 = vcmp.lt.s32.totalorder %v3194_v12, 0  ;;  %vm800_vm10 = vcmp.lt.s32.totalorder %v3196_v26, 0 }
 0x2d5   : > { %v705_v5 = vsub.f32 1.0, %v703_v18  ;;  %v706_v56 = vsub.f32 1.0, %v704_v35  ;;  %vm797_vm15 = vcmp.lt.f32.partialorder %v3196_v26, 0.0 }
 0x2d7   : > { %v707_v42 = vmax.f32 %v705_v5, 0.0  ;;  %v708_v22 = vmax.f32 %v706_v56, 0.0 }
 0x2d9   : > { %s1905_s13 = spop %1904  ;;  %2002 = vrsqrt.f32 %v707_v42  ;;  %vm711_vm5 = vcmp.eq.f32.partialorder %v707_v42, inf  ;;  %vm713_vm9 = vcmp.eq.f32.partialorder %v707_v42, 0.0  ;;  %vm718_vm3 = vcmp.eq.f32.partialorder %v708_v22, inf }
 0x2da   : > { %v1521_v2 = vstv %s1905_s13  ;;  %2004 = vrsqrt.f32 %v708_v22  ;;  %v721_v41 = vand.u32 2147483648, %v708_v22  ;;  %vm720_vm4 = vcmp.eq.f32.partialorder %v708_v22, 0.0  ;;  %s2064_s13 = scalar_lea.vmem %s2063_s12, 1536 }
 0x2db   : > { %v1522_v52 = vmax.f32 %v1521_v2, 1e-12  ;;  %p2066_p11 = scmp.lt.s32.totalorder %s2064_s13, %s2058_s9 }
 0x2dd   : > { %2006 = vrcp.f32 %v1522_v52  ;;  %p2067_p13 = por %p2066_p11, %p2065_p8 }
 0x2de   : > { %v2001_v9 = vpop.eup %2000 }
 0x2df   : > { %v1064_v55 = vmul.f32 %v2001_v9, %v3043_v19  ;;  %v1065_v62 = vmul.f32 %v2001_v9, %v3085_v45  ;;  %v714_v45 = vand.u32 2147483648, %v707_v42  ;;  %p2068_p1 = pnand %p2067_p13, %p2061_p7 }
 0x2e1   : > { %v3204_v33 = vmin.f32 %v1064_v55, 1.0  ;;  %v3206_v61 = vmin.f32 %v1065_v62, 1.0 }
 0x2e3   : > { %v1162_v40 = vmul.f32 %v3204_v33, %v3204_v33  ;;  %v1163_v59 = vmul.f32 %v3206_v61, %v3206_v61  ;;  %v2003_v29 = vpop.eup %2002  ;;  %v3247_v11 = vand.u32 2147483647, %v3204_v33  ;;  %v3253_v18 = vand.u32 2147483647, %v3206_v61 }
 0x2e4   : > { %v2005_v19 = vpop.eup %2004  ;;  %v710_v39 = vmul.f32 %v2003_v29, %v707_v42 }
 0x2e5   : > { %v1164_v20 = vsub.f32 1.0, %v1162_v40  ;;  %v1165_v31 = vsub.f32 1.0, %v1163_v59  ;;  %v717_v57 = vmul.f32 %v2005_v19, %v708_v22 }
 0x2e6   : > { %v712_v63 = vsel %vm711_vm5, %v707_v42, %v710_v39  ;;  %vm1209_vm5 = vcmp.lt.f32.partialorder %v3204_v33, 0.0 }
 0x2e7   : > { %v1166_v10 = vmax.f32 %v1164_v20, 0.0  ;;  %v1167_v13 = vmax.f32 %v1165_v31, 0.0  ;;  %v3212_v49 = vsel %vm713_vm9, %v714_v45, %v712_v63  ;;  %v719_v43 = vsel %vm718_vm3, %v708_v22, %v717_v57  ;;  %v2007_v17 = vpop.eup %2006 }
 0x2e8   : > { %v3214_v8 = vsel %vm720_vm4, %v721_v41, %v719_v43  ;;  %v3220_v23 = vand.u32 2147483647, %v3212_v49  ;;  %v1524_v32 = vmul.f32 %v2007_v17, %v3114_v6  ;;  %v1525_v48 = vmul.f32 %v2007_v17, %v3137_v14 }
 0x2e9   : > { %2008 = vrsqrt.f32 %v1166_v10  ;;  %v3226_v28 = vand.u32 2147483647, %v3214_v8  ;;  %vm1170_vm13 = vcmp.eq.f32.partialorder %v1166_v10, inf  ;;  %v1173_v3 = vand.u32 2147483648, %v1166_v10 }
 0x2ea   : > { %2010 = vrsqrt.f32 %v1167_v13  ;;  %v726_v44 = vmax.f32 %v3217_v51, %v3220_v23  ;;  %v3234_v4 = vmin.f32 %v1524_v32, 1.0  ;;  %v3236_v34 = vmin.f32 %v1525_v48, 1.0 }
 0x2eb   : > { %v773_v54 = vmax.f32 %v3223_v16, %v3226_v28  ;;  %vm1172_vm7 = vcmp.eq.f32.partialorder %v1166_v10, 0.0  ;;  %vm1177_vm12 = vcmp.eq.f32.partialorder %v1167_v13, inf  ;;  %v1180_v14 = vand.u32 2147483648, %v1167_v13 }
 0x2ec   : > { %2012 = vrcp.f32 %v726_v44  ;;  %v1622_v38 = vmul.f32 %v3234_v4, %v3234_v4  ;;  %v1623_v47 = vmul.f32 %v3236_v34, %v3236_v34  ;;  %vm1179_vm11 = vcmp.eq.f32.partialorder %v1167_v13, 0.0 }
 0x2ed   : > { %2014 = vrcp.f32 %v773_v54  ;;  %v725_v35 = vmin.f32 %v3217_v51, %v3220_v23  ;;  %v772_v2 = vmin.f32 %v3223_v16, %v3226_v28  ;;  %vm1212_vm9 = vcmp.lt.s32.totalorder %v3204_v33, 0 }
 0x2ee   : > { %v1624_v56 = vsub.f32 1.0, %v1622_v38  ;;  %v1625_v42 = vsub.f32 1.0, %v1623_v47  ;;  %vm1259_vm3 = vcmp.lt.s32.totalorder %v3206_v61, 0  ;;  %vm757_vm4 = vcmp.ne.f32.partialorder %v3194_v12, %v3194_v12 }
 0x2f0   : > { %v1626_v20 = vmax.f32 %v1624_v56, 0.0  ;;  %v1627_v31 = vmax.f32 %v1625_v42, 0.0 }
 0x2f2   : > { %vm1630_vm0 = vcmp.eq.f32.partialorder %v1626_v20, inf  ;;  %vm1632_vm14 = vcmp.eq.f32.partialorder %v1626_v20, 0.0  ;;  %vm1637_vm1 = vcmp.eq.f32.partialorder %v1627_v31, inf  ;;  %vm1639_vm6 = vcmp.eq.f32.partialorder %v1627_v31, 0.0 }
 0x2f3   : > { %v2009_v50 = vpop.eup %2008 }
 0x2f4   : > { %v2011_v24 = vpop.eup %2010  ;;  %v1169_v53 = vmul.f32 %v2009_v50, %v1166_v10 }
 0x2f5   : > { %v1176_v15 = vmul.f32 %v2011_v24, %v1167_v13 }
 0x2f6   : > { %v1171_v6 = vsel %vm1170_vm13, %v1166_v10, %v1169_v53  ;;  %v2013_v22 = vpop.eup %2012  ;;  %v3293_v53 = vand.u32 2147483647, %v3234_v4  ;;  %vm755_vm13 = vcmp.eq.f32.partialorder %v3212_v49, 0.0 }
 0x2f7   : > { %v3242_v7 = vsel %vm1172_vm7, %v1173_v3, %v1171_v6  ;;  %v1178_v36 = vsel %vm1177_vm12, %v1167_v13, %v1176_v15  ;;  %v2015_v55 = vpop.eup %2014  ;;  %v3264_v62 = vmul.f32 %v2013_v22, %v725_v35  ;;  %v1633_v35 = vand.u32 2147483648, %v1626_v20 }
 0x2f8   : > { %v3244_v58 = vsel %vm1179_vm11, %v1180_v14, %v1178_v36  ;;  %v3250_v27 = vand.u32 2147483647, %v3242_v7  ;;  %v3268_v40 = vmul.f32 %v2015_v55, %v772_v2  ;;  %vm758_vm7 = vcmp.ne.f32.partialorder %v3212_v49, %v3212_v49 }
 0x2f9   : > { %v3258_v5 = vand.u32 2147483647, %v3244_v58  ;;  %v3272_v59 = vmul.f32 %v3264_v62, %v3264_v62  ;;  %vm804_vm12 = vcmp.ne.f32.partialorder %v3196_v26, %v3196_v26  ;;  %vm763_vm11 = vcmp.eq.s32.totalorder %v3217_v51, inf }
 0x2fa   : > { %v1185_v9 = vmax.f32 %v3247_v11, %v3250_v27  ;;  %v3276_v29 = vmul.f32 %v3268_v40, %v3268_v40  ;;  %v1184_v41 = vmin.f32 %v3247_v11, %v3250_v27 }
 0x2fb   : > { %v1232_v52 = vmax.f32 %v3253_v18, %v3258_v5  ;;  %v730_v10 = vmul.f32 0.002785687, %v3272_v59  ;;  %v1231_v44 = vmin.f32 %v3253_v18, %v3258_v5 }
 0x2fc   : > { %2016 = vrcp.f32 %v1185_v9  ;;  %v777_v13 = vmul.f32 0.002785687, %v3276_v29 }
 0x2fd   : > { %2018 = vrcp.f32 %v1232_v52  ;;  %v731_v19 = vadd.f32 -0.015866, %v730_v10  ;;  %v1640_v52 = vand.u32 2147483648, %v1627_v31 }
 0x2fe   : > { %2020 = vrsqrt.f32 %v1626_v20  ;;  %v778_v39 = vadd.f32 -0.015866, %v777_v13 }
 0x2ff   : > { %2022 = vrsqrt.f32 %v1627_v31  ;;  %v732_v45 = vmul.f32 %v731_v19, %v3272_v59 }
 0x300   : > { %v779_v57 = vmul.f32 %v778_v39, %v3276_v29 }
 0x301   : > { %v733_v63 = vadd.f32 0.04247222, %v732_v45 }
 0x302   : > { %v780_v17 = vadd.f32 0.04247222, %v779_v57 }
 0x303   : > { %v734_v32 = vmul.f32 %v733_v63, %v3272_v59 }
 0x304   : > { %v781_v50 = vmul.f32 %v780_v17, %v3276_v29 }
 0x305   : > { %v735_v15 = vadd.f32 -0.074975304, %v734_v32 }
 0x306   : > { %v2017_v43 = vpop.eup %2016  ;;  %v782_v6 = vadd.f32 -0.074975304, %v781_v50 }
 0x307   : > { %v2019_v54 = vpop.eup %2018  ;;  %v3287_v48 = vmul.f32 %v2017_v43, %v1184_v41  ;;  %v736_v56 = vmul.f32 %v735_v15, %v3272_v59 }
 0x308   : > { %v3290_v24 = vmul.f32 %v2019_v54, %v1231_v44  ;;  %v2021_v3 = vpop.eup %2020  ;;  %v783_v2 = vmul.f32 %v782_v6, %v3276_v29  ;;  %v3325_v6 = vand.u32 2147483647, %v3236_v34 }
 0x309   : > { %v3297_v38 = vmul.f32 %v3287_v48, %v3287_v48  ;;  %v2023_v47 = vpop.eup %2022  ;;  %v1629_v36 = vmul.f32 %v2021_v3, %v1626_v20  ;;  %v737_v10 = vadd.f32 0.1064488, %v736_v56 }
 0x30a   : > { %v3301_v14 = vmul.f32 %v3290_v24, %v3290_v24  ;;  %v1636_v22 = vmul.f32 %v2023_v47, %v1627_v31  ;;  %v784_v45 = vadd.f32 0.1064488, %v783_v2 }
 0x30b   : > { %v1189_v42 = vmul.f32 0.002785687, %v3297_v38  ;;  %v1631_v55 = vsel %vm1630_vm0, %v1626_v20, %v1629_v36  ;;  %v738_v41 = vmul.f32 %v737_v10, %v3272_v59  ;;  %vm802_vm0 = vcmp.eq.f32.partialorder %v3214_v8, 0.0 }
 0x30c   : > { %v1236_v9 = vmul.f32 0.002785687, %v3301_v14  ;;  %v3308_v19 = vsel %vm1632_vm14, %v1633_v35, %v1631_v55  ;;  %v1638_v39 = vsel %vm1637_vm1, %v1627_v31, %v1636_v22  ;;  %v785_v17 = vmul.f32 %v784_v45, %v3276_v29 }
 0x30d   : > { %v1190_v13 = vadd.f32 -0.015866, %v1189_v42  ;;  %v3311_v63 = vand.u32 2147483647, %v3308_v19  ;;  %v3317_v54 = vsel %vm1639_vm6, %v1640_v52, %v1638_v39  ;;  %v739_v32 = vadd.f32 -0.14207031, %v738_v41 }
 0x30e   : > { %v1237_v57 = vadd.f32 -0.015866, %v1236_v9  ;;  %v786_v3 = vadd.f32 -0.14207031, %v785_v17  ;;  %v3328_v36 = vand.u32 2147483647, %v3317_v54  ;;  %vm805_vm1 = vcmp.ne.f32.partialorder %v3214_v8, %v3214_v8 }
 0x30f   : > { %v1191_v43 = vmul.f32 %v1190_v13, %v3297_v38  ;;  %v1645_v20 = vmax.f32 %v3293_v53, %v3311_v63  ;;  %v740_v47 = vmul.f32 %v739_v32, %v3272_v59  ;;  %v3339_v9 = vsel %vm750_vm8, 2.3561945, %v3810_v0 }
 0x310   : > { %v1238_v44 = vmul.f32 %v1237_v57, %v3301_v14  ;;  %v787_v35 = vmul.f32 %v786_v3, %v3276_v29  ;;  %v1692_v2 = vmax.f32 %v3325_v6, %v3328_v36  ;;  %v3343_v13 = vsel %vm753_vm2, 3.1415927, %v3804_v46 }
 0x311   : > { %v1192_v50 = vadd.f32 0.04247222, %v1191_v43  ;;  %2024 = vrcp.f32 %v1645_v20  ;;  %v741_v42 = vadd.f32 0.19993454, %v740_v47  ;;  %v3349_v57 = vsel %vm800_vm10, 3.1415927, %v3804_v46 }
 0x312   : > { %v1239_v15 = vadd.f32 0.04247222, %v1238_v44  ;;  %v788_v55 = vadd.f32 0.19993454, %v787_v35  ;;  %2026 = vrcp.f32 %v1692_v2  ;;  %v3366_v35 = vsel %vm1212_vm9, 3.1415927, %v3804_v46  ;;  %vm3427_vm9 = vmor %vm757_vm4, %vm758_vm7 }
 0x313   : > { %v1193_v31 = vmul.f32 %v1192_v50, %v3297_v38  ;;  %v742_v10 = vmul.f32 %v741_v42, %v3272_v59  ;;  %v3359_v50 = vsel %vm797_vm15, 2.3561945, %v3810_v0  ;;  %v3378_v2 = vsel %vm1259_vm3, 3.1415927, %v3804_v46 }
 0x314   : > { %v1240_v56 = vmul.f32 %v1239_v15, %v3301_v14  ;;  %v789_v45 = vmul.f32 %v788_v55, %v3276_v29  ;;  %v1644_v15 = vmin.f32 %v3293_v53, %v3311_v63  ;;  %vm810_vm14 = vcmp.eq.s32.totalorder %v3223_v16, inf }
 0x315   : > { %v1194_v22 = vadd.f32 -0.074975304, %v1193_v31  ;;  %v743_v43 = vadd.f32 -0.33333147, %v742_v10  ;;  %vm747_vm6 = vcmp.gt.f32.partialorder %v3220_v23, %v3217_v51  ;;  %vm794_vm2 = vcmp.gt.f32.partialorder %v3226_v28, %v3223_v16 }
 0x316   : > { %v1241_v52 = vadd.f32 -0.074975304, %v1240_v56  ;;  %v790_v44 = vadd.f32 -0.33333147, %v789_v45  ;;  %vm764_vm10 = vcmp.eq.s32.totalorder %v3220_v23, inf  ;;  %vm811_vm3 = vcmp.eq.s32.totalorder %v3226_v28, inf }
 0x317   : > { %v1195_v39 = vmul.f32 %v1194_v22, %v3297_v38  ;;  %v744_v32 = vmul.f32 %v743_v43, %v3272_v59  ;;  %v3371_v59 = vsel %vm1209_vm5, 2.3561945, %v3810_v0  ;;  %vm812_vm4 = vmand %vm810_vm14, %vm811_vm3  ;;  %vm1256_vm7 = vcmp.lt.f32.partialorder %v3206_v61, 0.0 }
 0x318   : > { %v1242_v41 = vmul.f32 %v1241_v52, %v3301_v14  ;;  %v791_v31 = vmul.f32 %v790_v44, %v3276_v29  ;;  %vm1264_vm14 = vcmp.ne.f32.partialorder %v3244_v58, %v3244_v58  ;;  %vm1270_vm3 = vcmp.eq.s32.totalorder %v3258_v5, inf }
 0x319   : > { %v1196_v17 = vadd.f32 0.1064488, %v1195_v39  ;;  %v745_v42 = vmul.f32 %v744_v32, %v3264_v62  ;;  %v768_v39 = vand.u32 2147483648, %v3212_v49 }
 0x31a   : > { %v1243_v20 = vadd.f32 0.1064488, %v1242_v41  ;;  %v792_v55 = vmul.f32 %v791_v31, %v3268_v40 }
 0x31b   : > { %v1197_v3 = vmul.f32 %v1196_v17, %v3297_v38  ;;  %v2025_v47 = vpop.eup %2024  ;;  %v746_v10 = vadd.f32 %v745_v42, %v3264_v62  ;;  %v1691_v62 = vmin.f32 %v3325_v6, %v3328_v36 }
 0x31c   : > { %v1244_v56 = vmul.f32 %v1243_v20, %v3301_v14  ;;  %v3380_v29 = vmul.f32 %v2025_v47, %v1644_v15  ;;  %v793_v43 = vadd.f32 %v792_v55, %v3268_v40  ;;  %v2027_v44 = vpop.eup %2026 }
 0x31d   : > { %v1198_v22 = vadd.f32 -0.14207031, %v1197_v3  ;;  %v748_v20 = vsub.f32 1.5707964, %v746_v10  ;;  %v3407_v47 = vmul.f32 %v2027_v44, %v1691_v62 }
 0x31e   : > { %v1245_v52 = vadd.f32 -0.14207031, %v1244_v56  ;;  %v3394_v41 = vmul.f32 %v3380_v29, %v3380_v29  ;;  %v795_v40 = vsub.f32 1.5707964, %v793_v43 }
 0x31f   : > { %v1199_v45 = vmul.f32 %v1198_v22, %v3297_v38  ;;  %v749_v31 = vsel %vm747_vm6, %v748_v20, %v746_v10  ;;  %vm1253_vm6 = vcmp.gt.f32.partialorder %v3258_v5, %v3253_v18 }
 0x320   : > { %v1246_v17 = vmul.f32 %v1245_v52, %v3301_v14  ;;  %v1649_v3 = vmul.f32 0.002785687, %v3394_v41  ;;  %v751_v22 = vsub.f32 3.1415927, %v749_v31  ;;  %v796_v55 = vsel %vm794_vm2, %v795_v40, %v793_v43 }
 0x321   : > { %v1200_v32 = vadd.f32 0.19993454, %v1199_v45  ;;  %v3415_v45 = vmul.f32 %v3407_v47, %v3407_v47  ;;  %vm1223_vm2 = vcmp.eq.s32.totalorder %v3250_v27, inf }
 0x322   : > { %v1247_v15 = vadd.f32 0.19993454, %v1246_v17  ;;  %v1650_v42 = vadd.f32 -0.015866, %v1649_v3  ;;  %v798_v17 = vsub.f32 3.1415927, %v796_v55  ;;  %v752_v44 = vsel %vm750_vm8, %v751_v22, %v749_v31  ;;  %vm3444_vm8 = vmor %vm804_vm12, %vm805_vm1 }
 0x323   : > { %v1201_v56 = vmul.f32 %v1200_v32, %v3297_v38  ;;  %v1696_v32 = vmul.f32 0.002785687, %v3415_v45  ;;  %v756_v3 = vsel %vm755_vm13, %v3343_v13, %v752_v44  ;;  %vm1216_vm13 = vcmp.ne.f32.partialorder %v3204_v33, %v3204_v33 }
 0x324   : > { %v1248_v52 = vmul.f32 %v1247_v15, %v3301_v14  ;;  %v1651_v10 = vmul.f32 %v1650_v42, %v3394_v41  ;;  %v799_v40 = vsel %vm797_vm15, %v798_v17, %v796_v55  ;;  %vm765_vm15 = vmand %vm763_vm11, %vm764_vm10  ;;  %vm1263_vm12 = vcmp.ne.f32.partialorder %v3206_v61, %v3206_v61 }
 0x325   : > { %v1202_v62 = vadd.f32 -0.33333147, %v1201_v56  ;;  %v760_v56 = vsel %vm3427_vm9, nan, %v756_v3  ;;  %v803_v13 = vsel %vm802_vm0, %v3349_v57, %v799_v40  ;;  %v1697_v42 = vadd.f32 -0.015866, %v1696_v32 }
 0x326   : > { %v1249_v20 = vadd.f32 -0.33333147, %v1248_v52  ;;  %v1652_v31 = vadd.f32 0.04247222, %v1651_v10  ;;  %v766_v22 = vsel %vm765_vm15, %v3339_v9, %v760_v56  ;;  %v815_v52 = vand.u32 2147483648, %v3214_v8  ;;  %vm3543_vm15 = vmor %vm1263_vm12, %vm1264_vm14 }
 0x327   : > { %v1203_v15 = vmul.f32 %v1202_v62, %v3297_v38  ;;  %v807_v38 = vsel %vm3444_vm8, nan, %v803_v13  ;;  %v767_v9 = vand.u32 2147483647, %v766_v22  ;;  %v1698_v16 = vmul.f32 %v1697_v42, %v3415_v45 }
 0x328   : > { %v1250_v26 = vmul.f32 %v1249_v20, %v3301_v14  ;;  %v1653_v23 = vmul.f32 %v1652_v31, %v3394_v41  ;;  %v3474_v14 = vld [vmem:[%s3678_s4] sm:$0xff]  ;;  %v813_v57 = vsel %vm812_vm4, %v3359_v50, %v807_v38  ;;  %vm1222_vm11 = vcmp.eq.s32.totalorder %v3247_v11, inf  ;;  %v3492_v50 = vld [vmem:[%s3678_s4 + $0x8] sm:$0xff] }
 0x329   : > { %v1204_v51 = vmul.f32 %v1203_v15, %v3287_v48  ;;  %v814_v55 = vand.u32 2147483647, %v813_v57  ;;  %v769_v10 = vor.u32 %v768_v39, %v767_v9  ;;  %vm1217_vm0 = vcmp.ne.f32.partialorder %v3242_v7, %v3242_v7 }
 0x32a   : > { %v1251_v28 = vmul.f32 %v1250_v26, %v3290_v24  ;;  %v1654_v62 = vadd.f32 -0.074975304, %v1653_v23  ;;  %vm1206_vm1 = vcmp.gt.f32.partialorder %v3250_v27, %v3247_v11  ;;  %vm1214_vm10 = vcmp.eq.f32.partialorder %v3242_v7, 0.0  ;;  %vm3522_vm9 = vmor %vm1216_vm13, %vm1217_vm0 }
 0x32b   : > { %v1205_v17 = vadd.f32 %v1204_v51, %v3287_v48  ;;  %v1699_v48 = vadd.f32 0.04247222, %v1698_v16  ;;  %v816_v44 = vor.u32 %v815_v52, %v814_v55  ;;  %v817_v32 = vmul.f32 %v769_v10, %v3474_v14  ;;  %vm1224_vm13 = vmand %vm1222_vm11, %vm1223_vm2 }
 0x32c   : > { %v1252_v8 = vadd.f32 %v1251_v28, %v3290_v24  ;;  %v1655_v20 = vmul.f32 %v1654_v62, %v3394_v41  ;;  %vm3824_vm8 = vcmask 130048   ;;  %vm1269_vm0 = vcmp.eq.s32.totalorder %v3253_v18, inf }
 0x32d   : > { %v1207_v43 = vsub.f32 1.5707964, %v1205_v17  ;;  %v1700_v39 = vmul.f32 %v1699_v48, %v3415_v45  ;;  %v818_v3 = vmul.f32 %v816_v44, %v3492_v50  ;;  %v819_v56 = vadd.f32 %v817_v32, %v3089_v21  ;;  %vm3827_vm4 = vmmov %vm3824_vm8 }
 0x32e   : > { %v1254_v49 = vsub.f32 1.5707964, %v1252_v8  ;;  %v1656_v24 = vadd.f32 0.1064488, %v1655_v20  ;;  %v1268_v55 = vsel %vm1256_vm7, 2.3561945, %v3810_v0  ;;  %vm1271_vm12 = vmand %vm1269_vm0, %vm1270_vm3  ;;  %vm1666_vm14 = vcmp.gt.f32.partialorder %v3311_v63, %v3293_v53 }
 0x32f   : > { %v1208_v40 = vsel %vm1206_vm1, %v1207_v43, %v1205_v17  ;;  %v1701_v31 = vadd.f32 -0.074975304, %v1700_v39  ;;  %v820_v42 = vadd.f32 %v818_v3, %v3079_v37  ;;  %821 = vst.msk [vmem:[%s3529_s26] sm:$0xff] %vm3824_vm8, %v819_v56  ;;  %vm3829_vm11 = vmmov %vm3827_vm4  ;;  %vm1672_vm1 = vcmp.lt.s32.totalorder %v3234_v4, 0 }
 0x330   : > { %v1210_v12 = vsub.f32 3.1415927, %v1208_v40  ;;  %v1255_v15 = vsel %vm1253_vm6, %v1254_v49, %v1252_v8  ;;  %v1657_v26 = vmul.f32 %v1656_v24, %v3394_v41  ;;  %vm1677_vm6 = vcmp.ne.f32.partialorder %v3308_v19, %v3308_v19 }
 0x331   : > { %v1257_v13 = vsub.f32 3.1415927, %v1255_v15  ;;  %v1702_v38 = vmul.f32 %v1701_v31, %v3415_v45  ;;  %822 = vst.msk [vmem:[%s3529_s26 + $0x8] sm:$0xff] %vm3827_vm4, %v820_v42  ;;  %vm1669_vm2 = vcmp.lt.f32.partialorder %v3234_v4, 0.0  ;;  %vm1674_vm3 = vcmp.eq.f32.partialorder %v3308_v19, 0.0 }
 0x332   : > { %v1211_v22 = vsel %vm1209_vm5, %v1210_v12, %v1208_v40  ;;  %vm1261_vm5 = vcmp.eq.f32.partialorder %v3244_v58, 0.0  ;;  %v1658_v23 = vadd.f32 -0.14207031, %v1657_v26  ;;  %v1681_v26 = vsel %vm1669_vm2, 2.3561945, %v3810_v0 }
 0x333   : > { %v1215_v37 = vsel %vm1214_vm10, %v3366_v35, %v1211_v22  ;;  %v1258_v51 = vsel %vm1256_vm7, %v1257_v13, %v1255_v15  ;;  %v1703_v57 = vadd.f32 0.1064488, %v1702_v38  ;;  %vm3828_vm7 = vmmov %vm3827_vm4  ;;  %vm1676_vm10 = vcmp.ne.f32.partialorder %v3234_v4, %v3234_v4 }
 0x334   : > { %v1219_v35 = vsel %vm3522_vm9, nan, %v1215_v37  ;;  %v1262_v9 = vsel %vm1261_vm5, %v3378_v2, %v1258_v51  ;;  %v1659_v11 = vmul.f32 %v1658_v23, %v3394_v41  ;;  %v1227_v2 = vand.u32 2147483648, %v3242_v7  ;;  %vm1678_vm8 = vmor %vm1676_vm10, %vm1677_vm6 }
 0x335   : > { %v1225_v28 = vsel %vm1224_vm13, %v3371_v59, %v1219_v35  ;;  %v1266_v16 = vsel %vm3543_vm15, nan, %v1262_v9  ;;  %v1704_v18 = vmul.f32 %v1703_v57, %v3415_v45  ;;  %v1274_v59 = vand.u32 2147483648, %v3244_v58 }
 0x336   : > { %v1226_v27 = vand.u32 2147483647, %v1225_v28  ;;  %v1272_v52 = vsel %vm1271_vm12, %v1268_v55, %v1266_v16  ;;  %v1660_v62 = vadd.f32 0.19993454, %v1659_v11  ;;  %vm1683_vm9 = vcmp.eq.s32.totalorder %v3311_v63, inf }
 0x337   : > { %v1273_v17 = vand.u32 2147483647, %v1272_v52  ;;  %v1705_v61 = vadd.f32 -0.14207031, %v1704_v18  ;;  %vm1682_vm5 = vcmp.eq.s32.totalorder %v3293_v53, inf  ;;  %vm1713_vm15 = vcmp.gt.f32.partialorder %v3328_v36, %v3325_v6 }
 0x338   : > { %v1228_v10 = vor.u32 %v1227_v2, %v1226_v27  ;;  %v1661_v5 = vmul.f32 %v1660_v62, %v3394_v41  ;;  %vm1684_vm4 = vmand %vm1682_vm5, %vm1683_vm9  ;;  %vm1719_vm13 = vcmp.lt.s32.totalorder %v3236_v34, 0  ;;  %vm1724_vm0 = vcmp.ne.f32.partialorder %v3317_v54, %v3317_v54 }
 0x339   : > { %v1275_v8 = vor.u32 %v1274_v59, %v1273_v17  ;;  %v1706_v44 = vmul.f32 %v1705_v61, %v3415_v45  ;;  %v1687_v21 = vand.u32 2147483648, %v3308_v19  ;;  %vm1716_vm12 = vcmp.lt.f32.partialorder %v3236_v34, 0.0 }
 0x33a   : > { %v1276_v48 = vmul.f32 %v1228_v10, %v3474_v14  ;;  %v1662_v43 = vadd.f32 -0.33333147, %v1661_v5  ;;  %v1720_v38 = vsel %vm1719_vm13, 3.1415927, %v3804_v46  ;;  %vm1729_vm6 = vcmp.eq.s32.totalorder %v3325_v6, inf }
 0x33b   : > { %v1277_v7 = vmul.f32 %v1275_v8, %v3492_v50  ;;  %v1707_v20 = vadd.f32 0.19993454, %v1706_v44  ;;  %v1734_v35 = vand.u32 2147483648, %v3317_v54  ;;  %vm3830_vm10 = vcmask 130048  }
 0x33c   : > { %v1278_v32 = vadd.f32 %v1276_v48, %v3156_v25  ;;  %v1663_v49 = vmul.f32 %v1662_v43, %v3394_v41  ;;  %vm3831_vm9 = vmmov %vm3830_vm10 }
 0x33d   : > { %v1279_v58 = vadd.f32 %v1277_v7, %v3153_v60  ;;  %v1708_v39 = vmul.f32 %v1707_v20, %v3415_v45 }
 0x33e   : > { %1881 = vst.msk [vmem:[%s3529_s26 + $0x10] sm:$0xff] %vm3828_vm7, %v1278_v32  ;;  %v1664_v3 = vmul.f32 %v1663_v49, %v3380_v29  ;;  %vm1730_vm7 = vcmp.eq.s32.totalorder %v3328_v36, inf  ;;  %v1728_v36 = vsel %vm1716_vm12, 2.3561945, %v3810_v0 }
 0x33f   : > { %1882 = vst.msk [vmem:[%s3529_s26 + $0x18] sm:$0xff] %vm3829_vm11, %v1279_v58  ;;  %v1709_v40 = vadd.f32 -0.33333147, %v1708_v39  ;;  %vm1721_vm11 = vcmp.eq.f32.partialorder %v3317_v54, 0.0 }
 0x340   : > { %v1665_v24 = vadd.f32 %v1664_v3, %v3380_v29 }
 0x341   : > { %v1710_v12 = vmul.f32 %v1709_v40, %v3415_v45  ;;  %v1673_v45 = vsel %vm1672_vm1, 3.1415927, %v3804_v46 }
 0x342   : > { %v1667_v15 = vsub.f32 1.5707964, %v1665_v24 }
 0x343   : > { %v1711_v25 = vmul.f32 %v1710_v12, %v3407_v47 }
 0x344   : > { %v1668_v60 = vsel %vm1666_vm14, %v1667_v15, %v1665_v24  ;;  %vm1723_vm14 = vcmp.ne.f32.partialorder %v3236_v34, %v3236_v34 }
 0x345   : > { %v1670_v41 = vsub.f32 3.1415927, %v1668_v60  ;;  %v1712_v31 = vadd.f32 %v1711_v25, %v3407_v47  ;;  %vm1725_vm1 = vmor %vm1723_vm14, %vm1724_vm0 }
 0x347   : > { %v1671_v29 = vsel %vm1669_vm2, %v1670_v41, %v1668_v60  ;;  %v1714_v56 = vsub.f32 1.5707964, %v1712_v31  ;;  %vm1731_vm2 = vmand %vm1729_vm6, %vm1730_vm7 }
 0x348   : > { %v1675_v13 = vsel %vm1674_vm3, %v1673_v45, %v1671_v29 }
 0x349   : > { %v1679_v47 = vsel %vm1678_vm8, nan, %v1675_v13  ;;  %v1715_v4 = vsel %vm1713_vm15, %v1714_v56, %v1712_v31 }
 0x34a   : > { %v1685_v63 = vsel %vm1684_vm4, %v1681_v26, %v1679_v47  ;;  %v1717_v42 = vsub.f32 3.1415927, %v1715_v4 }
 0x34b   : > { %v1686_v22 = vand.u32 2147483647, %v1685_v63 }
 0x34c   : > { %v1718_v53 = vsel %vm1716_vm12, %v1717_v42, %v1715_v4 }
 0x34d   : > { %v1688_v37 = vor.u32 %v1687_v21, %v1686_v22  ;;  %v1722_v51 = vsel %vm1721_vm11, %v1720_v38, %v1718_v53 }
 0x34e   : > { %v1726_v19 = vsel %vm1725_vm1, nan, %v1722_v51 }
 0x34f   : > { %v1732_v33 = vsel %vm1731_vm2, %v1728_v36, %v1726_v19  ;;  %v1736_v46 = vmul.f32 %v1688_v37, %v3474_v14 }
 0x350   : > { %v1733_v23 = vand.u32 2147483647, %v1732_v33 }
 0x351   : > { %v1738_v34 = vadd.f32 %v1736_v46, %v3190_v30 }
 0x352   : > { %v1735_v9 = vor.u32 %v1734_v35, %v1733_v23 }
 0x353   : > { %1893 = vst.msk [vmem:[%s3529_s26 + $0x20] sm:$0xff] %vm3830_vm10, %v1738_v34 }
 0x354   : > { %v1737_v6 = vmul.f32 %v1735_v9, %v3492_v50 }
 0x356   : > { %v1739_v0 = vadd.f32 %v1737_v6, %v3183_v1 }
 0x358   : > { %1894 = vst.msk [vmem:[%s3529_s26 + $0x28] sm:$0xff] %vm3831_vm9, %v1739_v0 }
 0x359   : > { %2071 = shalt.err (!%p2068_p1)
}
 0x35a   : > { %s2072_s14 = scalar_lea.hbm %s3624_s8, 768  ;;  %s2076_s11 = scalar_lea.hbm %s3679_s5, 1536 }
 0x35b   : > { %p2073_p2 = scmp.ne.s32.totalorder %s3624_s8, %s2072_s14  ;;  %p2077_p9 = scmp.lt.u32.totalorder %s3624_s8, %s3679_s5 }
 0x35c   : > { %p2078_p5 = scmp.lt.u32.totalorder %s2076_s11, %s2072_s14  ;;  %p2080_p10 = scmp.lt.u32.totalorder %s2072_s14, %s3624_s8 }
 0x35d   : > { %p2074_p3 = pnand %p2073_p2, %p3832_p12 }
 0x35e   : > { %p2079_p6 = por %p2078_p5, %p2077_p9 }
 0x35f   : > { %p2075_p4 = pneg %p2074_p3 }
 0x360   : > { %p2081_p0 = por %p2080_p10, %p2079_p6 }
 0x362   : > { %p2082_p7 = pnand %p2081_p0, %p2075_p4 }
 0x364   : > { %2085 = shalt.err (!%p2082_p7)
}
 0x365   : > { %s2138_s26 = smov 128   ;;  %s2139_s16 = smov 8  }
 0x366   : > { %1915 = dma.vmem_to_hbm [thread:$0]  (%p3832_p12), %s3626_s30, 768, %s3624_s8, %s3633_s22, %s2138_s26, %s2138_s26, %s2139_s16  }
 0x367 PF: > { %p1932_p8 = scmp.ge.s32.totalorder %s2128_s21, 2  ;;  %s1772_s6 = sand.u32 1, %s2116_s18  }
 0x368   : > { %p3833_p11 = scmp.ne.s32.totalorder %s3716_s29, 0  ;;  %s1773_s7 = scalar_lea.sflag [#allocation5], %s1772_s6 }
 0x36a   : > { %p1925_p13 = pnand %p1932_p8, %p3833_p11 }
 0x36c   : > { %2111 = dma.done.wait (!%p1925_p13), %s1773_s7, 768  }
 0x36d   : > { %2113 = vsyncadd (!%p1925_p13), %s1773_s7, 4294966528  ;;  %p17_p1 = scmp.ge.s32.totalorder %s2195_s24, 4   ;;  %s3834_s18 = smov %s2120_s19 }
 0x36e   : > { %s3835_s19 = smov %s2124_s20  ;;  %s3836_s20 = smov %s2206_s27 }
 0x36f   : > { %s3837_s21 = smov %s2195_s24  ;;  %19 = sbr.rel (!%p17_p1) target bundleno = 5 (0x5), region = 93 }
 0x376   :  { %1778 = vsyncpa [#allocation5], 1 }
 0x377   :  { %1780 = vsyncpa [#allocation5 + $0x1], 1 }
 0x378   :  { %1781 = vsyncpa [#allocation6], 1 }
 0x379   :  { %1783 = vsyncpa [#allocation6 + $0x1], 1 }
 0x37a   :  { %1784 = vsyncpa [#allocation8], 1 }

</bundles_post_ra>
